<compile_context>
chip_gen: v6e
topology: v6e:2x2x1
jax: 0.10.0
libtpu: 0.0.40
codegen_flags: <defaults>
</compile_context>

<pallas_src>
import jax
import jax.numpy as jnp
from jax.experimental import pallas as pl
from jax.experimental.pallas import tpu as pltpu


def _copy_kernel(x_ref, o_ref):
    # Straight VMEM copy of the current block (lane-dense, unmasked stores).
    o_ref[...] = x_ref[...]


# Below this, XLA's native copy wins; Pallas only adds launch/warm-up overhead.
_TINY_BYTES = 1 << 20  # 1 MiB


def _chip_budgets():
    """(max_block_bytes, vmem_limit_bytes) derived from the current chip."""
    try:
        info = pltpu.get_tpu_info()
        vmem_cap = int(getattr(info, "vmem_capacity_bytes", 64 << 20))
    except Exception:
        vmem_cap = 64 << 20  # conservative: v7x per-TC physical VMEM
    # Raise the scoped-VMEM limit: ~48 MiB on v7x (64 MiB physical),
    # 64 MiB on v5e/v6e (128 MiB physical).
    vmem_limit = min(3 * vmem_cap // 4, 64 << 20)
    # Double-buffered input + output holds ~4x the block; budget ~1/8 of the
    # limit per block (6 MiB v7x, 8 MiB v5e/v6e), never below the 2 MiB plateau.
    max_block = max(2 << 20, vmem_limit // 8)
    return max_block, vmem_limit


def _pick_block_rows(rows, lanes, itemsize, max_block_bytes):
    """Rows per block for the lane-dense 2D copy."""
    if rows <= 8:
        return rows  # full-dims exception
    max_rows = max(8, max_block_bytes // (lanes * itemsize))
    if rows <= max_rows:
        return rows  # whole array in one block
    # Prefer an even divisor of `rows` (unmasked vst on every step), aligned to
    # 32 (keeps sublanes whole for bf16 / int8 packing), then to 8.
    for align in (32, 8):
        best = 0
        d = align
        while d <= max_rows:
            if rows % d == 0:
                best = d
            d += align
        if best:
            return best
    # No aligned even divisor: 8-aligned tiles with a ragged (masked) last block.
    return (max_rows // 8) * 8


def _copy_leading_tiled(x, max_block, compiler_params):
    """Copy for shapes whose element count is not a multiple of 128.

    Keeps the trailing dims at full extent (full-dims exception) and tiles the
    leading dim so the block stays within the per-chip VMEM budget.
    """
    shape = tuple(x.shape)
    ndim = x.ndim
    itemsize = jnp.dtype(x.dtype).itemsize
    nbytes = x.size * itemsize

    if ndim < 2 or nbytes <= max_block:
        # Small enough (or 1-D): single full-array block.
        return pl.pallas_call(
            _copy_kernel,
            out_shape=jax.ShapeDtypeStruct(shape, x.dtype),
            grid=(1,),
            in_specs=[pl.BlockSpec(shape, lambda i: (0,) * ndim)],
            out_specs=pl.BlockSpec(shape, lambda i: (0,) * ndim),
            compiler_params=compiler_params,
        )(x)

    d0 = shape[0]
    rest_bytes = (x.size // d0) * itemsize
    max_b0 = max(1, max_block // rest_bytes)

    # Largest divisor of d0 <= max_b0.  For 2-D arrays the leading dim is the
    # sublane dim, so it must additionally be a multiple of 8 or equal d0.
    divisors = set()
    d = 1
    while d * d <= d0:
        if d0 % d == 0:
            divisors.add(d)
            divisors.add(d0 // d)
        d += 1
    b0 = 0
    for d in sorted(divisors):
        if d <= max_b0 and (ndim >= 3 or d % 8 == 0 or d == d0):
            b0 = d
    if b0 == 0:
        # No legal even divisor: ragged last block (still correct, masked).
        b0 = min(d0, max(8, (max_b0 // 8) * 8)) if ndim == 2 else max(1, max_b0)

    block_shape = (b0,) + shape[1:]
    grid = (pl.cdiv(d0, b0),)
    index_map = lambda i: (i,) + (0,) * (ndim - 1)
    return pl.pallas_call(
        _copy_kernel,
        out_shape=jax.ShapeDtypeStruct(shape, x.dtype),
        grid=grid,
        in_specs=[pl.BlockSpec(block_shape, index_map)],
        out_specs=pl.BlockSpec(block_shape, index_map),
        compiler_params=compiler_params,
    )(x)


def _identity_copy(x, block_bytes=None):
    """Materializing identity copy of `x` via an optimized Pallas copy kernel."""
    total = int(x.size)
    if total == 0:
        return x

    itemsize = jnp.dtype(x.dtype).itemsize
    nbytes = total * itemsize

    # Tiny tensors: fixed launch + pipeline warm-up dominates; XLA's native
    # copy is strictly better than any Pallas memcpy here.
    if nbytes < _TINY_BYTES:
        return jnp.copy(x)

    max_block, vmem_limit = _chip_budgets()
    if block_bytes is not None:
        max_block = int(block_bytes)

    # TODO(synk): on v7x verify plain "parallel" shards the row-tile axis across
    # both TensorCores; switch to pltpu.CORE_PARALLEL on that axis if it does not.
    compiler_params = pltpu.CompilerParams(
        dimension_semantics=("parallel",),
        vmem_limit_bytes=vmem_limit,
    )

    # Pick a lane-dense 2D view: last dim a multiple of 128 (prefer wide).
    lanes = None
    for cand in (1024, 512, 256, 128):
        if total % cand == 0:
            lanes = cand
            break

    if lanes is None:
        # Element count not a multiple of 128: tile the leading dim instead of
        # one giant unpipelined full-array block.
        return _copy_leading_tiled(x, max_block, compiler_params)

    rows = total // lanes
    x2d = x.reshape(rows, lanes)
    block_rows = _pick_block_rows(rows, lanes, itemsize, max_block)
    grid = (pl.cdiv(rows, block_rows),)

    out2d = pl.pallas_call(
        _copy_kernel,
        out_shape=jax.ShapeDtypeStruct((rows, lanes), x2d.dtype),
        grid=grid,
        in_specs=[pl.BlockSpec((block_rows, lanes), lambda i: (i, 0))],
        out_specs=pl.BlockSpec((block_rows, lanes), lambda i: (i, 0)),
        compiler_params=compiler_params,
    )(x2d)
    return out2d.reshape(x.shape)


def end_custom_blocks(inputs, materialize=False):
    """JAX equivalent of EndCustomBlocks.forward.

    inputs: (x, skip_list, index)
      x         : jnp.ndarray (NCHW)
      skip_list : list of unused skip-connection tensors (ignored)
      index     : Python int; if != 0 a warning is emitted.  NOTE: this fires
                  at trace time only and must be a static Python int (a
                  behavioral difference from the per-call PyTorch warning).
    materialize : if False (default), return x unchanged — the zero-cost path.
                  If True, route x through the optimized Pallas identity-copy
                  kernel (or an XLA copy for tiny tensors) for a fresh buffer.
    """
    x, skip_list, index = inputs
    del skip_list  # unused, matches the PyTorch module
    if index != 0:
        # TODO(synk): utils.ColorLogger.print(..., 'WARNING') replaced by plain print.
        print("WARNING: Unused skip-connections detected after end of custom block!")

    if not materialize:
        # Highest-value optimization: the module is a pure pass-through, so the
        # optimal "kernel" is no kernel — no HBM read/write, no launch overhead.
        return x
    return _identity_copy(x)


if __name__ == "__main__":
    key = jax.random.PRNGKey(0)
    kx, ks, kb, ko = jax.random.split(key, 4)

    # Small NCHW input consistent with a conv-net feature map.
    x = jax.random.normal(kx, (2, 4, 16, 16), dtype=jnp.float32)
    # An (unused) skip connection, as the module would receive.
    skip_list = [jax.random.normal(ks, (2, 4, 16, 16), dtype=jnp.float32)]
    index = 0  # no leftover skip connections -> no warning

    # Default (optimized) path: pure pass-through, no kernel, no HBM traffic.
    y_fast = end_custom_blocks((x, skip_list, index))
    assert y_fast is x

    # Materializing path on a tiny tensor: short-circuits to XLA's native copy.
    y = jax.block_until_ready(end_custom_blocks((x, skip_list, index), materialize=True))
    assert y.shape == x.shape and y.dtype == x.dtype
    assert bool(jnp.all(y == x))

    # Larger lane-dense input: default chip-derived block (single-block copy).
    x_big = jax.random.normal(kb, (8, 16, 64, 128), dtype=jnp.float32)  # 4 MiB
    y_big = jax.block_until_ready(end_custom_blocks((x_big, [], 0), materialize=True))
    assert y_big.shape == x_big.shape and y_big.dtype == x_big.dtype
    assert bool(jnp.all(y_big == x_big))

    # Force a small block cap to exercise the tiled (grid > 1, parallel) path.
    y_tiled = jax.block_until_ready(_identity_copy(x_big, block_bytes=1 << 20))
    assert bool(jnp.all(y_tiled == x_big))

    # Non-128-multiple element count: exercises the leading-dim-tiled fallback,
    # both as a single full-array block and with forced leading-dim tiling.
    x_odd = jax.random.normal(ko, (9, 3, 99, 131), dtype=jnp.float32)  # ~1.3 MiB
    y_odd = jax.block_until_ready(end_custom_blocks((x_odd, [], 0), materialize=True))
    assert bool(jnp.all(y_odd == x_odd))
    y_odd_tiled = jax.block_until_ready(_identity_copy(x_odd, block_bytes=512 * 1024))
    assert bool(jnp.all(y_odd_tiled == x_odd))

    print("KERNEL_OK")
</pallas_src>

<mosaic_0001>
module attributes {stable_mosaic.version = 11 : i64} {
  func.func @_copy_kernel(%arg0: i32, %arg1: memref<1024x1024xf32, #tpu.memory_space<vmem>>, %arg2: memref<1024x1024xf32, #tpu.memory_space<vmem>>) attributes {dimension_semantics = [#tpu.dimension_semantics<parallel>], iteration_bounds = array<i64: 1>, scalar_prefetch = 0 : i64, scratch_operands = 0 : i64, tpu.core_type = #tpu.core_type<tc>, window_params = [{transform_indices = @transform_0, window_bounds = array<i64: 1024, 1024>}, {transform_indices = @transform_1, window_bounds = array<i64: 1024, 1024>}]} {
    %c0 = arith.constant 0 : index
    %c0_0 = arith.constant 0 : index
    %0 = vector.load %arg1[%c0, %c0_0] : memref<1024x1024xf32, #tpu.memory_space<vmem>>, vector<1024x1024xf32>
    %c0_1 = arith.constant 0 : index
    %c0_2 = arith.constant 0 : index
    %1 = vector.load %arg2[%c0_1, %c0_2] : memref<1024x1024xf32, #tpu.memory_space<vmem>>, vector<1024x1024xf32>
    tpu.vector_store %arg2[%c0_1, %c0_2], %0 {strides = array<i32>} : memref<1024x1024xf32, #tpu.memory_space<vmem>>, vector<1024x1024xf32>,
    return
  }
  func.func @transform_0(%arg0: i32) -> (i32, i32) {
    %c0_i32 = arith.constant 0 : i32
    %c0_i32_0 = arith.constant 0 : i32
    return %arg0, %c0_i32 : i32, i32
  }
  func.func @transform_1(%arg0: i32) -> (i32, i32) {
    %c0_i32 = arith.constant 0 : i32
    %c0_i32_0 = arith.constant 0 : i32
    return %arg0, %c0_i32 : i32, i32
  }
}

</mosaic_0001>

<bundles_post_ra>
// kernel: tpu_custom_call.1
= control target key start
LH: loop header
LB: loop body
LE: loop exit
PB: predicated region body
PF: predicated region fallthrough
CT: control target
= control target key end

     0   :  { %6 = vsyncpa [#allocation3], 0  ;;  %s2162_s0 = inlined_call_operand.hbm [shape: f32[1024,1024], index: 0, kind: input, shape index: {}]   ;;  %s2163_s1 = inlined_call_operand.hbm [shape: f32[1024,1024], index: 1, kind: output, shape index: {}]  }
   0x1   :  { %7 = vsyncpa [#allocation4], 0  ;;  %s2136_s6 = smov [#allocation2]  }
   0x2   :  { %s13_s7 = sshll.u32 %s2136_s6, 4  ;;  %s14_s7 = int_to_ptr.vmem [resolvable:$true] %s13_s7 }
   0x3   :  { %s2100_s8 = scalar_lea.vmem %s14_s7, 131072  ;;  %p2105_p1 = scmp.lt.s32.totalorder %s14_s7, %s14_s7 }
   0x4   :  { %p2101_p0 = scmp.ne.s32.totalorder %s14_s7, %s2100_s8  ;;  %p2106_p2 = scmp.lt.s32.totalorder %s2100_s8, %s2100_s8 }
   0x6   :  { %p2107_p3 = por %p2106_p2, %p2105_p1 }
   0x8   :  { %p2108_p4 = pnand %p2107_p3, %p2101_p0 }
   0xa   :  { %2111 = shalt.err (!%p2108_p4)
}
   0xb   :  { %s2137_s9 = smov 1024   ;;  %s2138_s10 = smov 64  }
   0xc   :  { %19 = dma.hbm_to_vmem [thread:$0]  %s2162_s0, 131072, %s14_s7, [#allocation3], %s2137_s9, %s2137_s9, %s2138_s10  }
   0xd   :  { %2132 = dma.done.wait [#allocation3], 131072  }
   0xe   :  { %2133 = vsyncadd [#allocation3], 4294836224  ;;  %v23_v0 = vld [vmem:[#allocation2] sm:$0xff]  ;;  %v24_v1 = vld [vmem:[#allocation2 + $0x8] sm:$0xff]  ;;  %s2139_s0 = smov [#allocation5]  }
   0xf   :  { %v25_v2 = vld [vmem:[#allocation2 + $0x10] sm:$0xff]  ;;  %1047 = vst [vmem:[#allocation5] sm:$0xff] %v23_v0  ;;  %1048 = vst [vmem:[#allocation5 + $0x8] sm:$0xff] %v24_v1  ;;  %v26_v3 = vld [vmem:[#allocation2 + $0x18] sm:$0xff]  ;;  %s2076_s13 = sshll.u32 %s2139_s0, 4  ;;  %s2077_s13 = int_to_ptr.vmem [resolvable:$true] %s2076_s13 }
  0x10   :  { %1049 = vst [vmem:[#allocation5 + $0x10] sm:$0xff] %v25_v2  ;;  %v27_v4 = vld [vmem:[#allocation2 + $0x20] sm:$0xff]  ;;  %v28_v5 = vld [vmem:[#allocation2 + $0x28] sm:$0xff]  ;;  %1050 = vst [vmem:[#allocation5 + $0x18] sm:$0xff] %v26_v3  ;;  %s2112_s14 = scalar_lea.vmem %s2077_s13, 131072  ;;  %p2117_p6 = scmp.lt.s32.totalorder %s2077_s13, %s2077_s13 }
  0x11   :  { %1051 = vst [vmem:[#allocation5 + $0x20] sm:$0xff] %v27_v4  ;;  %1052 = vst [vmem:[#allocation5 + $0x28] sm:$0xff] %v28_v5  ;;  %v29_v6 = vld [vmem:[#allocation2 + $0x30] sm:$0xff]  ;;  %v30_v7 = vld [vmem:[#allocation2 + $0x38] sm:$0xff]  ;;  %p2113_p5 = scmp.ne.s32.totalorder %s2077_s13, %s2112_s14  ;;  %p2118_p7 = scmp.lt.s32.totalorder %s2112_s14, %s2112_s14 }
  0x12   :  { %v31_v8 = vld [vmem:[#allocation2 + $0x40] sm:$0xff]  ;;  %1053 = vst [vmem:[#allocation5 + $0x30] sm:$0xff] %v29_v6  ;;  %1054 = vst [vmem:[#allocation5 + $0x38] sm:$0xff] %v30_v7  ;;  %v32_v9 = vld [vmem:[#allocation2 + $0x48] sm:$0xff] }
  0x13   :  { %1055 = vst [vmem:[#allocation5 + $0x40] sm:$0xff] %v31_v8  ;;  %v33_v10 = vld [vmem:[#allocation2 + $0x50] sm:$0xff]  ;;  %v34_v11 = vld [vmem:[#allocation2 + $0x58] sm:$0xff]  ;;  %1056 = vst [vmem:[#allocation5 + $0x48] sm:$0xff] %v32_v9  ;;  %p2119_p8 = por %p2118_p7, %p2117_p6 }
  0x14   :  { %1057 = vst [vmem:[#allocation5 + $0x50] sm:$0xff] %v33_v10  ;;  %1058 = vst [vmem:[#allocation5 + $0x58] sm:$0xff] %v34_v11  ;;  %v35_v12 = vld [vmem:[#allocation2 + $0x60] sm:$0xff]  ;;  %v36_v13 = vld [vmem:[#allocation2 + $0x68] sm:$0xff] }
  0x15   :  { %v37_v14 = vld [vmem:[#allocation2 + $0x70] sm:$0xff]  ;;  %1059 = vst [vmem:[#allocation5 + $0x60] sm:$0xff] %v35_v12  ;;  %1060 = vst [vmem:[#allocation5 + $0x68] sm:$0xff] %v36_v13  ;;  %v38_v15 = vld [vmem:[#allocation2 + $0x78] sm:$0xff]  ;;  %p2120_p9 = pnand %p2119_p8, %p2113_p5 }
  0x16   :  { %1061 = vst [vmem:[#allocation5 + $0x70] sm:$0xff] %v37_v14  ;;  %v39_v16 = vld [vmem:[#allocation2 + $0x80] sm:$0xff]  ;;  %v40_v17 = vld [vmem:[#allocation2 + $0x88] sm:$0xff]  ;;  %1062 = vst [vmem:[#allocation5 + $0x78] sm:$0xff] %v38_v15 }
  0x17   :  { %1063 = vst [vmem:[#allocation5 + $0x80] sm:$0xff] %v39_v16  ;;  %1064 = vst [vmem:[#allocation5 + $0x88] sm:$0xff] %v40_v17  ;;  %v41_v18 = vld [vmem:[#allocation2 + $0x90] sm:$0xff]  ;;  %v42_v19 = vld [vmem:[#allocation2 + $0x98] sm:$0xff] }
  0x18   :  { %v43_v20 = vld [vmem:[#allocation2 + $0xa0] sm:$0xff]  ;;  %1065 = vst [vmem:[#allocation5 + $0x90] sm:$0xff] %v41_v18  ;;  %1066 = vst [vmem:[#allocation5 + $0x98] sm:$0xff] %v42_v19  ;;  %v44_v21 = vld [vmem:[#allocation2 + $0xa8] sm:$0xff] }
  0x19   :  { %1067 = vst [vmem:[#allocation5 + $0xa0] sm:$0xff] %v43_v20  ;;  %v45_v22 = vld [vmem:[#allocation2 + $0xb0] sm:$0xff]  ;;  %v46_v23 = vld [vmem:[#allocation2 + $0xb8] sm:$0xff]  ;;  %1068 = vst [vmem:[#allocation5 + $0xa8] sm:$0xff] %v44_v21 }
  0x1a   :  { %1069 = vst [vmem:[#allocation5 + $0xb0] sm:$0xff] %v45_v22  ;;  %1070 = vst [vmem:[#allocation5 + $0xb8] sm:$0xff] %v46_v23  ;;  %v47_v24 = vld [vmem:[#allocation2 + $0xc0] sm:$0xff]  ;;  %v48_v25 = vld [vmem:[#allocation2 + $0xc8] sm:$0xff] }
  0x1b   :  { %v49_v26 = vld [vmem:[#allocation2 + $0xd0] sm:$0xff]  ;;  %1071 = vst [vmem:[#allocation5 + $0xc0] sm:$0xff] %v47_v24  ;;  %1072 = vst [vmem:[#allocation5 + $0xc8] sm:$0xff] %v48_v25  ;;  %v50_v27 = vld [vmem:[#allocation2 + $0xd8] sm:$0xff] }
  0x1c   :  { %1073 = vst [vmem:[#allocation5 + $0xd0] sm:$0xff] %v49_v26  ;;  %v51_v28 = vld [vmem:[#allocation2 + $0xe0] sm:$0xff]  ;;  %v52_v29 = vld [vmem:[#allocation2 + $0xe8] sm:$0xff]  ;;  %1074 = vst [vmem:[#allocation5 + $0xd8] sm:$0xff] %v50_v27 }
  0x1d   :  { %1075 = vst [vmem:[#allocation5 + $0xe0] sm:$0xff] %v51_v28  ;;  %1076 = vst [vmem:[#allocation5 + $0xe8] sm:$0xff] %v52_v29  ;;  %v53_v30 = vld [vmem:[#allocation2 + $0xf0] sm:$0xff]  ;;  %v54_v31 = vld [vmem:[#allocation2 + $0xf8] sm:$0xff] }
  0x1e   :  { %v55_v32 = vld [vmem:[#allocation2 + $0x100] sm:$0xff]  ;;  %1077 = vst [vmem:[#allocation5 + $0xf0] sm:$0xff] %v53_v30  ;;  %1078 = vst [vmem:[#allocation5 + $0xf8] sm:$0xff] %v54_v31  ;;  %v56_v33 = vld [vmem:[#allocation2 + $0x108] sm:$0xff] }
  0x1f   :  { %1079 = vst [vmem:[#allocation5 + $0x100] sm:$0xff] %v55_v32  ;;  %v57_v34 = vld [vmem:[#allocation2 + $0x110] sm:$0xff]  ;;  %v58_v35 = vld [vmem:[#allocation2 + $0x118] sm:$0xff]  ;;  %1080 = vst [vmem:[#allocation5 + $0x108] sm:$0xff] %v56_v33 }
  0x20   :  { %1081 = vst [vmem:[#allocation5 + $0x110] sm:$0xff] %v57_v34  ;;  %1082 = vst [vmem:[#allocation5 + $0x118] sm:$0xff] %v58_v35  ;;  %v59_v36 = vld [vmem:[#allocation2 + $0x120] sm:$0xff]  ;;  %v60_v37 = vld [vmem:[#allocation2 + $0x128] sm:$0xff] }
  0x21   :  { %v61_v38 = vld [vmem:[#allocation2 + $0x130] sm:$0xff]  ;;  %1083 = vst [vmem:[#allocation5 + $0x120] sm:$0xff] %v59_v36  ;;  %1084 = vst [vmem:[#allocation5 + $0x128] sm:$0xff] %v60_v37  ;;  %v62_v39 = vld [vmem:[#allocation2 + $0x138] sm:$0xff] }
  0x22   :  { %1085 = vst [vmem:[#allocation5 + $0x130] sm:$0xff] %v61_v38  ;;  %v63_v40 = vld [vmem:[#allocation2 + $0x140] sm:$0xff]  ;;  %v64_v41 = vld [vmem:[#allocation2 + $0x148] sm:$0xff]  ;;  %1086 = vst [vmem:[#allocation5 + $0x138] sm:$0xff] %v62_v39 }
  0x23   :  { %1087 = vst [vmem:[#allocation5 + $0x140] sm:$0xff] %v63_v40  ;;  %1088 = vst [vmem:[#allocation5 + $0x148] sm:$0xff] %v64_v41  ;;  %v65_v42 = vld [vmem:[#allocation2 + $0x150] sm:$0xff]  ;;  %v66_v43 = vld [vmem:[#allocation2 + $0x158] sm:$0xff] }
  0x24   :  { %v67_v44 = vld [vmem:[#allocation2 + $0x160] sm:$0xff]  ;;  %1089 = vst [vmem:[#allocation5 + $0x150] sm:$0xff] %v65_v42  ;;  %1090 = vst [vmem:[#allocation5 + $0x158] sm:$0xff] %v66_v43  ;;  %v68_v45 = vld [vmem:[#allocation2 + $0x168] sm:$0xff] }
  0x25   :  { %1091 = vst [vmem:[#allocation5 + $0x160] sm:$0xff] %v67_v44  ;;  %v69_v46 = vld [vmem:[#allocation2 + $0x170] sm:$0xff]  ;;  %v70_v47 = vld [vmem:[#allocation2 + $0x178] sm:$0xff]  ;;  %1092 = vst [vmem:[#allocation5 + $0x168] sm:$0xff] %v68_v45 }
  0x26   :  { %1093 = vst [vmem:[#allocation5 + $0x170] sm:$0xff] %v69_v46  ;;  %1094 = vst [vmem:[#allocation5 + $0x178] sm:$0xff] %v70_v47  ;;  %v71_v48 = vld [vmem:[#allocation2 + $0x180] sm:$0xff]  ;;  %v72_v49 = vld [vmem:[#allocation2 + $0x188] sm:$0xff] }
  0x27   :  { %v73_v50 = vld [vmem:[#allocation2 + $0x190] sm:$0xff]  ;;  %1095 = vst [vmem:[#allocation5 + $0x180] sm:$0xff] %v71_v48  ;;  %1096 = vst [vmem:[#allocation5 + $0x188] sm:$0xff] %v72_v49  ;;  %v74_v51 = vld [vmem:[#allocation2 + $0x198] sm:$0xff] }
  0x28   :  { %1097 = vst [vmem:[#allocation5 + $0x190] sm:$0xff] %v73_v50  ;;  %v75_v52 = vld [vmem:[#allocation2 + $0x1a0] sm:$0xff]  ;;  %v76_v53 = vld [vmem:[#allocation2 + $0x1a8] sm:$0xff]  ;;  %1098 = vst [vmem:[#allocation5 + $0x198] sm:$0xff] %v74_v51 }
  0x29   :  { %1099 = vst [vmem:[#allocation5 + $0x1a0] sm:$0xff] %v75_v52  ;;  %1100 = vst [vmem:[#allocation5 + $0x1a8] sm:$0xff] %v76_v53  ;;  %v77_v54 = vld [vmem:[#allocation2 + $0x1b0] sm:$0xff]  ;;  %v78_v55 = vld [vmem:[#allocation2 + $0x1b8] sm:$0xff] }
  0x2a   :  { %v79_v56 = vld [vmem:[#allocation2 + $0x1c0] sm:$0xff]  ;;  %1101 = vst [vmem:[#allocation5 + $0x1b0] sm:$0xff] %v77_v54  ;;  %1102 = vst [vmem:[#allocation5 + $0x1b8] sm:$0xff] %v78_v55  ;;  %v80_v57 = vld [vmem:[#allocation2 + $0x1c8] sm:$0xff] }
  0x2b   :  { %1103 = vst [vmem:[#allocation5 + $0x1c0] sm:$0xff] %v79_v56  ;;  %v81_v58 = vld [vmem:[#allocation2 + $0x1d0] sm:$0xff]  ;;  %v82_v59 = vld [vmem:[#allocation2 + $0x1d8] sm:$0xff]  ;;  %1104 = vst [vmem:[#allocation5 + $0x1c8] sm:$0xff] %v80_v57 }
  0x2c   :  { %1105 = vst [vmem:[#allocation5 + $0x1d0] sm:$0xff] %v81_v58  ;;  %1106 = vst [vmem:[#allocation5 + $0x1d8] sm:$0xff] %v82_v59  ;;  %v83_v60 = vld [vmem:[#allocation2 + $0x1e0] sm:$0xff]  ;;  %v84_v61 = vld [vmem:[#allocation2 + $0x1e8] sm:$0xff] }
  0x2d   :  { %v85_v62 = vld [vmem:[#allocation2 + $0x1f0] sm:$0xff]  ;;  %1107 = vst [vmem:[#allocation5 + $0x1e0] sm:$0xff] %v83_v60  ;;  %1108 = vst [vmem:[#allocation5 + $0x1e8] sm:$0xff] %v84_v61  ;;  %v86_v63 = vld [vmem:[#allocation2 + $0x1f8] sm:$0xff] }
  0x2e   :  { %1109 = vst [vmem:[#allocation5 + $0x1f0] sm:$0xff] %v85_v62  ;;  %v87_v0 = vld [vmem:[#allocation2 + $0x200] sm:$0xff]  ;;  %v88_v1 = vld [vmem:[#allocation2 + $0x208] sm:$0xff]  ;;  %1110 = vst [vmem:[#allocation5 + $0x1f8] sm:$0xff] %v86_v63 }
  0x2f   :  { %1111 = vst [vmem:[#allocation5 + $0x200] sm:$0xff] %v87_v0  ;;  %1112 = vst [vmem:[#allocation5 + $0x208] sm:$0xff] %v88_v1  ;;  %v89_v2 = vld [vmem:[#allocation2 + $0x210] sm:$0xff]  ;;  %v90_v3 = vld [vmem:[#allocation2 + $0x218] sm:$0xff] }
  0x30   :  { %v91_v4 = vld [vmem:[#allocation2 + $0x220] sm:$0xff]  ;;  %1113 = vst [vmem:[#allocation5 + $0x210] sm:$0xff] %v89_v2  ;;  %1114 = vst [vmem:[#allocation5 + $0x218] sm:$0xff] %v90_v3  ;;  %v92_v5 = vld [vmem:[#allocation2 + $0x228] sm:$0xff] }
  0x31   :  { %1115 = vst [vmem:[#allocation5 + $0x220] sm:$0xff] %v91_v4  ;;  %v93_v6 = vld [vmem:[#allocation2 + $0x230] sm:$0xff]  ;;  %v94_v7 = vld [vmem:[#allocation2 + $0x238] sm:$0xff]  ;;  %1116 = vst [vmem:[#allocation5 + $0x228] sm:$0xff] %v92_v5 }
  0x32   :  { %1117 = vst [vmem:[#allocation5 + $0x230] sm:$0xff] %v93_v6  ;;  %1118 = vst [vmem:[#allocation5 + $0x238] sm:$0xff] %v94_v7  ;;  %v95_v8 = vld [vmem:[#allocation2 + $0x240] sm:$0xff]  ;;  %v96_v9 = vld [vmem:[#allocation2 + $0x248] sm:$0xff] }
  0x33   :  { %v97_v10 = vld [vmem:[#allocation2 + $0x250] sm:$0xff]  ;;  %1119 = vst [vmem:[#allocation5 + $0x240] sm:$0xff] %v95_v8  ;;  %1120 = vst [vmem:[#allocation5 + $0x248] sm:$0xff] %v96_v9  ;;  %v98_v11 = vld [vmem:[#allocation2 + $0x258] sm:$0xff] }
  0x34   :  { %1121 = vst [vmem:[#allocation5 + $0x250] sm:$0xff] %v97_v10  ;;  %v99_v12 = vld [vmem:[#allocation2 + $0x260] sm:$0xff]  ;;  %v100_v13 = vld [vmem:[#allocation2 + $0x268] sm:$0xff]  ;;  %1122 = vst [vmem:[#allocation5 + $0x258] sm:$0xff] %v98_v11 }
  0x35   :  { %1123 = vst [vmem:[#allocation5 + $0x260] sm:$0xff] %v99_v12  ;;  %1124 = vst [vmem:[#allocation5 + $0x268] sm:$0xff] %v100_v13  ;;  %v101_v14 = vld [vmem:[#allocation2 + $0x270] sm:$0xff]  ;;  %v102_v15 = vld [vmem:[#allocation2 + $0x278] sm:$0xff] }
  0x36   :  { %v103_v16 = vld [vmem:[#allocation2 + $0x280] sm:$0xff]  ;;  %1125 = vst [vmem:[#allocation5 + $0x270] sm:$0xff] %v101_v14  ;;  %1126 = vst [vmem:[#allocation5 + $0x278] sm:$0xff] %v102_v15  ;;  %v104_v17 = vld [vmem:[#allocation2 + $0x288] sm:$0xff] }
  0x37   :  { %1127 = vst [vmem:[#allocation5 + $0x280] sm:$0xff] %v103_v16  ;;  %v105_v18 = vld [vmem:[#allocation2 + $0x290] sm:$0xff]  ;;  %v106_v19 = vld [vmem:[#allocation2 + $0x298] sm:$0xff]  ;;  %1128 = vst [vmem:[#allocation5 + $0x288] sm:$0xff] %v104_v17 }
  0x38   :  { %1129 = vst [vmem:[#allocation5 + $0x290] sm:$0xff] %v105_v18  ;;  %1130 = vst [vmem:[#allocation5 + $0x298] sm:$0xff] %v106_v19  ;;  %v107_v20 = vld [vmem:[#allocation2 + $0x2a0] sm:$0xff]  ;;  %v108_v21 = vld [vmem:[#allocation2 + $0x2a8] sm:$0xff] }
  0x39   :  { %v109_v22 = vld [vmem:[#allocation2 + $0x2b0] sm:$0xff]  ;;  %1131 = vst [vmem:[#allocation5 + $0x2a0] sm:$0xff] %v107_v20  ;;  %1132 = vst [vmem:[#allocation5 + $0x2a8] sm:$0xff] %v108_v21  ;;  %v110_v23 = vld [vmem:[#allocation2 + $0x2b8] sm:$0xff] }
  0x3a   :  { %1133 = vst [vmem:[#allocation5 + $0x2b0] sm:$0xff] %v109_v22  ;;  %v111_v24 = vld [vmem:[#allocation2 + $0x2c0] sm:$0xff]  ;;  %v112_v25 = vld [vmem:[#allocation2 + $0x2c8] sm:$0xff]  ;;  %1134 = vst [vmem:[#allocation5 + $0x2b8] sm:$0xff] %v110_v23 }
  0x3b   :  { %1135 = vst [vmem:[#allocation5 + $0x2c0] sm:$0xff] %v111_v24  ;;  %1136 = vst [vmem:[#allocation5 + $0x2c8] sm:$0xff] %v112_v25  ;;  %v113_v26 = vld [vmem:[#allocation2 + $0x2d0] sm:$0xff]  ;;  %v114_v27 = vld [vmem:[#allocation2 + $0x2d8] sm:$0xff] }
  0x3c   :  { %v115_v28 = vld [vmem:[#allocation2 + $0x2e0] sm:$0xff]  ;;  %1137 = vst [vmem:[#allocation5 + $0x2d0] sm:$0xff] %v113_v26  ;;  %1138 = vst [vmem:[#allocation5 + $0x2d8] sm:$0xff] %v114_v27  ;;  %v116_v29 = vld [vmem:[#allocation2 + $0x2e8] sm:$0xff] }
  0x3d   :  { %1139 = vst [vmem:[#allocation5 + $0x2e0] sm:$0xff] %v115_v28  ;;  %v117_v30 = vld [vmem:[#allocation2 + $0x2f0] sm:$0xff]  ;;  %v118_v31 = vld [vmem:[#allocation2 + $0x2f8] sm:$0xff]  ;;  %1140 = vst [vmem:[#allocation5 + $0x2e8] sm:$0xff] %v116_v29 }
  0x3e   :  { %1141 = vst [vmem:[#allocation5 + $0x2f0] sm:$0xff] %v117_v30  ;;  %1142 = vst [vmem:[#allocation5 + $0x2f8] sm:$0xff] %v118_v31  ;;  %v119_v32 = vld [vmem:[#allocation2 + $0x300] sm:$0xff]  ;;  %v120_v33 = vld [vmem:[#allocation2 + $0x308] sm:$0xff] }
  0x3f   :  { %v121_v34 = vld [vmem:[#allocation2 + $0x310] sm:$0xff]  ;;  %1143 = vst [vmem:[#allocation5 + $0x300] sm:$0xff] %v119_v32  ;;  %1144 = vst [vmem:[#allocation5 + $0x308] sm:$0xff] %v120_v33  ;;  %v122_v35 = vld [vmem:[#allocation2 + $0x318] sm:$0xff] }
  0x40   :  { %1145 = vst [vmem:[#allocation5 + $0x310] sm:$0xff] %v121_v34  ;;  %v123_v36 = vld [vmem:[#allocation2 + $0x320] sm:$0xff]  ;;  %v124_v37 = vld [vmem:[#allocation2 + $0x328] sm:$0xff]  ;;  %1146 = vst [vmem:[#allocation5 + $0x318] sm:$0xff] %v122_v35 }
  0x41   :  { %1147 = vst [vmem:[#allocation5 + $0x320] sm:$0xff] %v123_v36  ;;  %1148 = vst [vmem:[#allocation5 + $0x328] sm:$0xff] %v124_v37  ;;  %v125_v38 = vld [vmem:[#allocation2 + $0x330] sm:$0xff]  ;;  %v126_v39 = vld [vmem:[#allocation2 + $0x338] sm:$0xff] }
  0x42   :  { %v127_v40 = vld [vmem:[#allocation2 + $0x340] sm:$0xff]  ;;  %1149 = vst [vmem:[#allocation5 + $0x330] sm:$0xff] %v125_v38  ;;  %1150 = vst [vmem:[#allocation5 + $0x338] sm:$0xff] %v126_v39  ;;  %v128_v41 = vld [vmem:[#allocation2 + $0x348] sm:$0xff] }
  0x43   :  { %1151 = vst [vmem:[#allocation5 + $0x340] sm:$0xff] %v127_v40  ;;  %v129_v42 = vld [vmem:[#allocation2 + $0x350] sm:$0xff]  ;;  %v130_v43 = vld [vmem:[#allocation2 + $0x358] sm:$0xff]  ;;  %1152 = vst [vmem:[#allocation5 + $0x348] sm:$0xff] %v128_v41 }
  0x44   :  { %1153 = vst [vmem:[#allocation5 + $0x350] sm:$0xff] %v129_v42  ;;  %1154 = vst [vmem:[#allocation5 + $0x358] sm:$0xff] %v130_v43  ;;  %v131_v44 = vld [vmem:[#allocation2 + $0x360] sm:$0xff]  ;;  %v132_v45 = vld [vmem:[#allocation2 + $0x368] sm:$0xff] }
  0x45   :  { %v133_v46 = vld [vmem:[#allocation2 + $0x370] sm:$0xff]  ;;  %1155 = vst [vmem:[#allocation5 + $0x360] sm:$0xff] %v131_v44  ;;  %1156 = vst [vmem:[#allocation5 + $0x368] sm:$0xff] %v132_v45  ;;  %v134_v47 = vld [vmem:[#allocation2 + $0x378] sm:$0xff] }
  0x46   :  { %1157 = vst [vmem:[#allocation5 + $0x370] sm:$0xff] %v133_v46  ;;  %v135_v48 = vld [vmem:[#allocation2 + $0x380] sm:$0xff]  ;;  %v136_v49 = vld [vmem:[#allocation2 + $0x388] sm:$0xff]  ;;  %1158 = vst [vmem:[#allocation5 + $0x378] sm:$0xff] %v134_v47 }
  0x47   :  { %1159 = vst [vmem:[#allocation5 + $0x380] sm:$0xff] %v135_v48  ;;  %1160 = vst [vmem:[#allocation5 + $0x388] sm:$0xff] %v136_v49  ;;  %v137_v50 = vld [vmem:[#allocation2 + $0x390] sm:$0xff]  ;;  %v138_v51 = vld [vmem:[#allocation2 + $0x398] sm:$0xff] }
  0x48   :  { %v139_v52 = vld [vmem:[#allocation2 + $0x3a0] sm:$0xff]  ;;  %1161 = vst [vmem:[#allocation5 + $0x390] sm:$0xff] %v137_v50  ;;  %1162 = vst [vmem:[#allocation5 + $0x398] sm:$0xff] %v138_v51  ;;  %v140_v53 = vld [vmem:[#allocation2 + $0x3a8] sm:$0xff] }
  0x49   :  { %1163 = vst [vmem:[#allocation5 + $0x3a0] sm:$0xff] %v139_v52  ;;  %v141_v54 = vld [vmem:[#allocation2 + $0x3b0] sm:$0xff]  ;;  %v142_v55 = vld [vmem:[#allocation2 + $0x3b8] sm:$0xff]  ;;  %1164 = vst [vmem:[#allocation5 + $0x3a8] sm:$0xff] %v140_v53 }
  0x4a   :  { %1165 = vst [vmem:[#allocation5 + $0x3b0] sm:$0xff] %v141_v54  ;;  %1166 = vst [vmem:[#allocation5 + $0x3b8] sm:$0xff] %v142_v55  ;;  %v143_v56 = vld [vmem:[#allocation2 + $0x3c0] sm:$0xff]  ;;  %v144_v57 = vld [vmem:[#allocation2 + $0x3c8] sm:$0xff] }
  0x4b   :  { %v145_v58 = vld [vmem:[#allocation2 + $0x3d0] sm:$0xff]  ;;  %1167 = vst [vmem:[#allocation5 + $0x3c0] sm:$0xff] %v143_v56  ;;  %1168 = vst [vmem:[#allocation5 + $0x3c8] sm:$0xff] %v144_v57  ;;  %v146_v59 = vld [vmem:[#allocation2 + $0x3d8] sm:$0xff] }
  0x4c   :  { %1169 = vst [vmem:[#allocation5 + $0x3d0] sm:$0xff] %v145_v58  ;;  %v147_v60 = vld [vmem:[#allocation2 + $0x3e0] sm:$0xff]  ;;  %v148_v61 = vld [vmem:[#allocation2 + $0x3e8] sm:$0xff]  ;;  %1170 = vst [vmem:[#allocation5 + $0x3d8] sm:$0xff] %v146_v59 }
  0x4d   :  { %1171 = vst [vmem:[#allocation5 + $0x3e0] sm:$0xff] %v147_v60  ;;  %1172 = vst [vmem:[#allocation5 + $0x3e8] sm:$0xff] %v148_v61  ;;  %v149_v62 = vld [vmem:[#allocation2 + $0x3f0] sm:$0xff]  ;;  %v150_v63 = vld [vmem:[#allocation2 + $0x3f8] sm:$0xff] }
  0x4e   :  { %v151_v0 = vld [vmem:[#allocation2 + $0x400] sm:$0xff]  ;;  %1173 = vst [vmem:[#allocation5 + $0x3f0] sm:$0xff] %v149_v62  ;;  %1174 = vst [vmem:[#allocation5 + $0x3f8] sm:$0xff] %v150_v63  ;;  %v152_v1 = vld [vmem:[#allocation2 + $0x408] sm:$0xff] }
  0x4f   :  { %1175 = vst [vmem:[#allocation5 + $0x400] sm:$0xff] %v151_v0  ;;  %v153_v2 = vld [vmem:[#allocation2 + $0x410] sm:$0xff]  ;;  %v154_v3 = vld [vmem:[#allocation2 + $0x418] sm:$0xff]  ;;  %1176 = vst [vmem:[#allocation5 + $0x408] sm:$0xff] %v152_v1 }
  0x50   :  { %1177 = vst [vmem:[#allocation5 + $0x410] sm:$0xff] %v153_v2  ;;  %1178 = vst [vmem:[#allocation5 + $0x418] sm:$0xff] %v154_v3  ;;  %v155_v4 = vld [vmem:[#allocation2 + $0x420] sm:$0xff]  ;;  %v156_v5 = vld [vmem:[#allocation2 + $0x428] sm:$0xff] }
  0x51   :  { %v157_v6 = vld [vmem:[#allocation2 + $0x430] sm:$0xff]  ;;  %1179 = vst [vmem:[#allocation5 + $0x420] sm:$0xff] %v155_v4  ;;  %1180 = vst [vmem:[#allocation5 + $0x428] sm:$0xff] %v156_v5  ;;  %v158_v7 = vld [vmem:[#allocation2 + $0x438] sm:$0xff] }
  0x52   :  { %1181 = vst [vmem:[#allocation5 + $0x430] sm:$0xff] %v157_v6  ;;  %v159_v8 = vld [vmem:[#allocation2 + $0x440] sm:$0xff]  ;;  %v160_v9 = vld [vmem:[#allocation2 + $0x448] sm:$0xff]  ;;  %1182 = vst [vmem:[#allocation5 + $0x438] sm:$0xff] %v158_v7 }
  0x53   :  { %1183 = vst [vmem:[#allocation5 + $0x440] sm:$0xff] %v159_v8  ;;  %1184 = vst [vmem:[#allocation5 + $0x448] sm:$0xff] %v160_v9  ;;  %v161_v10 = vld [vmem:[#allocation2 + $0x450] sm:$0xff]  ;;  %v162_v11 = vld [vmem:[#allocation2 + $0x458] sm:$0xff] }
  0x54   :  { %v163_v12 = vld [vmem:[#allocation2 + $0x460] sm:$0xff]  ;;  %1185 = vst [vmem:[#allocation5 + $0x450] sm:$0xff] %v161_v10  ;;  %1186 = vst [vmem:[#allocation5 + $0x458] sm:$0xff] %v162_v11  ;;  %v164_v13 = vld [vmem:[#allocation2 + $0x468] sm:$0xff] }
  0x55   :  { %1187 = vst [vmem:[#allocation5 + $0x460] sm:$0xff] %v163_v12  ;;  %v165_v14 = vld [vmem:[#allocation2 + $0x470] sm:$0xff]  ;;  %v166_v15 = vld [vmem:[#allocation2 + $0x478] sm:$0xff]  ;;  %1188 = vst [vmem:[#allocation5 + $0x468] sm:$0xff] %v164_v13 }
  0x56   :  { %1189 = vst [vmem:[#allocation5 + $0x470] sm:$0xff] %v165_v14  ;;  %1190 = vst [vmem:[#allocation5 + $0x478] sm:$0xff] %v166_v15  ;;  %v167_v16 = vld [vmem:[#allocation2 + $0x480] sm:$0xff]  ;;  %v168_v17 = vld [vmem:[#allocation2 + $0x488] sm:$0xff] }
  0x57   :  { %v169_v18 = vld [vmem:[#allocation2 + $0x490] sm:$0xff]  ;;  %1191 = vst [vmem:[#allocation5 + $0x480] sm:$0xff] %v167_v16  ;;  %1192 = vst [vmem:[#allocation5 + $0x488] sm:$0xff] %v168_v17  ;;  %v170_v19 = vld [vmem:[#allocation2 + $0x498] sm:$0xff] }
  0x58   :  { %1193 = vst [vmem:[#allocation5 + $0x490] sm:$0xff] %v169_v18  ;;  %v171_v20 = vld [vmem:[#allocation2 + $0x4a0] sm:$0xff]  ;;  %v172_v21 = vld [vmem:[#allocation2 + $0x4a8] sm:$0xff]  ;;  %1194 = vst [vmem:[#allocation5 + $0x498] sm:$0xff] %v170_v19 }
  0x59   :  { %1195 = vst [vmem:[#allocation5 + $0x4a0] sm:$0xff] %v171_v20  ;;  %1196 = vst [vmem:[#allocation5 + $0x4a8] sm:$0xff] %v172_v21  ;;  %v173_v22 = vld [vmem:[#allocation2 + $0x4b0] sm:$0xff]  ;;  %v174_v23 = vld [vmem:[#allocation2 + $0x4b8] sm:$0xff] }
  0x5a   :  { %v175_v24 = vld [vmem:[#allocation2 + $0x4c0] sm:$0xff]  ;;  %1197 = vst [vmem:[#allocation5 + $0x4b0] sm:$0xff] %v173_v22  ;;  %1198 = vst [vmem:[#allocation5 + $0x4b8] sm:$0xff] %v174_v23  ;;  %v176_v25 = vld [vmem:[#allocation2 + $0x4c8] sm:$0xff] }
  0x5b   :  { %1199 = vst [vmem:[#allocation5 + $0x4c0] sm:$0xff] %v175_v24  ;;  %v177_v26 = vld [vmem:[#allocation2 + $0x4d0] sm:$0xff]  ;;  %v178_v27 = vld [vmem:[#allocation2 + $0x4d8] sm:$0xff]  ;;  %1200 = vst [vmem:[#allocation5 + $0x4c8] sm:$0xff] %v176_v25 }
  0x5c   :  { %1201 = vst [vmem:[#allocation5 + $0x4d0] sm:$0xff] %v177_v26  ;;  %1202 = vst [vmem:[#allocation5 + $0x4d8] sm:$0xff] %v178_v27  ;;  %v179_v28 = vld [vmem:[#allocation2 + $0x4e0] sm:$0xff]  ;;  %v180_v29 = vld [vmem:[#allocation2 + $0x4e8] sm:$0xff] }
  0x5d   :  { %v181_v30 = vld [vmem:[#allocation2 + $0x4f0] sm:$0xff]  ;;  %1203 = vst [vmem:[#allocation5 + $0x4e0] sm:$0xff] %v179_v28  ;;  %1204 = vst [vmem:[#allocation5 + $0x4e8] sm:$0xff] %v180_v29  ;;  %v182_v31 = vld [vmem:[#allocation2 + $0x4f8] sm:$0xff] }
  0x5e   :  { %1205 = vst [vmem:[#allocation5 + $0x4f0] sm:$0xff] %v181_v30  ;;  %v183_v32 = vld [vmem:[#allocation2 + $0x500] sm:$0xff]  ;;  %v184_v33 = vld [vmem:[#allocation2 + $0x508] sm:$0xff]  ;;  %1206 = vst [vmem:[#allocation5 + $0x4f8] sm:$0xff] %v182_v31 }
  0x5f   :  { %1207 = vst [vmem:[#allocation5 + $0x500] sm:$0xff] %v183_v32  ;;  %1208 = vst [vmem:[#allocation5 + $0x508] sm:$0xff] %v184_v33  ;;  %v185_v34 = vld [vmem:[#allocation2 + $0x510] sm:$0xff]  ;;  %v186_v35 = vld [vmem:[#allocation2 + $0x518] sm:$0xff] }
  0x60   :  { %v187_v36 = vld [vmem:[#allocation2 + $0x520] sm:$0xff]  ;;  %1209 = vst [vmem:[#allocation5 + $0x510] sm:$0xff] %v185_v34  ;;  %1210 = vst [vmem:[#allocation5 + $0x518] sm:$0xff] %v186_v35  ;;  %v188_v37 = vld [vmem:[#allocation2 + $0x528] sm:$0xff] }
  0x61   :  { %1211 = vst [vmem:[#allocation5 + $0x520] sm:$0xff] %v187_v36  ;;  %v189_v38 = vld [vmem:[#allocation2 + $0x530] sm:$0xff]  ;;  %v190_v39 = vld [vmem:[#allocation2 + $0x538] sm:$0xff]  ;;  %1212 = vst [vmem:[#allocation5 + $0x528] sm:$0xff] %v188_v37 }
  0x62   :  { %1213 = vst [vmem:[#allocation5 + $0x530] sm:$0xff] %v189_v38  ;;  %1214 = vst [vmem:[#allocation5 + $0x538] sm:$0xff] %v190_v39  ;;  %v191_v40 = vld [vmem:[#allocation2 + $0x540] sm:$0xff]  ;;  %v192_v41 = vld [vmem:[#allocation2 + $0x548] sm:$0xff] }
  0x63   :  { %v193_v42 = vld [vmem:[#allocation2 + $0x550] sm:$0xff]  ;;  %1215 = vst [vmem:[#allocation5 + $0x540] sm:$0xff] %v191_v40  ;;  %1216 = vst [vmem:[#allocation5 + $0x548] sm:$0xff] %v192_v41  ;;  %v194_v43 = vld [vmem:[#allocation2 + $0x558] sm:$0xff] }
  0x64   :  { %1217 = vst [vmem:[#allocation5 + $0x550] sm:$0xff] %v193_v42  ;;  %v195_v44 = vld [vmem:[#allocation2 + $0x560] sm:$0xff]  ;;  %v196_v45 = vld [vmem:[#allocation2 + $0x568] sm:$0xff]  ;;  %1218 = vst [vmem:[#allocation5 + $0x558] sm:$0xff] %v194_v43 }
  0x65   :  { %1219 = vst [vmem:[#allocation5 + $0x560] sm:$0xff] %v195_v44  ;;  %1220 = vst [vmem:[#allocation5 + $0x568] sm:$0xff] %v196_v45  ;;  %v197_v46 = vld [vmem:[#allocation2 + $0x570] sm:$0xff]  ;;  %v198_v47 = vld [vmem:[#allocation2 + $0x578] sm:$0xff] }
  0x66   :  { %v199_v48 = vld [vmem:[#allocation2 + $0x580] sm:$0xff]  ;;  %1221 = vst [vmem:[#allocation5 + $0x570] sm:$0xff] %v197_v46  ;;  %1222 = vst [vmem:[#allocation5 + $0x578] sm:$0xff] %v198_v47  ;;  %v200_v49 = vld [vmem:[#allocation2 + $0x588] sm:$0xff] }
  0x67   :  { %1223 = vst [vmem:[#allocation5 + $0x580] sm:$0xff] %v199_v48  ;;  %v201_v50 = vld [vmem:[#allocation2 + $0x590] sm:$0xff]  ;;  %v202_v51 = vld [vmem:[#allocation2 + $0x598] sm:$0xff]  ;;  %1224 = vst [vmem:[#allocation5 + $0x588] sm:$0xff] %v200_v49 }
  0x68   :  { %1225 = vst [vmem:[#allocation5 + $0x590] sm:$0xff] %v201_v50  ;;  %1226 = vst [vmem:[#allocation5 + $0x598] sm:$0xff] %v202_v51  ;;  %v203_v52 = vld [vmem:[#allocation2 + $0x5a0] sm:$0xff]  ;;  %v204_v53 = vld [vmem:[#allocation2 + $0x5a8] sm:$0xff] }
  0x69   :  { %v205_v54 = vld [vmem:[#allocation2 + $0x5b0] sm:$0xff]  ;;  %1227 = vst [vmem:[#allocation5 + $0x5a0] sm:$0xff] %v203_v52  ;;  %1228 = vst [vmem:[#allocation5 + $0x5a8] sm:$0xff] %v204_v53  ;;  %v206_v55 = vld [vmem:[#allocation2 + $0x5b8] sm:$0xff] }
  0x6a   :  { %1229 = vst [vmem:[#allocation5 + $0x5b0] sm:$0xff] %v205_v54  ;;  %v207_v56 = vld [vmem:[#allocation2 + $0x5c0] sm:$0xff]  ;;  %v208_v57 = vld [vmem:[#allocation2 + $0x5c8] sm:$0xff]  ;;  %1230 = vst [vmem:[#allocation5 + $0x5b8] sm:$0xff] %v206_v55 }
  0x6b   :  { %1231 = vst [vmem:[#allocation5 + $0x5c0] sm:$0xff] %v207_v56  ;;  %1232 = vst [vmem:[#allocation5 + $0x5c8] sm:$0xff] %v208_v57  ;;  %v209_v58 = vld [vmem:[#allocation2 + $0x5d0] sm:$0xff]  ;;  %v210_v59 = vld [vmem:[#allocation2 + $0x5d8] sm:$0xff] }
  0x6c   :  { %v211_v60 = vld [vmem:[#allocation2 + $0x5e0] sm:$0xff]  ;;  %1233 = vst [vmem:[#allocation5 + $0x5d0] sm:$0xff] %v209_v58  ;;  %1234 = vst [vmem:[#allocation5 + $0x5d8] sm:$0xff] %v210_v59  ;;  %v212_v61 = vld [vmem:[#allocation2 + $0x5e8] sm:$0xff] }
  0x6d   :  { %1235 = vst [vmem:[#allocation5 + $0x5e0] sm:$0xff] %v211_v60  ;;  %v213_v62 = vld [vmem:[#allocation2 + $0x5f0] sm:$0xff]  ;;  %v214_v63 = vld [vmem:[#allocation2 + $0x5f8] sm:$0xff]  ;;  %1236 = vst [vmem:[#allocation5 + $0x5e8] sm:$0xff] %v212_v61 }
  0x6e   :  { %1237 = vst [vmem:[#allocation5 + $0x5f0] sm:$0xff] %v213_v62  ;;  %1238 = vst [vmem:[#allocation5 + $0x5f8] sm:$0xff] %v214_v63  ;;  %v215_v0 = vld [vmem:[#allocation2 + $0x600] sm:$0xff]  ;;  %v216_v1 = vld [vmem:[#allocation2 + $0x608] sm:$0xff] }
  0x6f   :  { %v217_v2 = vld [vmem:[#allocation2 + $0x610] sm:$0xff]  ;;  %1239 = vst [vmem:[#allocation5 + $0x600] sm:$0xff] %v215_v0  ;;  %1240 = vst [vmem:[#allocation5 + $0x608] sm:$0xff] %v216_v1  ;;  %v218_v3 = vld [vmem:[#allocation2 + $0x618] sm:$0xff] }
  0x70   :  { %1241 = vst [vmem:[#allocation5 + $0x610] sm:$0xff] %v217_v2  ;;  %v219_v4 = vld [vmem:[#allocation2 + $0x620] sm:$0xff]  ;;  %v220_v5 = vld [vmem:[#allocation2 + $0x628] sm:$0xff]  ;;  %1242 = vst [vmem:[#allocation5 + $0x618] sm:$0xff] %v218_v3 }
  0x71   :  { %1243 = vst [vmem:[#allocation5 + $0x620] sm:$0xff] %v219_v4  ;;  %1244 = vst [vmem:[#allocation5 + $0x628] sm:$0xff] %v220_v5  ;;  %v221_v6 = vld [vmem:[#allocation2 + $0x630] sm:$0xff]  ;;  %v222_v7 = vld [vmem:[#allocation2 + $0x638] sm:$0xff] }
  0x72   :  { %v223_v8 = vld [vmem:[#allocation2 + $0x640] sm:$0xff]  ;;  %1245 = vst [vmem:[#allocation5 + $0x630] sm:$0xff] %v221_v6  ;;  %1246 = vst [vmem:[#allocation5 + $0x638] sm:$0xff] %v222_v7  ;;  %v224_v9 = vld [vmem:[#allocation2 + $0x648] sm:$0xff] }
  0x73   :  { %1247 = vst [vmem:[#allocation5 + $0x640] sm:$0xff] %v223_v8  ;;  %v225_v10 = vld [vmem:[#allocation2 + $0x650] sm:$0xff]  ;;  %v226_v11 = vld [vmem:[#allocation2 + $0x658] sm:$0xff]  ;;  %1248 = vst [vmem:[#allocation5 + $0x648] sm:$0xff] %v224_v9 }
  0x74   :  { %1249 = vst [vmem:[#allocation5 + $0x650] sm:$0xff] %v225_v10  ;;  %1250 = vst [vmem:[#allocation5 + $0x658] sm:$0xff] %v226_v11  ;;  %v227_v12 = vld [vmem:[#allocation2 + $0x660] sm:$0xff]  ;;  %v228_v13 = vld [vmem:[#allocation2 + $0x668] sm:$0xff] }
  0x75   :  { %v229_v14 = vld [vmem:[#allocation2 + $0x670] sm:$0xff]  ;;  %1251 = vst [vmem:[#allocation5 + $0x660] sm:$0xff] %v227_v12  ;;  %1252 = vst [vmem:[#allocation5 + $0x668] sm:$0xff] %v228_v13  ;;  %v230_v15 = vld [vmem:[#allocation2 + $0x678] sm:$0xff] }
  0x76   :  { %1253 = vst [vmem:[#allocation5 + $0x670] sm:$0xff] %v229_v14  ;;  %v231_v16 = vld [vmem:[#allocation2 + $0x680] sm:$0xff]  ;;  %v232_v17 = vld [vmem:[#allocation2 + $0x688] sm:$0xff]  ;;  %1254 = vst [vmem:[#allocation5 + $0x678] sm:$0xff] %v230_v15 }
  0x77   :  { %1255 = vst [vmem:[#allocation5 + $0x680] sm:$0xff] %v231_v16  ;;  %1256 = vst [vmem:[#allocation5 + $0x688] sm:$0xff] %v232_v17  ;;  %v233_v18 = vld [vmem:[#allocation2 + $0x690] sm:$0xff]  ;;  %v234_v19 = vld [vmem:[#allocation2 + $0x698] sm:$0xff] }
  0x78   :  { %v235_v20 = vld [vmem:[#allocation2 + $0x6a0] sm:$0xff]  ;;  %1257 = vst [vmem:[#allocation5 + $0x690] sm:$0xff] %v233_v18  ;;  %1258 = vst [vmem:[#allocation5 + $0x698] sm:$0xff] %v234_v19  ;;  %v236_v21 = vld [vmem:[#allocation2 + $0x6a8] sm:$0xff] }
  0x79   :  { %1259 = vst [vmem:[#allocation5 + $0x6a0] sm:$0xff] %v235_v20  ;;  %v237_v22 = vld [vmem:[#allocation2 + $0x6b0] sm:$0xff]  ;;  %v238_v23 = vld [vmem:[#allocation2 + $0x6b8] sm:$0xff]  ;;  %1260 = vst [vmem:[#allocation5 + $0x6a8] sm:$0xff] %v236_v21 }
  0x7a   :  { %1261 = vst [vmem:[#allocation5 + $0x6b0] sm:$0xff] %v237_v22  ;;  %1262 = vst [vmem:[#allocation5 + $0x6b8] sm:$0xff] %v238_v23  ;;  %v239_v24 = vld [vmem:[#allocation2 + $0x6c0] sm:$0xff]  ;;  %v240_v25 = vld [vmem:[#allocation2 + $0x6c8] sm:$0xff] }
  0x7b   :  { %v241_v26 = vld [vmem:[#allocation2 + $0x6d0] sm:$0xff]  ;;  %1263 = vst [vmem:[#allocation5 + $0x6c0] sm:$0xff] %v239_v24  ;;  %1264 = vst [vmem:[#allocation5 + $0x6c8] sm:$0xff] %v240_v25  ;;  %v242_v27 = vld [vmem:[#allocation2 + $0x6d8] sm:$0xff] }
  0x7c   :  { %1265 = vst [vmem:[#allocation5 + $0x6d0] sm:$0xff] %v241_v26  ;;  %v243_v28 = vld [vmem:[#allocation2 + $0x6e0] sm:$0xff]  ;;  %v244_v29 = vld [vmem:[#allocation2 + $0x6e8] sm:$0xff]  ;;  %1266 = vst [vmem:[#allocation5 + $0x6d8] sm:$0xff] %v242_v27 }
  0x7d   :  { %1267 = vst [vmem:[#allocation5 + $0x6e0] sm:$0xff] %v243_v28  ;;  %1268 = vst [vmem:[#allocation5 + $0x6e8] sm:$0xff] %v244_v29  ;;  %v245_v30 = vld [vmem:[#allocation2 + $0x6f0] sm:$0xff]  ;;  %v246_v31 = vld [vmem:[#allocation2 + $0x6f8] sm:$0xff] }
  0x7e   :  { %v247_v32 = vld [vmem:[#allocation2 + $0x700] sm:$0xff]  ;;  %1269 = vst [vmem:[#allocation5 + $0x6f0] sm:$0xff] %v245_v30  ;;  %1270 = vst [vmem:[#allocation5 + $0x6f8] sm:$0xff] %v246_v31  ;;  %v248_v33 = vld [vmem:[#allocation2 + $0x708] sm:$0xff] }
  0x7f   :  { %1271 = vst [vmem:[#allocation5 + $0x700] sm:$0xff] %v247_v32  ;;  %v249_v34 = vld [vmem:[#allocation2 + $0x710] sm:$0xff]  ;;  %v250_v35 = vld [vmem:[#allocation2 + $0x718] sm:$0xff]  ;;  %1272 = vst [vmem:[#allocation5 + $0x708] sm:$0xff] %v248_v33 }
  0x80   :  { %1273 = vst [vmem:[#allocation5 + $0x710] sm:$0xff] %v249_v34  ;;  %1274 = vst [vmem:[#allocation5 + $0x718] sm:$0xff] %v250_v35  ;;  %v251_v36 = vld [vmem:[#allocation2 + $0x720] sm:$0xff]  ;;  %v252_v37 = vld [vmem:[#allocation2 + $0x728] sm:$0xff] }
  0x81   :  { %v253_v38 = vld [vmem:[#allocation2 + $0x730] sm:$0xff]  ;;  %1275 = vst [vmem:[#allocation5 + $0x720] sm:$0xff] %v251_v36  ;;  %1276 = vst [vmem:[#allocation5 + $0x728] sm:$0xff] %v252_v37  ;;  %v254_v39 = vld [vmem:[#allocation2 + $0x738] sm:$0xff] }
  0x82   :  { %1277 = vst [vmem:[#allocation5 + $0x730] sm:$0xff] %v253_v38  ;;  %v255_v40 = vld [vmem:[#allocation2 + $0x740] sm:$0xff]  ;;  %v256_v41 = vld [vmem:[#allocation2 + $0x748] sm:$0xff]  ;;  %1278 = vst [vmem:[#allocation5 + $0x738] sm:$0xff] %v254_v39 }
  0x83   :  { %1279 = vst [vmem:[#allocation5 + $0x740] sm:$0xff] %v255_v40  ;;  %1280 = vst [vmem:[#allocation5 + $0x748] sm:$0xff] %v256_v41  ;;  %v257_v42 = vld [vmem:[#allocation2 + $0x750] sm:$0xff]  ;;  %v258_v43 = vld [vmem:[#allocation2 + $0x758] sm:$0xff] }
  0x84   :  { %v259_v44 = vld [vmem:[#allocation2 + $0x760] sm:$0xff]  ;;  %1281 = vst [vmem:[#allocation5 + $0x750] sm:$0xff] %v257_v42  ;;  %1282 = vst [vmem:[#allocation5 + $0x758] sm:$0xff] %v258_v43  ;;  %v260_v45 = vld [vmem:[#allocation2 + $0x768] sm:$0xff] }
  0x85   :  { %1283 = vst [vmem:[#allocation5 + $0x760] sm:$0xff] %v259_v44  ;;  %v261_v46 = vld [vmem:[#allocation2 + $0x770] sm:$0xff]  ;;  %v262_v47 = vld [vmem:[#allocation2 + $0x778] sm:$0xff]  ;;  %1284 = vst [vmem:[#allocation5 + $0x768] sm:$0xff] %v260_v45 }
  0x86   :  { %1285 = vst [vmem:[#allocation5 + $0x770] sm:$0xff] %v261_v46  ;;  %1286 = vst [vmem:[#allocation5 + $0x778] sm:$0xff] %v262_v47  ;;  %v263_v48 = vld [vmem:[#allocation2 + $0x780] sm:$0xff]  ;;  %v264_v49 = vld [vmem:[#allocation2 + $0x788] sm:$0xff] }
  0x87   :  { %v265_v50 = vld [vmem:[#allocation2 + $0x790] sm:$0xff]  ;;  %1287 = vst [vmem:[#allocation5 + $0x780] sm:$0xff] %v263_v48  ;;  %1288 = vst [vmem:[#allocation5 + $0x788] sm:$0xff] %v264_v49  ;;  %v266_v51 = vld [vmem:[#allocation2 + $0x798] sm:$0xff] }
  0x88   :  { %1289 = vst [vmem:[#allocation5 + $0x790] sm:$0xff] %v265_v50  ;;  %v267_v52 = vld [vmem:[#allocation2 + $0x7a0] sm:$0xff]  ;;  %v268_v53 = vld [vmem:[#allocation2 + $0x7a8] sm:$0xff]  ;;  %1290 = vst [vmem:[#allocation5 + $0x798] sm:$0xff] %v266_v51 }
  0x89   :  { %1291 = vst [vmem:[#allocation5 + $0x7a0] sm:$0xff] %v267_v52  ;;  %1292 = vst [vmem:[#allocation5 + $0x7a8] sm:$0xff] %v268_v53  ;;  %v269_v54 = vld [vmem:[#allocation2 + $0x7b0] sm:$0xff]  ;;  %v270_v55 = vld [vmem:[#allocation2 + $0x7b8] sm:$0xff] }
  0x8a   :  { %v271_v56 = vld [vmem:[#allocation2 + $0x7c0] sm:$0xff]  ;;  %1293 = vst [vmem:[#allocation5 + $0x7b0] sm:$0xff] %v269_v54  ;;  %1294 = vst [vmem:[#allocation5 + $0x7b8] sm:$0xff] %v270_v55  ;;  %v272_v57 = vld [vmem:[#allocation2 + $0x7c8] sm:$0xff] }
  0x8b   :  { %1295 = vst [vmem:[#allocation5 + $0x7c0] sm:$0xff] %v271_v56  ;;  %v273_v58 = vld [vmem:[#allocation2 + $0x7d0] sm:$0xff]  ;;  %v274_v59 = vld [vmem:[#allocation2 + $0x7d8] sm:$0xff]  ;;  %1296 = vst [vmem:[#allocation5 + $0x7c8] sm:$0xff] %v272_v57 }
  0x8c   :  { %1297 = vst [vmem:[#allocation5 + $0x7d0] sm:$0xff] %v273_v58  ;;  %1298 = vst [vmem:[#allocation5 + $0x7d8] sm:$0xff] %v274_v59  ;;  %v275_v60 = vld [vmem:[#allocation2 + $0x7e0] sm:$0xff]  ;;  %v276_v61 = vld [vmem:[#allocation2 + $0x7e8] sm:$0xff] }
  0x8d   :  { %v277_v62 = vld [vmem:[#allocation2 + $0x7f0] sm:$0xff]  ;;  %1299 = vst [vmem:[#allocation5 + $0x7e0] sm:$0xff] %v275_v60  ;;  %1300 = vst [vmem:[#allocation5 + $0x7e8] sm:$0xff] %v276_v61  ;;  %v278_v63 = vld [vmem:[#allocation2 + $0x7f8] sm:$0xff] }
  0x8e   :  { %1301 = vst [vmem:[#allocation5 + $0x7f0] sm:$0xff] %v277_v62  ;;  %v279_v0 = vld [vmem:[#allocation2 + $0x800] sm:$0xff]  ;;  %v280_v1 = vld [vmem:[#allocation2 + $0x808] sm:$0xff]  ;;  %1302 = vst [vmem:[#allocation5 + $0x7f8] sm:$0xff] %v278_v63 }
  0x8f   :  { %1303 = vst [vmem:[#allocation5 + $0x800] sm:$0xff] %v279_v0  ;;  %1304 = vst [vmem:[#allocation5 + $0x808] sm:$0xff] %v280_v1  ;;  %v281_v2 = vld [vmem:[#allocation2 + $0x810] sm:$0xff]  ;;  %v282_v3 = vld [vmem:[#allocation2 + $0x818] sm:$0xff] }
  0x90   :  { %v283_v4 = vld [vmem:[#allocation2 + $0x820] sm:$0xff]  ;;  %1305 = vst [vmem:[#allocation5 + $0x810] sm:$0xff] %v281_v2  ;;  %1306 = vst [vmem:[#allocation5 + $0x818] sm:$0xff] %v282_v3  ;;  %v284_v5 = vld [vmem:[#allocation2 + $0x828] sm:$0xff] }
  0x91   :  { %1307 = vst [vmem:[#allocation5 + $0x820] sm:$0xff] %v283_v4  ;;  %v285_v6 = vld [vmem:[#allocation2 + $0x830] sm:$0xff]  ;;  %v286_v7 = vld [vmem:[#allocation2 + $0x838] sm:$0xff]  ;;  %1308 = vst [vmem:[#allocation5 + $0x828] sm:$0xff] %v284_v5 }
  0x92   :  { %1309 = vst [vmem:[#allocation5 + $0x830] sm:$0xff] %v285_v6  ;;  %1310 = vst [vmem:[#allocation5 + $0x838] sm:$0xff] %v286_v7  ;;  %v287_v8 = vld [vmem:[#allocation2 + $0x840] sm:$0xff]  ;;  %v288_v9 = vld [vmem:[#allocation2 + $0x848] sm:$0xff] }
  0x93   :  { %v289_v10 = vld [vmem:[#allocation2 + $0x850] sm:$0xff]  ;;  %1311 = vst [vmem:[#allocation5 + $0x840] sm:$0xff] %v287_v8  ;;  %1312 = vst [vmem:[#allocation5 + $0x848] sm:$0xff] %v288_v9  ;;  %v290_v11 = vld [vmem:[#allocation2 + $0x858] sm:$0xff] }
  0x94   :  { %1313 = vst [vmem:[#allocation5 + $0x850] sm:$0xff] %v289_v10  ;;  %v291_v12 = vld [vmem:[#allocation2 + $0x860] sm:$0xff]  ;;  %v292_v13 = vld [vmem:[#allocation2 + $0x868] sm:$0xff]  ;;  %1314 = vst [vmem:[#allocation5 + $0x858] sm:$0xff] %v290_v11 }
  0x95   :  { %1315 = vst [vmem:[#allocation5 + $0x860] sm:$0xff] %v291_v12  ;;  %1316 = vst [vmem:[#allocation5 + $0x868] sm:$0xff] %v292_v13  ;;  %v293_v14 = vld [vmem:[#allocation2 + $0x870] sm:$0xff]  ;;  %v294_v15 = vld [vmem:[#allocation2 + $0x878] sm:$0xff] }
  0x96   :  { %v295_v16 = vld [vmem:[#allocation2 + $0x880] sm:$0xff]  ;;  %1317 = vst [vmem:[#allocation5 + $0x870] sm:$0xff] %v293_v14  ;;  %1318 = vst [vmem:[#allocation5 + $0x878] sm:$0xff] %v294_v15  ;;  %v296_v17 = vld [vmem:[#allocation2 + $0x888] sm:$0xff] }
  0x97   :  { %1319 = vst [vmem:[#allocation5 + $0x880] sm:$0xff] %v295_v16  ;;  %v297_v18 = vld [vmem:[#allocation2 + $0x890] sm:$0xff]  ;;  %v298_v19 = vld [vmem:[#allocation2 + $0x898] sm:$0xff]  ;;  %1320 = vst [vmem:[#allocation5 + $0x888] sm:$0xff] %v296_v17 }
  0x98   :  { %1321 = vst [vmem:[#allocation5 + $0x890] sm:$0xff] %v297_v18  ;;  %1322 = vst [vmem:[#allocation5 + $0x898] sm:$0xff] %v298_v19  ;;  %v299_v20 = vld [vmem:[#allocation2 + $0x8a0] sm:$0xff]  ;;  %v300_v21 = vld [vmem:[#allocation2 + $0x8a8] sm:$0xff] }
  0x99   :  { %v301_v22 = vld [vmem:[#allocation2 + $0x8b0] sm:$0xff]  ;;  %1323 = vst [vmem:[#allocation5 + $0x8a0] sm:$0xff] %v299_v20  ;;  %1324 = vst [vmem:[#allocation5 + $0x8a8] sm:$0xff] %v300_v21  ;;  %v302_v23 = vld [vmem:[#allocation2 + $0x8b8] sm:$0xff] }
  0x9a   :  { %1325 = vst [vmem:[#allocation5 + $0x8b0] sm:$0xff] %v301_v22  ;;  %v303_v24 = vld [vmem:[#allocation2 + $0x8c0] sm:$0xff]  ;;  %v304_v25 = vld [vmem:[#allocation2 + $0x8c8] sm:$0xff]  ;;  %1326 = vst [vmem:[#allocation5 + $0x8b8] sm:$0xff] %v302_v23 }
  0x9b   :  { %1327 = vst [vmem:[#allocation5 + $0x8c0] sm:$0xff] %v303_v24  ;;  %1328 = vst [vmem:[#allocation5 + $0x8c8] sm:$0xff] %v304_v25  ;;  %v305_v26 = vld [vmem:[#allocation2 + $0x8d0] sm:$0xff]  ;;  %v306_v27 = vld [vmem:[#allocation2 + $0x8d8] sm:$0xff] }
  0x9c   :  { %v307_v28 = vld [vmem:[#allocation2 + $0x8e0] sm:$0xff]  ;;  %1329 = vst [vmem:[#allocation5 + $0x8d0] sm:$0xff] %v305_v26  ;;  %1330 = vst [vmem:[#allocation5 + $0x8d8] sm:$0xff] %v306_v27  ;;  %v308_v29 = vld [vmem:[#allocation2 + $0x8e8] sm:$0xff] }
  0x9d   :  { %1331 = vst [vmem:[#allocation5 + $0x8e0] sm:$0xff] %v307_v28  ;;  %v309_v30 = vld [vmem:[#allocation2 + $0x8f0] sm:$0xff]  ;;  %v310_v31 = vld [vmem:[#allocation2 + $0x8f8] sm:$0xff]  ;;  %1332 = vst [vmem:[#allocation5 + $0x8e8] sm:$0xff] %v308_v29 }
  0x9e   :  { %1333 = vst [vmem:[#allocation5 + $0x8f0] sm:$0xff] %v309_v30  ;;  %1334 = vst [vmem:[#allocation5 + $0x8f8] sm:$0xff] %v310_v31  ;;  %v311_v32 = vld [vmem:[#allocation2 + $0x900] sm:$0xff]  ;;  %v312_v33 = vld [vmem:[#allocation2 + $0x908] sm:$0xff] }
  0x9f   :  { %v313_v34 = vld [vmem:[#allocation2 + $0x910] sm:$0xff]  ;;  %1335 = vst [vmem:[#allocation5 + $0x900] sm:$0xff] %v311_v32  ;;  %1336 = vst [vmem:[#allocation5 + $0x908] sm:$0xff] %v312_v33  ;;  %v314_v35 = vld [vmem:[#allocation2 + $0x918] sm:$0xff] }
  0xa0   :  { %1337 = vst [vmem:[#allocation5 + $0x910] sm:$0xff] %v313_v34  ;;  %v315_v36 = vld [vmem:[#allocation2 + $0x920] sm:$0xff]  ;;  %v316_v37 = vld [vmem:[#allocation2 + $0x928] sm:$0xff]  ;;  %1338 = vst [vmem:[#allocation5 + $0x918] sm:$0xff] %v314_v35 }
  0xa1   :  { %1339 = vst [vmem:[#allocation5 + $0x920] sm:$0xff] %v315_v36  ;;  %1340 = vst [vmem:[#allocation5 + $0x928] sm:$0xff] %v316_v37  ;;  %v317_v38 = vld [vmem:[#allocation2 + $0x930] sm:$0xff]  ;;  %v318_v39 = vld [vmem:[#allocation2 + $0x938] sm:$0xff] }
  0xa2   :  { %v319_v40 = vld [vmem:[#allocation2 + $0x940] sm:$0xff]  ;;  %1341 = vst [vmem:[#allocation5 + $0x930] sm:$0xff] %v317_v38  ;;  %1342 = vst [vmem:[#allocation5 + $0x938] sm:$0xff] %v318_v39  ;;  %v320_v41 = vld [vmem:[#allocation2 + $0x948] sm:$0xff] }
  0xa3   :  { %1343 = vst [vmem:[#allocation5 + $0x940] sm:$0xff] %v319_v40  ;;  %v321_v42 = vld [vmem:[#allocation2 + $0x950] sm:$0xff]  ;;  %v322_v43 = vld [vmem:[#allocation2 + $0x958] sm:$0xff]  ;;  %1344 = vst [vmem:[#allocation5 + $0x948] sm:$0xff] %v320_v41 }
  0xa4   :  { %1345 = vst [vmem:[#allocation5 + $0x950] sm:$0xff] %v321_v42  ;;  %1346 = vst [vmem:[#allocation5 + $0x958] sm:$0xff] %v322_v43  ;;  %v323_v44 = vld [vmem:[#allocation2 + $0x960] sm:$0xff]  ;;  %v324_v45 = vld [vmem:[#allocation2 + $0x968] sm:$0xff] }
  0xa5   :  { %v325_v46 = vld [vmem:[#allocation2 + $0x970] sm:$0xff]  ;;  %1347 = vst [vmem:[#allocation5 + $0x960] sm:$0xff] %v323_v44  ;;  %1348 = vst [vmem:[#allocation5 + $0x968] sm:$0xff] %v324_v45  ;;  %v326_v47 = vld [vmem:[#allocation2 + $0x978] sm:$0xff] }
  0xa6   :  { %1349 = vst [vmem:[#allocation5 + $0x970] sm:$0xff] %v325_v46  ;;  %v327_v48 = vld [vmem:[#allocation2 + $0x980] sm:$0xff]  ;;  %v328_v49 = vld [vmem:[#allocation2 + $0x988] sm:$0xff]  ;;  %1350 = vst [vmem:[#allocation5 + $0x978] sm:$0xff] %v326_v47 }
  0xa7   :  { %1351 = vst [vmem:[#allocation5 + $0x980] sm:$0xff] %v327_v48  ;;  %1352 = vst [vmem:[#allocation5 + $0x988] sm:$0xff] %v328_v49  ;;  %v329_v50 = vld [vmem:[#allocation2 + $0x990] sm:$0xff]  ;;  %v330_v51 = vld [vmem:[#allocation2 + $0x998] sm:$0xff] }
  0xa8   :  { %v331_v52 = vld [vmem:[#allocation2 + $0x9a0] sm:$0xff]  ;;  %1353 = vst [vmem:[#allocation5 + $0x990] sm:$0xff] %v329_v50  ;;  %1354 = vst [vmem:[#allocation5 + $0x998] sm:$0xff] %v330_v51  ;;  %v332_v53 = vld [vmem:[#allocation2 + $0x9a8] sm:$0xff] }
  0xa9   :  { %1355 = vst [vmem:[#allocation5 + $0x9a0] sm:$0xff] %v331_v52  ;;  %v333_v54 = vld [vmem:[#allocation2 + $0x9b0] sm:$0xff]  ;;  %v334_v55 = vld [vmem:[#allocation2 + $0x9b8] sm:$0xff]  ;;  %1356 = vst [vmem:[#allocation5 + $0x9a8] sm:$0xff] %v332_v53 }
  0xaa   :  { %1357 = vst [vmem:[#allocation5 + $0x9b0] sm:$0xff] %v333_v54  ;;  %1358 = vst [vmem:[#allocation5 + $0x9b8] sm:$0xff] %v334_v55  ;;  %v335_v56 = vld [vmem:[#allocation2 + $0x9c0] sm:$0xff]  ;;  %v336_v57 = vld [vmem:[#allocation2 + $0x9c8] sm:$0xff] }
  0xab   :  { %v337_v58 = vld [vmem:[#allocation2 + $0x9d0] sm:$0xff]  ;;  %1359 = vst [vmem:[#allocation5 + $0x9c0] sm:$0xff] %v335_v56  ;;  %1360 = vst [vmem:[#allocation5 + $0x9c8] sm:$0xff] %v336_v57  ;;  %v338_v59 = vld [vmem:[#allocation2 + $0x9d8] sm:$0xff] }
  0xac   :  { %1361 = vst [vmem:[#allocation5 + $0x9d0] sm:$0xff] %v337_v58  ;;  %v339_v60 = vld [vmem:[#allocation2 + $0x9e0] sm:$0xff]  ;;  %v340_v61 = vld [vmem:[#allocation2 + $0x9e8] sm:$0xff]  ;;  %1362 = vst [vmem:[#allocation5 + $0x9d8] sm:$0xff] %v338_v59 }
  0xad   :  { %1363 = vst [vmem:[#allocation5 + $0x9e0] sm:$0xff] %v339_v60  ;;  %1364 = vst [vmem:[#allocation5 + $0x9e8] sm:$0xff] %v340_v61  ;;  %v341_v62 = vld [vmem:[#allocation2 + $0x9f0] sm:$0xff]  ;;  %v342_v63 = vld [vmem:[#allocation2 + $0x9f8] sm:$0xff] }
  0xae   :  { %v343_v0 = vld [vmem:[#allocation2 + $0xa00] sm:$0xff]  ;;  %1365 = vst [vmem:[#allocation5 + $0x9f0] sm:$0xff] %v341_v62  ;;  %1366 = vst [vmem:[#allocation5 + $0x9f8] sm:$0xff] %v342_v63  ;;  %v344_v1 = vld [vmem:[#allocation2 + $0xa08] sm:$0xff] }
  0xaf   :  { %1367 = vst [vmem:[#allocation5 + $0xa00] sm:$0xff] %v343_v0  ;;  %v345_v2 = vld [vmem:[#allocation2 + $0xa10] sm:$0xff]  ;;  %v346_v3 = vld [vmem:[#allocation2 + $0xa18] sm:$0xff]  ;;  %1368 = vst [vmem:[#allocation5 + $0xa08] sm:$0xff] %v344_v1 }
  0xb0   :  { %1369 = vst [vmem:[#allocation5 + $0xa10] sm:$0xff] %v345_v2  ;;  %1370 = vst [vmem:[#allocation5 + $0xa18] sm:$0xff] %v346_v3  ;;  %v347_v4 = vld [vmem:[#allocation2 + $0xa20] sm:$0xff]  ;;  %v348_v5 = vld [vmem:[#allocation2 + $0xa28] sm:$0xff] }
  0xb1   :  { %v349_v6 = vld [vmem:[#allocation2 + $0xa30] sm:$0xff]  ;;  %1371 = vst [vmem:[#allocation5 + $0xa20] sm:$0xff] %v347_v4  ;;  %1372 = vst [vmem:[#allocation5 + $0xa28] sm:$0xff] %v348_v5  ;;  %v350_v7 = vld [vmem:[#allocation2 + $0xa38] sm:$0xff] }
  0xb2   :  { %1373 = vst [vmem:[#allocation5 + $0xa30] sm:$0xff] %v349_v6  ;;  %v351_v8 = vld [vmem:[#allocation2 + $0xa40] sm:$0xff]  ;;  %v352_v9 = vld [vmem:[#allocation2 + $0xa48] sm:$0xff]  ;;  %1374 = vst [vmem:[#allocation5 + $0xa38] sm:$0xff] %v350_v7 }
  0xb3   :  { %1375 = vst [vmem:[#allocation5 + $0xa40] sm:$0xff] %v351_v8  ;;  %1376 = vst [vmem:[#allocation5 + $0xa48] sm:$0xff] %v352_v9  ;;  %v353_v10 = vld [vmem:[#allocation2 + $0xa50] sm:$0xff]  ;;  %v354_v11 = vld [vmem:[#allocation2 + $0xa58] sm:$0xff] }
  0xb4   :  { %v355_v12 = vld [vmem:[#allocation2 + $0xa60] sm:$0xff]  ;;  %1377 = vst [vmem:[#allocation5 + $0xa50] sm:$0xff] %v353_v10  ;;  %1378 = vst [vmem:[#allocation5 + $0xa58] sm:$0xff] %v354_v11  ;;  %v356_v13 = vld [vmem:[#allocation2 + $0xa68] sm:$0xff] }
  0xb5   :  { %1379 = vst [vmem:[#allocation5 + $0xa60] sm:$0xff] %v355_v12  ;;  %v357_v14 = vld [vmem:[#allocation2 + $0xa70] sm:$0xff]  ;;  %v358_v15 = vld [vmem:[#allocation2 + $0xa78] sm:$0xff]  ;;  %1380 = vst [vmem:[#allocation5 + $0xa68] sm:$0xff] %v356_v13 }
  0xb6   :  { %1381 = vst [vmem:[#allocation5 + $0xa70] sm:$0xff] %v357_v14  ;;  %1382 = vst [vmem:[#allocation5 + $0xa78] sm:$0xff] %v358_v15  ;;  %v359_v16 = vld [vmem:[#allocation2 + $0xa80] sm:$0xff]  ;;  %v360_v17 = vld [vmem:[#allocation2 + $0xa88] sm:$0xff] }
  0xb7   :  { %v361_v18 = vld [vmem:[#allocation2 + $0xa90] sm:$0xff]  ;;  %1383 = vst [vmem:[#allocation5 + $0xa80] sm:$0xff] %v359_v16  ;;  %1384 = vst [vmem:[#allocation5 + $0xa88] sm:$0xff] %v360_v17  ;;  %v362_v19 = vld [vmem:[#allocation2 + $0xa98] sm:$0xff] }
  0xb8   :  { %1385 = vst [vmem:[#allocation5 + $0xa90] sm:$0xff] %v361_v18  ;;  %v363_v20 = vld [vmem:[#allocation2 + $0xaa0] sm:$0xff]  ;;  %v364_v21 = vld [vmem:[#allocation2 + $0xaa8] sm:$0xff]  ;;  %1386 = vst [vmem:[#allocation5 + $0xa98] sm:$0xff] %v362_v19 }
  0xb9   :  { %1387 = vst [vmem:[#allocation5 + $0xaa0] sm:$0xff] %v363_v20  ;;  %1388 = vst [vmem:[#allocation5 + $0xaa8] sm:$0xff] %v364_v21  ;;  %v365_v22 = vld [vmem:[#allocation2 + $0xab0] sm:$0xff]  ;;  %v366_v23 = vld [vmem:[#allocation2 + $0xab8] sm:$0xff] }
  0xba   :  { %v367_v24 = vld [vmem:[#allocation2 + $0xac0] sm:$0xff]  ;;  %1389 = vst [vmem:[#allocation5 + $0xab0] sm:$0xff] %v365_v22  ;;  %1390 = vst [vmem:[#allocation5 + $0xab8] sm:$0xff] %v366_v23  ;;  %v368_v25 = vld [vmem:[#allocation2 + $0xac8] sm:$0xff] }
  0xbb   :  { %1391 = vst [vmem:[#allocation5 + $0xac0] sm:$0xff] %v367_v24  ;;  %v369_v26 = vld [vmem:[#allocation2 + $0xad0] sm:$0xff]  ;;  %v370_v27 = vld [vmem:[#allocation2 + $0xad8] sm:$0xff]  ;;  %1392 = vst [vmem:[#allocation5 + $0xac8] sm:$0xff] %v368_v25 }
  0xbc   :  { %1393 = vst [vmem:[#allocation5 + $0xad0] sm:$0xff] %v369_v26  ;;  %1394 = vst [vmem:[#allocation5 + $0xad8] sm:$0xff] %v370_v27  ;;  %v371_v28 = vld [vmem:[#allocation2 + $0xae0] sm:$0xff]  ;;  %v372_v29 = vld [vmem:[#allocation2 + $0xae8] sm:$0xff] }
  0xbd   :  { %v373_v30 = vld [vmem:[#allocation2 + $0xaf0] sm:$0xff]  ;;  %1395 = vst [vmem:[#allocation5 + $0xae0] sm:$0xff] %v371_v28  ;;  %1396 = vst [vmem:[#allocation5 + $0xae8] sm:$0xff] %v372_v29  ;;  %v374_v31 = vld [vmem:[#allocation2 + $0xaf8] sm:$0xff] }
  0xbe   :  { %1397 = vst [vmem:[#allocation5 + $0xaf0] sm:$0xff] %v373_v30  ;;  %v375_v32 = vld [vmem:[#allocation2 + $0xb00] sm:$0xff]  ;;  %v376_v33 = vld [vmem:[#allocation2 + $0xb08] sm:$0xff]  ;;  %1398 = vst [vmem:[#allocation5 + $0xaf8] sm:$0xff] %v374_v31 }
  0xbf   :  { %1399 = vst [vmem:[#allocation5 + $0xb00] sm:$0xff] %v375_v32  ;;  %1400 = vst [vmem:[#allocation5 + $0xb08] sm:$0xff] %v376_v33  ;;  %v377_v34 = vld [vmem:[#allocation2 + $0xb10] sm:$0xff]  ;;  %v378_v35 = vld [vmem:[#allocation2 + $0xb18] sm:$0xff] }
  0xc0   :  { %v379_v36 = vld [vmem:[#allocation2 + $0xb20] sm:$0xff]  ;;  %1401 = vst [vmem:[#allocation5 + $0xb10] sm:$0xff] %v377_v34  ;;  %1402 = vst [vmem:[#allocation5 + $0xb18] sm:$0xff] %v378_v35  ;;  %v380_v37 = vld [vmem:[#allocation2 + $0xb28] sm:$0xff] }
  0xc1   :  { %1403 = vst [vmem:[#allocation5 + $0xb20] sm:$0xff] %v379_v36  ;;  %v381_v38 = vld [vmem:[#allocation2 + $0xb30] sm:$0xff]  ;;  %v382_v39 = vld [vmem:[#allocation2 + $0xb38] sm:$0xff]  ;;  %1404 = vst [vmem:[#allocation5 + $0xb28] sm:$0xff] %v380_v37 }
  0xc2   :  { %1405 = vst [vmem:[#allocation5 + $0xb30] sm:$0xff] %v381_v38  ;;  %1406 = vst [vmem:[#allocation5 + $0xb38] sm:$0xff] %v382_v39  ;;  %v383_v40 = vld [vmem:[#allocation2 + $0xb40] sm:$0xff]  ;;  %v384_v41 = vld [vmem:[#allocation2 + $0xb48] sm:$0xff] }
  0xc3   :  { %v385_v42 = vld [vmem:[#allocation2 + $0xb50] sm:$0xff]  ;;  %1407 = vst [vmem:[#allocation5 + $0xb40] sm:$0xff] %v383_v40  ;;  %1408 = vst [vmem:[#allocation5 + $0xb48] sm:$0xff] %v384_v41  ;;  %v386_v43 = vld [vmem:[#allocation2 + $0xb58] sm:$0xff] }
  0xc4   :  { %1409 = vst [vmem:[#allocation5 + $0xb50] sm:$0xff] %v385_v42  ;;  %v387_v44 = vld [vmem:[#allocation2 + $0xb60] sm:$0xff]  ;;  %v388_v45 = vld [vmem:[#allocation2 + $0xb68] sm:$0xff]  ;;  %1410 = vst [vmem:[#allocation5 + $0xb58] sm:$0xff] %v386_v43 }
  0xc5   :  { %1411 = vst [vmem:[#allocation5 + $0xb60] sm:$0xff] %v387_v44  ;;  %1412 = vst [vmem:[#allocation5 + $0xb68] sm:$0xff] %v388_v45  ;;  %v389_v46 = vld [vmem:[#allocation2 + $0xb70] sm:$0xff]  ;;  %v390_v47 = vld [vmem:[#allocation2 + $0xb78] sm:$0xff] }
  0xc6   :  { %v391_v48 = vld [vmem:[#allocation2 + $0xb80] sm:$0xff]  ;;  %1413 = vst [vmem:[#allocation5 + $0xb70] sm:$0xff] %v389_v46  ;;  %1414 = vst [vmem:[#allocation5 + $0xb78] sm:$0xff] %v390_v47  ;;  %v392_v49 = vld [vmem:[#allocation2 + $0xb88] sm:$0xff] }
  0xc7   :  { %1415 = vst [vmem:[#allocation5 + $0xb80] sm:$0xff] %v391_v48  ;;  %v393_v50 = vld [vmem:[#allocation2 + $0xb90] sm:$0xff]  ;;  %v394_v51 = vld [vmem:[#allocation2 + $0xb98] sm:$0xff]  ;;  %1416 = vst [vmem:[#allocation5 + $0xb88] sm:$0xff] %v392_v49 }
  0xc8   :  { %1417 = vst [vmem:[#allocation5 + $0xb90] sm:$0xff] %v393_v50  ;;  %1418 = vst [vmem:[#allocation5 + $0xb98] sm:$0xff] %v394_v51  ;;  %v395_v52 = vld [vmem:[#allocation2 + $0xba0] sm:$0xff]  ;;  %v396_v53 = vld [vmem:[#allocation2 + $0xba8] sm:$0xff] }
  0xc9   :  { %v397_v54 = vld [vmem:[#allocation2 + $0xbb0] sm:$0xff]  ;;  %1419 = vst [vmem:[#allocation5 + $0xba0] sm:$0xff] %v395_v52  ;;  %1420 = vst [vmem:[#allocation5 + $0xba8] sm:$0xff] %v396_v53  ;;  %v398_v55 = vld [vmem:[#allocation2 + $0xbb8] sm:$0xff] }
  0xca   :  { %1421 = vst [vmem:[#allocation5 + $0xbb0] sm:$0xff] %v397_v54  ;;  %v399_v56 = vld [vmem:[#allocation2 + $0xbc0] sm:$0xff]  ;;  %v400_v57 = vld [vmem:[#allocation2 + $0xbc8] sm:$0xff]  ;;  %1422 = vst [vmem:[#allocation5 + $0xbb8] sm:$0xff] %v398_v55 }
  0xcb   :  { %1423 = vst [vmem:[#allocation5 + $0xbc0] sm:$0xff] %v399_v56  ;;  %1424 = vst [vmem:[#allocation5 + $0xbc8] sm:$0xff] %v400_v57  ;;  %v401_v58 = vld [vmem:[#allocation2 + $0xbd0] sm:$0xff]  ;;  %v402_v59 = vld [vmem:[#allocation2 + $0xbd8] sm:$0xff] }
  0xcc   :  { %v403_v60 = vld [vmem:[#allocation2 + $0xbe0] sm:$0xff]  ;;  %1425 = vst [vmem:[#allocation5 + $0xbd0] sm:$0xff] %v401_v58  ;;  %1426 = vst [vmem:[#allocation5 + $0xbd8] sm:$0xff] %v402_v59  ;;  %v404_v61 = vld [vmem:[#allocation2 + $0xbe8] sm:$0xff] }
  0xcd   :  { %1427 = vst [vmem:[#allocation5 + $0xbe0] sm:$0xff] %v403_v60  ;;  %v405_v62 = vld [vmem:[#allocation2 + $0xbf0] sm:$0xff]  ;;  %v406_v63 = vld [vmem:[#allocation2 + $0xbf8] sm:$0xff]  ;;  %1428 = vst [vmem:[#allocation5 + $0xbe8] sm:$0xff] %v404_v61 }
  0xce   :  { %1429 = vst [vmem:[#allocation5 + $0xbf0] sm:$0xff] %v405_v62  ;;  %1430 = vst [vmem:[#allocation5 + $0xbf8] sm:$0xff] %v406_v63  ;;  %v407_v0 = vld [vmem:[#allocation2 + $0xc00] sm:$0xff]  ;;  %v408_v1 = vld [vmem:[#allocation2 + $0xc08] sm:$0xff] }
  0xcf   :  { %v409_v2 = vld [vmem:[#allocation2 + $0xc10] sm:$0xff]  ;;  %1431 = vst [vmem:[#allocation5 + $0xc00] sm:$0xff] %v407_v0  ;;  %1432 = vst [vmem:[#allocation5 + $0xc08] sm:$0xff] %v408_v1  ;;  %v410_v3 = vld [vmem:[#allocation2 + $0xc18] sm:$0xff] }
  0xd0   :  { %1433 = vst [vmem:[#allocation5 + $0xc10] sm:$0xff] %v409_v2  ;;  %v411_v4 = vld [vmem:[#allocation2 + $0xc20] sm:$0xff]  ;;  %v412_v5 = vld [vmem:[#allocation2 + $0xc28] sm:$0xff]  ;;  %1434 = vst [vmem:[#allocation5 + $0xc18] sm:$0xff] %v410_v3 }
  0xd1   :  { %1435 = vst [vmem:[#allocation5 + $0xc20] sm:$0xff] %v411_v4  ;;  %1436 = vst [vmem:[#allocation5 + $0xc28] sm:$0xff] %v412_v5  ;;  %v413_v6 = vld [vmem:[#allocation2 + $0xc30] sm:$0xff]  ;;  %v414_v7 = vld [vmem:[#allocation2 + $0xc38] sm:$0xff] }
  0xd2   :  { %v415_v8 = vld [vmem:[#allocation2 + $0xc40] sm:$0xff]  ;;  %1437 = vst [vmem:[#allocation5 + $0xc30] sm:$0xff] %v413_v6  ;;  %1438 = vst [vmem:[#allocation5 + $0xc38] sm:$0xff] %v414_v7  ;;  %v416_v9 = vld [vmem:[#allocation2 + $0xc48] sm:$0xff] }
  0xd3   :  { %1439 = vst [vmem:[#allocation5 + $0xc40] sm:$0xff] %v415_v8  ;;  %v417_v10 = vld [vmem:[#allocation2 + $0xc50] sm:$0xff]  ;;  %v418_v11 = vld [vmem:[#allocation2 + $0xc58] sm:$0xff]  ;;  %1440 = vst [vmem:[#allocation5 + $0xc48] sm:$0xff] %v416_v9 }
  0xd4   :  { %1441 = vst [vmem:[#allocation5 + $0xc50] sm:$0xff] %v417_v10  ;;  %1442 = vst [vmem:[#allocation5 + $0xc58] sm:$0xff] %v418_v11  ;;  %v419_v12 = vld [vmem:[#allocation2 + $0xc60] sm:$0xff]  ;;  %v420_v13 = vld [vmem:[#allocation2 + $0xc68] sm:$0xff] }
  0xd5   :  { %v421_v14 = vld [vmem:[#allocation2 + $0xc70] sm:$0xff]  ;;  %1443 = vst [vmem:[#allocation5 + $0xc60] sm:$0xff] %v419_v12  ;;  %1444 = vst [vmem:[#allocation5 + $0xc68] sm:$0xff] %v420_v13  ;;  %v422_v15 = vld [vmem:[#allocation2 + $0xc78] sm:$0xff] }
  0xd6   :  { %1445 = vst [vmem:[#allocation5 + $0xc70] sm:$0xff] %v421_v14  ;;  %v423_v16 = vld [vmem:[#allocation2 + $0xc80] sm:$0xff]  ;;  %v424_v17 = vld [vmem:[#allocation2 + $0xc88] sm:$0xff]  ;;  %1446 = vst [vmem:[#allocation5 + $0xc78] sm:$0xff] %v422_v15 }
  0xd7   :  { %1447 = vst [vmem:[#allocation5 + $0xc80] sm:$0xff] %v423_v16  ;;  %1448 = vst [vmem:[#allocation5 + $0xc88] sm:$0xff] %v424_v17  ;;  %v425_v18 = vld [vmem:[#allocation2 + $0xc90] sm:$0xff]  ;;  %v426_v19 = vld [vmem:[#allocation2 + $0xc98] sm:$0xff] }
  0xd8   :  { %v427_v20 = vld [vmem:[#allocation2 + $0xca0] sm:$0xff]  ;;  %1449 = vst [vmem:[#allocation5 + $0xc90] sm:$0xff] %v425_v18  ;;  %1450 = vst [vmem:[#allocation5 + $0xc98] sm:$0xff] %v426_v19  ;;  %v428_v21 = vld [vmem:[#allocation2 + $0xca8] sm:$0xff] }
  0xd9   :  { %1451 = vst [vmem:[#allocation5 + $0xca0] sm:$0xff] %v427_v20  ;;  %v429_v22 = vld [vmem:[#allocation2 + $0xcb0] sm:$0xff]  ;;  %v430_v23 = vld [vmem:[#allocation2 + $0xcb8] sm:$0xff]  ;;  %1452 = vst [vmem:[#allocation5 + $0xca8] sm:$0xff] %v428_v21 }
  0xda   :  { %1453 = vst [vmem:[#allocation5 + $0xcb0] sm:$0xff] %v429_v22  ;;  %1454 = vst [vmem:[#allocation5 + $0xcb8] sm:$0xff] %v430_v23  ;;  %v431_v24 = vld [vmem:[#allocation2 + $0xcc0] sm:$0xff]  ;;  %v432_v25 = vld [vmem:[#allocation2 + $0xcc8] sm:$0xff] }
  0xdb   :  { %v433_v26 = vld [vmem:[#allocation2 + $0xcd0] sm:$0xff]  ;;  %1455 = vst [vmem:[#allocation5 + $0xcc0] sm:$0xff] %v431_v24  ;;  %1456 = vst [vmem:[#allocation5 + $0xcc8] sm:$0xff] %v432_v25  ;;  %v434_v27 = vld [vmem:[#allocation2 + $0xcd8] sm:$0xff] }
  0xdc   :  { %1457 = vst [vmem:[#allocation5 + $0xcd0] sm:$0xff] %v433_v26  ;;  %v435_v28 = vld [vmem:[#allocation2 + $0xce0] sm:$0xff]  ;;  %v436_v29 = vld [vmem:[#allocation2 + $0xce8] sm:$0xff]  ;;  %1458 = vst [vmem:[#allocation5 + $0xcd8] sm:$0xff] %v434_v27 }
  0xdd   :  { %1459 = vst [vmem:[#allocation5 + $0xce0] sm:$0xff] %v435_v28  ;;  %1460 = vst [vmem:[#allocation5 + $0xce8] sm:$0xff] %v436_v29  ;;  %v437_v30 = vld [vmem:[#allocation2 + $0xcf0] sm:$0xff]  ;;  %v438_v31 = vld [vmem:[#allocation2 + $0xcf8] sm:$0xff] }
  0xde   :  { %v439_v32 = vld [vmem:[#allocation2 + $0xd00] sm:$0xff]  ;;  %1461 = vst [vmem:[#allocation5 + $0xcf0] sm:$0xff] %v437_v30  ;;  %1462 = vst [vmem:[#allocation5 + $0xcf8] sm:$0xff] %v438_v31  ;;  %v440_v33 = vld [vmem:[#allocation2 + $0xd08] sm:$0xff] }
  0xdf   :  { %1463 = vst [vmem:[#allocation5 + $0xd00] sm:$0xff] %v439_v32  ;;  %v441_v34 = vld [vmem:[#allocation2 + $0xd10] sm:$0xff]  ;;  %v442_v35 = vld [vmem:[#allocation2 + $0xd18] sm:$0xff]  ;;  %1464 = vst [vmem:[#allocation5 + $0xd08] sm:$0xff] %v440_v33 }
  0xe0   :  { %1465 = vst [vmem:[#allocation5 + $0xd10] sm:$0xff] %v441_v34  ;;  %1466 = vst [vmem:[#allocation5 + $0xd18] sm:$0xff] %v442_v35  ;;  %v443_v36 = vld [vmem:[#allocation2 + $0xd20] sm:$0xff]  ;;  %v444_v37 = vld [vmem:[#allocation2 + $0xd28] sm:$0xff] }
  0xe1   :  { %v445_v38 = vld [vmem:[#allocation2 + $0xd30] sm:$0xff]  ;;  %1467 = vst [vmem:[#allocation5 + $0xd20] sm:$0xff] %v443_v36  ;;  %1468 = vst [vmem:[#allocation5 + $0xd28] sm:$0xff] %v444_v37  ;;  %v446_v39 = vld [vmem:[#allocation2 + $0xd38] sm:$0xff] }
  0xe2   :  { %1469 = vst [vmem:[#allocation5 + $0xd30] sm:$0xff] %v445_v38  ;;  %v447_v40 = vld [vmem:[#allocation2 + $0xd40] sm:$0xff]  ;;  %v448_v41 = vld [vmem:[#allocation2 + $0xd48] sm:$0xff]  ;;  %1470 = vst [vmem:[#allocation5 + $0xd38] sm:$0xff] %v446_v39 }
  0xe3   :  { %1471 = vst [vmem:[#allocation5 + $0xd40] sm:$0xff] %v447_v40  ;;  %1472 = vst [vmem:[#allocation5 + $0xd48] sm:$0xff] %v448_v41  ;;  %v449_v42 = vld [vmem:[#allocation2 + $0xd50] sm:$0xff]  ;;  %v450_v43 = vld [vmem:[#allocation2 + $0xd58] sm:$0xff] }
  0xe4   :  { %v451_v44 = vld [vmem:[#allocation2 + $0xd60] sm:$0xff]  ;;  %1473 = vst [vmem:[#allocation5 + $0xd50] sm:$0xff] %v449_v42  ;;  %1474 = vst [vmem:[#allocation5 + $0xd58] sm:$0xff] %v450_v43  ;;  %v452_v45 = vld [vmem:[#allocation2 + $0xd68] sm:$0xff] }
  0xe5   :  { %1475 = vst [vmem:[#allocation5 + $0xd60] sm:$0xff] %v451_v44  ;;  %v453_v46 = vld [vmem:[#allocation2 + $0xd70] sm:$0xff]  ;;  %v454_v47 = vld [vmem:[#allocation2 + $0xd78] sm:$0xff]  ;;  %1476 = vst [vmem:[#allocation5 + $0xd68] sm:$0xff] %v452_v45 }
  0xe6   :  { %1477 = vst [vmem:[#allocation5 + $0xd70] sm:$0xff] %v453_v46  ;;  %1478 = vst [vmem:[#allocation5 + $0xd78] sm:$0xff] %v454_v47  ;;  %v455_v48 = vld [vmem:[#allocation2 + $0xd80] sm:$0xff]  ;;  %v456_v49 = vld [vmem:[#allocation2 + $0xd88] sm:$0xff] }
  0xe7   :  { %v457_v50 = vld [vmem:[#allocation2 + $0xd90] sm:$0xff]  ;;  %1479 = vst [vmem:[#allocation5 + $0xd80] sm:$0xff] %v455_v48  ;;  %1480 = vst [vmem:[#allocation5 + $0xd88] sm:$0xff] %v456_v49  ;;  %v458_v51 = vld [vmem:[#allocation2 + $0xd98] sm:$0xff] }
  0xe8   :  { %1481 = vst [vmem:[#allocation5 + $0xd90] sm:$0xff] %v457_v50  ;;  %v459_v52 = vld [vmem:[#allocation2 + $0xda0] sm:$0xff]  ;;  %v460_v53 = vld [vmem:[#allocation2 + $0xda8] sm:$0xff]  ;;  %1482 = vst [vmem:[#allocation5 + $0xd98] sm:$0xff] %v458_v51 }
  0xe9   :  { %1483 = vst [vmem:[#allocation5 + $0xda0] sm:$0xff] %v459_v52  ;;  %1484 = vst [vmem:[#allocation5 + $0xda8] sm:$0xff] %v460_v53  ;;  %v461_v54 = vld [vmem:[#allocation2 + $0xdb0] sm:$0xff]  ;;  %v462_v55 = vld [vmem:[#allocation2 + $0xdb8] sm:$0xff] }
  0xea   :  { %v463_v56 = vld [vmem:[#allocation2 + $0xdc0] sm:$0xff]  ;;  %1485 = vst [vmem:[#allocation5 + $0xdb0] sm:$0xff] %v461_v54  ;;  %1486 = vst [vmem:[#allocation5 + $0xdb8] sm:$0xff] %v462_v55  ;;  %v464_v57 = vld [vmem:[#allocation2 + $0xdc8] sm:$0xff] }
  0xeb   :  { %1487 = vst [vmem:[#allocation5 + $0xdc0] sm:$0xff] %v463_v56  ;;  %v465_v58 = vld [vmem:[#allocation2 + $0xdd0] sm:$0xff]  ;;  %v466_v59 = vld [vmem:[#allocation2 + $0xdd8] sm:$0xff]  ;;  %1488 = vst [vmem:[#allocation5 + $0xdc8] sm:$0xff] %v464_v57 }
  0xec   :  { %1489 = vst [vmem:[#allocation5 + $0xdd0] sm:$0xff] %v465_v58  ;;  %1490 = vst [vmem:[#allocation5 + $0xdd8] sm:$0xff] %v466_v59  ;;  %v467_v60 = vld [vmem:[#allocation2 + $0xde0] sm:$0xff]  ;;  %v468_v61 = vld [vmem:[#allocation2 + $0xde8] sm:$0xff] }
  0xed   :  { %v469_v62 = vld [vmem:[#allocation2 + $0xdf0] sm:$0xff]  ;;  %1491 = vst [vmem:[#allocation5 + $0xde0] sm:$0xff] %v467_v60  ;;  %1492 = vst [vmem:[#allocation5 + $0xde8] sm:$0xff] %v468_v61  ;;  %v470_v63 = vld [vmem:[#allocation2 + $0xdf8] sm:$0xff] }
  0xee   :  { %1493 = vst [vmem:[#allocation5 + $0xdf0] sm:$0xff] %v469_v62  ;;  %v471_v0 = vld [vmem:[#allocation2 + $0xe00] sm:$0xff]  ;;  %v472_v1 = vld [vmem:[#allocation2 + $0xe08] sm:$0xff]  ;;  %1494 = vst [vmem:[#allocation5 + $0xdf8] sm:$0xff] %v470_v63 }
  0xef   :  { %1495 = vst [vmem:[#allocation5 + $0xe00] sm:$0xff] %v471_v0  ;;  %1496 = vst [vmem:[#allocation5 + $0xe08] sm:$0xff] %v472_v1  ;;  %v473_v2 = vld [vmem:[#allocation2 + $0xe10] sm:$0xff]  ;;  %v474_v3 = vld [vmem:[#allocation2 + $0xe18] sm:$0xff] }
  0xf0   :  { %v475_v4 = vld [vmem:[#allocation2 + $0xe20] sm:$0xff]  ;;  %1497 = vst [vmem:[#allocation5 + $0xe10] sm:$0xff] %v473_v2  ;;  %1498 = vst [vmem:[#allocation5 + $0xe18] sm:$0xff] %v474_v3  ;;  %v476_v5 = vld [vmem:[#allocation2 + $0xe28] sm:$0xff] }
  0xf1   :  { %1499 = vst [vmem:[#allocation5 + $0xe20] sm:$0xff] %v475_v4  ;;  %v477_v6 = vld [vmem:[#allocation2 + $0xe30] sm:$0xff]  ;;  %v478_v7 = vld [vmem:[#allocation2 + $0xe38] sm:$0xff]  ;;  %1500 = vst [vmem:[#allocation5 + $0xe28] sm:$0xff] %v476_v5 }
  0xf2   :  { %1501 = vst [vmem:[#allocation5 + $0xe30] sm:$0xff] %v477_v6  ;;  %1502 = vst [vmem:[#allocation5 + $0xe38] sm:$0xff] %v478_v7  ;;  %v479_v8 = vld [vmem:[#allocation2 + $0xe40] sm:$0xff]  ;;  %v480_v9 = vld [vmem:[#allocation2 + $0xe48] sm:$0xff] }
  0xf3   :  { %v481_v10 = vld [vmem:[#allocation2 + $0xe50] sm:$0xff]  ;;  %1503 = vst [vmem:[#allocation5 + $0xe40] sm:$0xff] %v479_v8  ;;  %1504 = vst [vmem:[#allocation5 + $0xe48] sm:$0xff] %v480_v9  ;;  %v482_v11 = vld [vmem:[#allocation2 + $0xe58] sm:$0xff] }
  0xf4   :  { %1505 = vst [vmem:[#allocation5 + $0xe50] sm:$0xff] %v481_v10  ;;  %v483_v12 = vld [vmem:[#allocation2 + $0xe60] sm:$0xff]  ;;  %v484_v13 = vld [vmem:[#allocation2 + $0xe68] sm:$0xff]  ;;  %1506 = vst [vmem:[#allocation5 + $0xe58] sm:$0xff] %v482_v11 }
  0xf5   :  { %1507 = vst [vmem:[#allocation5 + $0xe60] sm:$0xff] %v483_v12  ;;  %1508 = vst [vmem:[#allocation5 + $0xe68] sm:$0xff] %v484_v13  ;;  %v485_v14 = vld [vmem:[#allocation2 + $0xe70] sm:$0xff]  ;;  %v486_v15 = vld [vmem:[#allocation2 + $0xe78] sm:$0xff] }
  0xf6   :  { %v487_v16 = vld [vmem:[#allocation2 + $0xe80] sm:$0xff]  ;;  %1509 = vst [vmem:[#allocation5 + $0xe70] sm:$0xff] %v485_v14  ;;  %1510 = vst [vmem:[#allocation5 + $0xe78] sm:$0xff] %v486_v15  ;;  %v488_v17 = vld [vmem:[#allocation2 + $0xe88] sm:$0xff] }
  0xf7   :  { %1511 = vst [vmem:[#allocation5 + $0xe80] sm:$0xff] %v487_v16  ;;  %v489_v18 = vld [vmem:[#allocation2 + $0xe90] sm:$0xff]  ;;  %v490_v19 = vld [vmem:[#allocation2 + $0xe98] sm:$0xff]  ;;  %1512 = vst [vmem:[#allocation5 + $0xe88] sm:$0xff] %v488_v17 }
  0xf8   :  { %1513 = vst [vmem:[#allocation5 + $0xe90] sm:$0xff] %v489_v18  ;;  %1514 = vst [vmem:[#allocation5 + $0xe98] sm:$0xff] %v490_v19  ;;  %v491_v20 = vld [vmem:[#allocation2 + $0xea0] sm:$0xff]  ;;  %v492_v21 = vld [vmem:[#allocation2 + $0xea8] sm:$0xff] }
  0xf9   :  { %v493_v22 = vld [vmem:[#allocation2 + $0xeb0] sm:$0xff]  ;;  %1515 = vst [vmem:[#allocation5 + $0xea0] sm:$0xff] %v491_v20  ;;  %1516 = vst [vmem:[#allocation5 + $0xea8] sm:$0xff] %v492_v21  ;;  %v494_v23 = vld [vmem:[#allocation2 + $0xeb8] sm:$0xff] }
  0xfa   :  { %1517 = vst [vmem:[#allocation5 + $0xeb0] sm:$0xff] %v493_v22  ;;  %v495_v24 = vld [vmem:[#allocation2 + $0xec0] sm:$0xff]  ;;  %v496_v25 = vld [vmem:[#allocation2 + $0xec8] sm:$0xff]  ;;  %1518 = vst [vmem:[#allocation5 + $0xeb8] sm:$0xff] %v494_v23 }
  0xfb   :  { %1519 = vst [vmem:[#allocation5 + $0xec0] sm:$0xff] %v495_v24  ;;  %1520 = vst [vmem:[#allocation5 + $0xec8] sm:$0xff] %v496_v25  ;;  %v497_v26 = vld [vmem:[#allocation2 + $0xed0] sm:$0xff]  ;;  %v498_v27 = vld [vmem:[#allocation2 + $0xed8] sm:$0xff] }
  0xfc   :  { %v499_v28 = vld [vmem:[#allocation2 + $0xee0] sm:$0xff]  ;;  %1521 = vst [vmem:[#allocation5 + $0xed0] sm:$0xff] %v497_v26  ;;  %1522 = vst [vmem:[#allocation5 + $0xed8] sm:$0xff] %v498_v27  ;;  %v500_v29 = vld [vmem:[#allocation2 + $0xee8] sm:$0xff] }
  0xfd   :  { %1523 = vst [vmem:[#allocation5 + $0xee0] sm:$0xff] %v499_v28  ;;  %v501_v30 = vld [vmem:[#allocation2 + $0xef0] sm:$0xff]  ;;  %v502_v31 = vld [vmem:[#allocation2 + $0xef8] sm:$0xff]  ;;  %1524 = vst [vmem:[#allocation5 + $0xee8] sm:$0xff] %v500_v29 }
  0xfe   :  { %1525 = vst [vmem:[#allocation5 + $0xef0] sm:$0xff] %v501_v30  ;;  %1526 = vst [vmem:[#allocation5 + $0xef8] sm:$0xff] %v502_v31  ;;  %v503_v32 = vld [vmem:[#allocation2 + $0xf00] sm:$0xff]  ;;  %v504_v33 = vld [vmem:[#allocation2 + $0xf08] sm:$0xff] }
  0xff   :  { %v505_v34 = vld [vmem:[#allocation2 + $0xf10] sm:$0xff]  ;;  %1527 = vst [vmem:[#allocation5 + $0xf00] sm:$0xff] %v503_v32  ;;  %1528 = vst [vmem:[#allocation5 + $0xf08] sm:$0xff] %v504_v33  ;;  %v506_v35 = vld [vmem:[#allocation2 + $0xf18] sm:$0xff] }
 0x100   :  { %1529 = vst [vmem:[#allocation5 + $0xf10] sm:$0xff] %v505_v34  ;;  %v507_v36 = vld [vmem:[#allocation2 + $0xf20] sm:$0xff]  ;;  %v508_v37 = vld [vmem:[#allocation2 + $0xf28] sm:$0xff]  ;;  %1530 = vst [vmem:[#allocation5 + $0xf18] sm:$0xff] %v506_v35 }
 0x101   :  { %1531 = vst [vmem:[#allocation5 + $0xf20] sm:$0xff] %v507_v36  ;;  %1532 = vst [vmem:[#allocation5 + $0xf28] sm:$0xff] %v508_v37  ;;  %v509_v38 = vld [vmem:[#allocation2 + $0xf30] sm:$0xff]  ;;  %v510_v39 = vld [vmem:[#allocation2 + $0xf38] sm:$0xff] }
 0x102   :  { %v511_v40 = vld [vmem:[#allocation2 + $0xf40] sm:$0xff]  ;;  %1533 = vst [vmem:[#allocation5 + $0xf30] sm:$0xff] %v509_v38  ;;  %1534 = vst [vmem:[#allocation5 + $0xf38] sm:$0xff] %v510_v39  ;;  %v512_v41 = vld [vmem:[#allocation2 + $0xf48] sm:$0xff] }
 0x103   :  { %1535 = vst [vmem:[#allocation5 + $0xf40] sm:$0xff] %v511_v40  ;;  %v513_v42 = vld [vmem:[#allocation2 + $0xf50] sm:$0xff]  ;;  %v514_v43 = vld [vmem:[#allocation2 + $0xf58] sm:$0xff]  ;;  %1536 = vst [vmem:[#allocation5 + $0xf48] sm:$0xff] %v512_v41 }
 0x104   :  { %1537 = vst [vmem:[#allocation5 + $0xf50] sm:$0xff] %v513_v42  ;;  %1538 = vst [vmem:[#allocation5 + $0xf58] sm:$0xff] %v514_v43  ;;  %v515_v44 = vld [vmem:[#allocation2 + $0xf60] sm:$0xff]  ;;  %v516_v45 = vld [vmem:[#allocation2 + $0xf68] sm:$0xff] }
 0x105   :  { %v517_v46 = vld [vmem:[#allocation2 + $0xf70] sm:$0xff]  ;;  %1539 = vst [vmem:[#allocation5 + $0xf60] sm:$0xff] %v515_v44  ;;  %1540 = vst [vmem:[#allocation5 + $0xf68] sm:$0xff] %v516_v45  ;;  %v518_v47 = vld [vmem:[#allocation2 + $0xf78] sm:$0xff] }
 0x106   :  { %1541 = vst [vmem:[#allocation5 + $0xf70] sm:$0xff] %v517_v46  ;;  %v519_v48 = vld [vmem:[#allocation2 + $0xf80] sm:$0xff]  ;;  %v520_v49 = vld [vmem:[#allocation2 + $0xf88] sm:$0xff]  ;;  %1542 = vst [vmem:[#allocation5 + $0xf78] sm:$0xff] %v518_v47 }
 0x107   :  { %1543 = vst [vmem:[#allocation5 + $0xf80] sm:$0xff] %v519_v48  ;;  %1544 = vst [vmem:[#allocation5 + $0xf88] sm:$0xff] %v520_v49  ;;  %v521_v50 = vld [vmem:[#allocation2 + $0xf90] sm:$0xff]  ;;  %v522_v51 = vld [vmem:[#allocation2 + $0xf98] sm:$0xff] }
 0x108   :  { %v523_v52 = vld [vmem:[#allocation2 + $0xfa0] sm:$0xff]  ;;  %1545 = vst [vmem:[#allocation5 + $0xf90] sm:$0xff] %v521_v50  ;;  %1546 = vst [vmem:[#allocation5 + $0xf98] sm:$0xff] %v522_v51  ;;  %v524_v53 = vld [vmem:[#allocation2 + $0xfa8] sm:$0xff] }
 0x109   :  { %1547 = vst [vmem:[#allocation5 + $0xfa0] sm:$0xff] %v523_v52  ;;  %v525_v54 = vld [vmem:[#allocation2 + $0xfb0] sm:$0xff]  ;;  %v526_v55 = vld [vmem:[#allocation2 + $0xfb8] sm:$0xff]  ;;  %1548 = vst [vmem:[#allocation5 + $0xfa8] sm:$0xff] %v524_v53 }
 0x10a   :  { %1549 = vst [vmem:[#allocation5 + $0xfb0] sm:$0xff] %v525_v54  ;;  %1550 = vst [vmem:[#allocation5 + $0xfb8] sm:$0xff] %v526_v55  ;;  %v527_v56 = vld [vmem:[#allocation2 + $0xfc0] sm:$0xff]  ;;  %v528_v57 = vld [vmem:[#allocation2 + $0xfc8] sm:$0xff] }
 0x10b   :  { %v529_v58 = vld [vmem:[#allocation2 + $0xfd0] sm:$0xff]  ;;  %1551 = vst [vmem:[#allocation5 + $0xfc0] sm:$0xff] %v527_v56  ;;  %1552 = vst [vmem:[#allocation5 + $0xfc8] sm:$0xff] %v528_v57  ;;  %v530_v59 = vld [vmem:[#allocation2 + $0xfd8] sm:$0xff] }
 0x10c   :  { %1553 = vst [vmem:[#allocation5 + $0xfd0] sm:$0xff] %v529_v58  ;;  %v531_v60 = vld [vmem:[#allocation2 + $0xfe0] sm:$0xff]  ;;  %v532_v61 = vld [vmem:[#allocation2 + $0xfe8] sm:$0xff]  ;;  %1554 = vst [vmem:[#allocation5 + $0xfd8] sm:$0xff] %v530_v59 }
 0x10d   :  { %1555 = vst [vmem:[#allocation5 + $0xfe0] sm:$0xff] %v531_v60  ;;  %1556 = vst [vmem:[#allocation5 + $0xfe8] sm:$0xff] %v532_v61  ;;  %v533_v62 = vld [vmem:[#allocation2 + $0xff0] sm:$0xff]  ;;  %v534_v63 = vld [vmem:[#allocation2 + $0xff8] sm:$0xff] }
 0x10e   :  { %v535_v0 = vld [vmem:[#allocation2 + $0x1000] sm:$0xff]  ;;  %1557 = vst [vmem:[#allocation5 + $0xff0] sm:$0xff] %v533_v62  ;;  %1558 = vst [vmem:[#allocation5 + $0xff8] sm:$0xff] %v534_v63  ;;  %v536_v1 = vld [vmem:[#allocation2 + $0x1008] sm:$0xff] }
 0x10f   :  { %1559 = vst [vmem:[#allocation5 + $0x1000] sm:$0xff] %v535_v0  ;;  %v537_v2 = vld [vmem:[#allocation2 + $0x1010] sm:$0xff]  ;;  %v538_v3 = vld [vmem:[#allocation2 + $0x1018] sm:$0xff]  ;;  %1560 = vst [vmem:[#allocation5 + $0x1008] sm:$0xff] %v536_v1 }
 0x110   :  { %1561 = vst [vmem:[#allocation5 + $0x1010] sm:$0xff] %v537_v2  ;;  %1562 = vst [vmem:[#allocation5 + $0x1018] sm:$0xff] %v538_v3  ;;  %v539_v4 = vld [vmem:[#allocation2 + $0x1020] sm:$0xff]  ;;  %v540_v5 = vld [vmem:[#allocation2 + $0x1028] sm:$0xff] }
 0x111   :  { %v541_v6 = vld [vmem:[#allocation2 + $0x1030] sm:$0xff]  ;;  %1563 = vst [vmem:[#allocation5 + $0x1020] sm:$0xff] %v539_v4  ;;  %1564 = vst [vmem:[#allocation5 + $0x1028] sm:$0xff] %v540_v5  ;;  %v542_v7 = vld [vmem:[#allocation2 + $0x1038] sm:$0xff] }
 0x112   :  { %1565 = vst [vmem:[#allocation5 + $0x1030] sm:$0xff] %v541_v6  ;;  %v543_v8 = vld [vmem:[#allocation2 + $0x1040] sm:$0xff]  ;;  %v544_v9 = vld [vmem:[#allocation2 + $0x1048] sm:$0xff]  ;;  %1566 = vst [vmem:[#allocation5 + $0x1038] sm:$0xff] %v542_v7 }
 0x113   :  { %1567 = vst [vmem:[#allocation5 + $0x1040] sm:$0xff] %v543_v8  ;;  %1568 = vst [vmem:[#allocation5 + $0x1048] sm:$0xff] %v544_v9  ;;  %v545_v10 = vld [vmem:[#allocation2 + $0x1050] sm:$0xff]  ;;  %v546_v11 = vld [vmem:[#allocation2 + $0x1058] sm:$0xff] }
 0x114   :  { %v547_v12 = vld [vmem:[#allocation2 + $0x1060] sm:$0xff]  ;;  %1569 = vst [vmem:[#allocation5 + $0x1050] sm:$0xff] %v545_v10  ;;  %1570 = vst [vmem:[#allocation5 + $0x1058] sm:$0xff] %v546_v11  ;;  %v548_v13 = vld [vmem:[#allocation2 + $0x1068] sm:$0xff] }
 0x115   :  { %1571 = vst [vmem:[#allocation5 + $0x1060] sm:$0xff] %v547_v12  ;;  %v549_v14 = vld [vmem:[#allocation2 + $0x1070] sm:$0xff]  ;;  %v550_v15 = vld [vmem:[#allocation2 + $0x1078] sm:$0xff]  ;;  %1572 = vst [vmem:[#allocation5 + $0x1068] sm:$0xff] %v548_v13 }
 0x116   :  { %1573 = vst [vmem:[#allocation5 + $0x1070] sm:$0xff] %v549_v14  ;;  %1574 = vst [vmem:[#allocation5 + $0x1078] sm:$0xff] %v550_v15  ;;  %v551_v16 = vld [vmem:[#allocation2 + $0x1080] sm:$0xff]  ;;  %v552_v17 = vld [vmem:[#allocation2 + $0x1088] sm:$0xff] }
 0x117   :  { %v553_v18 = vld [vmem:[#allocation2 + $0x1090] sm:$0xff]  ;;  %1575 = vst [vmem:[#allocation5 + $0x1080] sm:$0xff] %v551_v16  ;;  %1576 = vst [vmem:[#allocation5 + $0x1088] sm:$0xff] %v552_v17  ;;  %v554_v19 = vld [vmem:[#allocation2 + $0x1098] sm:$0xff] }
 0x118   :  { %1577 = vst [vmem:[#allocation5 + $0x1090] sm:$0xff] %v553_v18  ;;  %v555_v20 = vld [vmem:[#allocation2 + $0x10a0] sm:$0xff]  ;;  %v556_v21 = vld [vmem:[#allocation2 + $0x10a8] sm:$0xff]  ;;  %1578 = vst [vmem:[#allocation5 + $0x1098] sm:$0xff] %v554_v19 }
 0x119   :  { %1579 = vst [vmem:[#allocation5 + $0x10a0] sm:$0xff] %v555_v20  ;;  %1580 = vst [vmem:[#allocation5 + $0x10a8] sm:$0xff] %v556_v21  ;;  %v557_v22 = vld [vmem:[#allocation2 + $0x10b0] sm:$0xff]  ;;  %v558_v23 = vld [vmem:[#allocation2 + $0x10b8] sm:$0xff] }
 0x11a   :  { %v559_v24 = vld [vmem:[#allocation2 + $0x10c0] sm:$0xff]  ;;  %1581 = vst [vmem:[#allocation5 + $0x10b0] sm:$0xff] %v557_v22  ;;  %1582 = vst [vmem:[#allocation5 + $0x10b8] sm:$0xff] %v558_v23  ;;  %v560_v25 = vld [vmem:[#allocation2 + $0x10c8] sm:$0xff] }
 0x11b   :  { %1583 = vst [vmem:[#allocation5 + $0x10c0] sm:$0xff] %v559_v24  ;;  %v561_v26 = vld [vmem:[#allocation2 + $0x10d0] sm:$0xff]  ;;  %v562_v27 = vld [vmem:[#allocation2 + $0x10d8] sm:$0xff]  ;;  %1584 = vst [vmem:[#allocation5 + $0x10c8] sm:$0xff] %v560_v25 }
 0x11c   :  { %1585 = vst [vmem:[#allocation5 + $0x10d0] sm:$0xff] %v561_v26  ;;  %1586 = vst [vmem:[#allocation5 + $0x10d8] sm:$0xff] %v562_v27  ;;  %v563_v28 = vld [vmem:[#allocation2 + $0x10e0] sm:$0xff]  ;;  %v564_v29 = vld [vmem:[#allocation2 + $0x10e8] sm:$0xff] }
 0x11d   :  { %v565_v30 = vld [vmem:[#allocation2 + $0x10f0] sm:$0xff]  ;;  %1587 = vst [vmem:[#allocation5 + $0x10e0] sm:$0xff] %v563_v28  ;;  %1588 = vst [vmem:[#allocation5 + $0x10e8] sm:$0xff] %v564_v29  ;;  %v566_v31 = vld [vmem:[#allocation2 + $0x10f8] sm:$0xff] }
 0x11e   :  { %1589 = vst [vmem:[#allocation5 + $0x10f0] sm:$0xff] %v565_v30  ;;  %v567_v32 = vld [vmem:[#allocation2 + $0x1100] sm:$0xff]  ;;  %v568_v33 = vld [vmem:[#allocation2 + $0x1108] sm:$0xff]  ;;  %1590 = vst [vmem:[#allocation5 + $0x10f8] sm:$0xff] %v566_v31 }
 0x11f   :  { %1591 = vst [vmem:[#allocation5 + $0x1100] sm:$0xff] %v567_v32  ;;  %1592 = vst [vmem:[#allocation5 + $0x1108] sm:$0xff] %v568_v33  ;;  %v569_v34 = vld [vmem:[#allocation2 + $0x1110] sm:$0xff]  ;;  %v570_v35 = vld [vmem:[#allocation2 + $0x1118] sm:$0xff] }
 0x120   :  { %v571_v36 = vld [vmem:[#allocation2 + $0x1120] sm:$0xff]  ;;  %1593 = vst [vmem:[#allocation5 + $0x1110] sm:$0xff] %v569_v34  ;;  %1594 = vst [vmem:[#allocation5 + $0x1118] sm:$0xff] %v570_v35  ;;  %v572_v37 = vld [vmem:[#allocation2 + $0x1128] sm:$0xff] }
 0x121   :  { %1595 = vst [vmem:[#allocation5 + $0x1120] sm:$0xff] %v571_v36  ;;  %v573_v38 = vld [vmem:[#allocation2 + $0x1130] sm:$0xff]  ;;  %v574_v39 = vld [vmem:[#allocation2 + $0x1138] sm:$0xff]  ;;  %1596 = vst [vmem:[#allocation5 + $0x1128] sm:$0xff] %v572_v37 }
 0x122   :  { %1597 = vst [vmem:[#allocation5 + $0x1130] sm:$0xff] %v573_v38  ;;  %1598 = vst [vmem:[#allocation5 + $0x1138] sm:$0xff] %v574_v39  ;;  %v575_v40 = vld [vmem:[#allocation2 + $0x1140] sm:$0xff]  ;;  %v576_v41 = vld [vmem:[#allocation2 + $0x1148] sm:$0xff] }
 0x123   :  { %v577_v42 = vld [vmem:[#allocation2 + $0x1150] sm:$0xff]  ;;  %1599 = vst [vmem:[#allocation5 + $0x1140] sm:$0xff] %v575_v40  ;;  %1600 = vst [vmem:[#allocation5 + $0x1148] sm:$0xff] %v576_v41  ;;  %v578_v43 = vld [vmem:[#allocation2 + $0x1158] sm:$0xff] }
 0x124   :  { %1601 = vst [vmem:[#allocation5 + $0x1150] sm:$0xff] %v577_v42  ;;  %v579_v44 = vld [vmem:[#allocation2 + $0x1160] sm:$0xff]  ;;  %v580_v45 = vld [vmem:[#allocation2 + $0x1168] sm:$0xff]  ;;  %1602 = vst [vmem:[#allocation5 + $0x1158] sm:$0xff] %v578_v43 }
 0x125   :  { %1603 = vst [vmem:[#allocation5 + $0x1160] sm:$0xff] %v579_v44  ;;  %1604 = vst [vmem:[#allocation5 + $0x1168] sm:$0xff] %v580_v45  ;;  %v581_v46 = vld [vmem:[#allocation2 + $0x1170] sm:$0xff]  ;;  %v582_v47 = vld [vmem:[#allocation2 + $0x1178] sm:$0xff] }
 0x126   :  { %v583_v48 = vld [vmem:[#allocation2 + $0x1180] sm:$0xff]  ;;  %1605 = vst [vmem:[#allocation5 + $0x1170] sm:$0xff] %v581_v46  ;;  %1606 = vst [vmem:[#allocation5 + $0x1178] sm:$0xff] %v582_v47  ;;  %v584_v49 = vld [vmem:[#allocation2 + $0x1188] sm:$0xff] }
 0x127   :  { %1607 = vst [vmem:[#allocation5 + $0x1180] sm:$0xff] %v583_v48  ;;  %v585_v50 = vld [vmem:[#allocation2 + $0x1190] sm:$0xff]  ;;  %v586_v51 = vld [vmem:[#allocation2 + $0x1198] sm:$0xff]  ;;  %1608 = vst [vmem:[#allocation5 + $0x1188] sm:$0xff] %v584_v49 }
 0x128   :  { %1609 = vst [vmem:[#allocation5 + $0x1190] sm:$0xff] %v585_v50  ;;  %1610 = vst [vmem:[#allocation5 + $0x1198] sm:$0xff] %v586_v51  ;;  %v587_v52 = vld [vmem:[#allocation2 + $0x11a0] sm:$0xff]  ;;  %v588_v53 = vld [vmem:[#allocation2 + $0x11a8] sm:$0xff] }
 0x129   :  { %v589_v54 = vld [vmem:[#allocation2 + $0x11b0] sm:$0xff]  ;;  %1611 = vst [vmem:[#allocation5 + $0x11a0] sm:$0xff] %v587_v52  ;;  %1612 = vst [vmem:[#allocation5 + $0x11a8] sm:$0xff] %v588_v53  ;;  %v590_v55 = vld [vmem:[#allocation2 + $0x11b8] sm:$0xff] }
 0x12a   :  { %1613 = vst [vmem:[#allocation5 + $0x11b0] sm:$0xff] %v589_v54  ;;  %v591_v56 = vld [vmem:[#allocation2 + $0x11c0] sm:$0xff]  ;;  %v592_v57 = vld [vmem:[#allocation2 + $0x11c8] sm:$0xff]  ;;  %1614 = vst [vmem:[#allocation5 + $0x11b8] sm:$0xff] %v590_v55 }
 0x12b   :  { %1615 = vst [vmem:[#allocation5 + $0x11c0] sm:$0xff] %v591_v56  ;;  %1616 = vst [vmem:[#allocation5 + $0x11c8] sm:$0xff] %v592_v57  ;;  %v593_v58 = vld [vmem:[#allocation2 + $0x11d0] sm:$0xff]  ;;  %v594_v59 = vld [vmem:[#allocation2 + $0x11d8] sm:$0xff] }
 0x12c   :  { %v595_v60 = vld [vmem:[#allocation2 + $0x11e0] sm:$0xff]  ;;  %1617 = vst [vmem:[#allocation5 + $0x11d0] sm:$0xff] %v593_v58  ;;  %1618 = vst [vmem:[#allocation5 + $0x11d8] sm:$0xff] %v594_v59  ;;  %v596_v61 = vld [vmem:[#allocation2 + $0x11e8] sm:$0xff] }
 0x12d   :  { %1619 = vst [vmem:[#allocation5 + $0x11e0] sm:$0xff] %v595_v60  ;;  %v597_v62 = vld [vmem:[#allocation2 + $0x11f0] sm:$0xff]  ;;  %v598_v63 = vld [vmem:[#allocation2 + $0x11f8] sm:$0xff]  ;;  %1620 = vst [vmem:[#allocation5 + $0x11e8] sm:$0xff] %v596_v61 }
 0x12e   :  { %1621 = vst [vmem:[#allocation5 + $0x11f0] sm:$0xff] %v597_v62  ;;  %1622 = vst [vmem:[#allocation5 + $0x11f8] sm:$0xff] %v598_v63  ;;  %v599_v0 = vld [vmem:[#allocation2 + $0x1200] sm:$0xff]  ;;  %v600_v1 = vld [vmem:[#allocation2 + $0x1208] sm:$0xff] }
 0x12f   :  { %v601_v2 = vld [vmem:[#allocation2 + $0x1210] sm:$0xff]  ;;  %1623 = vst [vmem:[#allocation5 + $0x1200] sm:$0xff] %v599_v0  ;;  %1624 = vst [vmem:[#allocation5 + $0x1208] sm:$0xff] %v600_v1  ;;  %v602_v3 = vld [vmem:[#allocation2 + $0x1218] sm:$0xff] }
 0x130   :  { %1625 = vst [vmem:[#allocation5 + $0x1210] sm:$0xff] %v601_v2  ;;  %v603_v4 = vld [vmem:[#allocation2 + $0x1220] sm:$0xff]  ;;  %v604_v5 = vld [vmem:[#allocation2 + $0x1228] sm:$0xff]  ;;  %1626 = vst [vmem:[#allocation5 + $0x1218] sm:$0xff] %v602_v3 }
 0x131   :  { %1627 = vst [vmem:[#allocation5 + $0x1220] sm:$0xff] %v603_v4  ;;  %1628 = vst [vmem:[#allocation5 + $0x1228] sm:$0xff] %v604_v5  ;;  %v605_v6 = vld [vmem:[#allocation2 + $0x1230] sm:$0xff]  ;;  %v606_v7 = vld [vmem:[#allocation2 + $0x1238] sm:$0xff] }
 0x132   :  { %v607_v8 = vld [vmem:[#allocation2 + $0x1240] sm:$0xff]  ;;  %1629 = vst [vmem:[#allocation5 + $0x1230] sm:$0xff] %v605_v6  ;;  %1630 = vst [vmem:[#allocation5 + $0x1238] sm:$0xff] %v606_v7  ;;  %v608_v9 = vld [vmem:[#allocation2 + $0x1248] sm:$0xff] }
 0x133   :  { %1631 = vst [vmem:[#allocation5 + $0x1240] sm:$0xff] %v607_v8  ;;  %v609_v10 = vld [vmem:[#allocation2 + $0x1250] sm:$0xff]  ;;  %v610_v11 = vld [vmem:[#allocation2 + $0x1258] sm:$0xff]  ;;  %1632 = vst [vmem:[#allocation5 + $0x1248] sm:$0xff] %v608_v9 }
 0x134   :  { %1633 = vst [vmem:[#allocation5 + $0x1250] sm:$0xff] %v609_v10  ;;  %1634 = vst [vmem:[#allocation5 + $0x1258] sm:$0xff] %v610_v11  ;;  %v611_v12 = vld [vmem:[#allocation2 + $0x1260] sm:$0xff]  ;;  %v612_v13 = vld [vmem:[#allocation2 + $0x1268] sm:$0xff] }
 0x135   :  { %v613_v14 = vld [vmem:[#allocation2 + $0x1270] sm:$0xff]  ;;  %1635 = vst [vmem:[#allocation5 + $0x1260] sm:$0xff] %v611_v12  ;;  %1636 = vst [vmem:[#allocation5 + $0x1268] sm:$0xff] %v612_v13  ;;  %v614_v15 = vld [vmem:[#allocation2 + $0x1278] sm:$0xff] }
 0x136   :  { %1637 = vst [vmem:[#allocation5 + $0x1270] sm:$0xff] %v613_v14  ;;  %v615_v16 = vld [vmem:[#allocation2 + $0x1280] sm:$0xff]  ;;  %v616_v17 = vld [vmem:[#allocation2 + $0x1288] sm:$0xff]  ;;  %1638 = vst [vmem:[#allocation5 + $0x1278] sm:$0xff] %v614_v15 }
 0x137   :  { %1639 = vst [vmem:[#allocation5 + $0x1280] sm:$0xff] %v615_v16  ;;  %1640 = vst [vmem:[#allocation5 + $0x1288] sm:$0xff] %v616_v17  ;;  %v617_v18 = vld [vmem:[#allocation2 + $0x1290] sm:$0xff]  ;;  %v618_v19 = vld [vmem:[#allocation2 + $0x1298] sm:$0xff] }
 0x138   :  { %v619_v20 = vld [vmem:[#allocation2 + $0x12a0] sm:$0xff]  ;;  %1641 = vst [vmem:[#allocation5 + $0x1290] sm:$0xff] %v617_v18  ;;  %1642 = vst [vmem:[#allocation5 + $0x1298] sm:$0xff] %v618_v19  ;;  %v620_v21 = vld [vmem:[#allocation2 + $0x12a8] sm:$0xff] }
 0x139   :  { %1643 = vst [vmem:[#allocation5 + $0x12a0] sm:$0xff] %v619_v20  ;;  %v621_v22 = vld [vmem:[#allocation2 + $0x12b0] sm:$0xff]  ;;  %v622_v23 = vld [vmem:[#allocation2 + $0x12b8] sm:$0xff]  ;;  %1644 = vst [vmem:[#allocation5 + $0x12a8] sm:$0xff] %v620_v21 }
 0x13a   :  { %1645 = vst [vmem:[#allocation5 + $0x12b0] sm:$0xff] %v621_v22  ;;  %1646 = vst [vmem:[#allocation5 + $0x12b8] sm:$0xff] %v622_v23  ;;  %v623_v24 = vld [vmem:[#allocation2 + $0x12c0] sm:$0xff]  ;;  %v624_v25 = vld [vmem:[#allocation2 + $0x12c8] sm:$0xff] }
 0x13b   :  { %v625_v26 = vld [vmem:[#allocation2 + $0x12d0] sm:$0xff]  ;;  %1647 = vst [vmem:[#allocation5 + $0x12c0] sm:$0xff] %v623_v24  ;;  %1648 = vst [vmem:[#allocation5 + $0x12c8] sm:$0xff] %v624_v25  ;;  %v626_v27 = vld [vmem:[#allocation2 + $0x12d8] sm:$0xff] }
 0x13c   :  { %1649 = vst [vmem:[#allocation5 + $0x12d0] sm:$0xff] %v625_v26  ;;  %v627_v28 = vld [vmem:[#allocation2 + $0x12e0] sm:$0xff]  ;;  %v628_v29 = vld [vmem:[#allocation2 + $0x12e8] sm:$0xff]  ;;  %1650 = vst [vmem:[#allocation5 + $0x12d8] sm:$0xff] %v626_v27 }
 0x13d   :  { %1651 = vst [vmem:[#allocation5 + $0x12e0] sm:$0xff] %v627_v28  ;;  %1652 = vst [vmem:[#allocation5 + $0x12e8] sm:$0xff] %v628_v29  ;;  %v629_v30 = vld [vmem:[#allocation2 + $0x12f0] sm:$0xff]  ;;  %v630_v31 = vld [vmem:[#allocation2 + $0x12f8] sm:$0xff] }
 0x13e   :  { %v631_v32 = vld [vmem:[#allocation2 + $0x1300] sm:$0xff]  ;;  %1653 = vst [vmem:[#allocation5 + $0x12f0] sm:$0xff] %v629_v30  ;;  %1654 = vst [vmem:[#allocation5 + $0x12f8] sm:$0xff] %v630_v31  ;;  %v632_v33 = vld [vmem:[#allocation2 + $0x1308] sm:$0xff] }
 0x13f   :  { %1655 = vst [vmem:[#allocation5 + $0x1300] sm:$0xff] %v631_v32  ;;  %v633_v34 = vld [vmem:[#allocation2 + $0x1310] sm:$0xff]  ;;  %v634_v35 = vld [vmem:[#allocation2 + $0x1318] sm:$0xff]  ;;  %1656 = vst [vmem:[#allocation5 + $0x1308] sm:$0xff] %v632_v33 }
 0x140   :  { %1657 = vst [vmem:[#allocation5 + $0x1310] sm:$0xff] %v633_v34  ;;  %1658 = vst [vmem:[#allocation5 + $0x1318] sm:$0xff] %v634_v35  ;;  %v635_v36 = vld [vmem:[#allocation2 + $0x1320] sm:$0xff]  ;;  %v636_v37 = vld [vmem:[#allocation2 + $0x1328] sm:$0xff] }
 0x141   :  { %v637_v38 = vld [vmem:[#allocation2 + $0x1330] sm:$0xff]  ;;  %1659 = vst [vmem:[#allocation5 + $0x1320] sm:$0xff] %v635_v36  ;;  %1660 = vst [vmem:[#allocation5 + $0x1328] sm:$0xff] %v636_v37  ;;  %v638_v39 = vld [vmem:[#allocation2 + $0x1338] sm:$0xff] }
 0x142   :  { %1661 = vst [vmem:[#allocation5 + $0x1330] sm:$0xff] %v637_v38  ;;  %v639_v40 = vld [vmem:[#allocation2 + $0x1340] sm:$0xff]  ;;  %v640_v41 = vld [vmem:[#allocation2 + $0x1348] sm:$0xff]  ;;  %1662 = vst [vmem:[#allocation5 + $0x1338] sm:$0xff] %v638_v39 }
 0x143   :  { %1663 = vst [vmem:[#allocation5 + $0x1340] sm:$0xff] %v639_v40  ;;  %1664 = vst [vmem:[#allocation5 + $0x1348] sm:$0xff] %v640_v41  ;;  %v641_v42 = vld [vmem:[#allocation2 + $0x1350] sm:$0xff]  ;;  %v642_v43 = vld [vmem:[#allocation2 + $0x1358] sm:$0xff] }
 0x144   :  { %v643_v44 = vld [vmem:[#allocation2 + $0x1360] sm:$0xff]  ;;  %1665 = vst [vmem:[#allocation5 + $0x1350] sm:$0xff] %v641_v42  ;;  %1666 = vst [vmem:[#allocation5 + $0x1358] sm:$0xff] %v642_v43  ;;  %v644_v45 = vld [vmem:[#allocation2 + $0x1368] sm:$0xff] }
 0x145   :  { %1667 = vst [vmem:[#allocation5 + $0x1360] sm:$0xff] %v643_v44  ;;  %v645_v46 = vld [vmem:[#allocation2 + $0x1370] sm:$0xff]  ;;  %v646_v47 = vld [vmem:[#allocation2 + $0x1378] sm:$0xff]  ;;  %1668 = vst [vmem:[#allocation5 + $0x1368] sm:$0xff] %v644_v45 }
 0x146   :  { %1669 = vst [vmem:[#allocation5 + $0x1370] sm:$0xff] %v645_v46  ;;  %1670 = vst [vmem:[#allocation5 + $0x1378] sm:$0xff] %v646_v47  ;;  %v647_v48 = vld [vmem:[#allocation2 + $0x1380] sm:$0xff]  ;;  %v648_v49 = vld [vmem:[#allocation2 + $0x1388] sm:$0xff] }
 0x147   :  { %v649_v50 = vld [vmem:[#allocation2 + $0x1390] sm:$0xff]  ;;  %1671 = vst [vmem:[#allocation5 + $0x1380] sm:$0xff] %v647_v48  ;;  %1672 = vst [vmem:[#allocation5 + $0x1388] sm:$0xff] %v648_v49  ;;  %v650_v51 = vld [vmem:[#allocation2 + $0x1398] sm:$0xff] }
 0x148   :  { %1673 = vst [vmem:[#allocation5 + $0x1390] sm:$0xff] %v649_v50  ;;  %v651_v52 = vld [vmem:[#allocation2 + $0x13a0] sm:$0xff]  ;;  %v652_v53 = vld [vmem:[#allocation2 + $0x13a8] sm:$0xff]  ;;  %1674 = vst [vmem:[#allocation5 + $0x1398] sm:$0xff] %v650_v51 }
 0x149   :  { %1675 = vst [vmem:[#allocation5 + $0x13a0] sm:$0xff] %v651_v52  ;;  %1676 = vst [vmem:[#allocation5 + $0x13a8] sm:$0xff] %v652_v53  ;;  %v653_v54 = vld [vmem:[#allocation2 + $0x13b0] sm:$0xff]  ;;  %v654_v55 = vld [vmem:[#allocation2 + $0x13b8] sm:$0xff] }
 0x14a   :  { %v655_v56 = vld [vmem:[#allocation2 + $0x13c0] sm:$0xff]  ;;  %1677 = vst [vmem:[#allocation5 + $0x13b0] sm:$0xff] %v653_v54  ;;  %1678 = vst [vmem:[#allocation5 + $0x13b8] sm:$0xff] %v654_v55  ;;  %v656_v57 = vld [vmem:[#allocation2 + $0x13c8] sm:$0xff] }
 0x14b   :  { %1679 = vst [vmem:[#allocation5 + $0x13c0] sm:$0xff] %v655_v56  ;;  %v657_v58 = vld [vmem:[#allocation2 + $0x13d0] sm:$0xff]  ;;  %v658_v59 = vld [vmem:[#allocation2 + $0x13d8] sm:$0xff]  ;;  %1680 = vst [vmem:[#allocation5 + $0x13c8] sm:$0xff] %v656_v57 }
 0x14c   :  { %1681 = vst [vmem:[#allocation5 + $0x13d0] sm:$0xff] %v657_v58  ;;  %1682 = vst [vmem:[#allocation5 + $0x13d8] sm:$0xff] %v658_v59  ;;  %v659_v60 = vld [vmem:[#allocation2 + $0x13e0] sm:$0xff]  ;;  %v660_v61 = vld [vmem:[#allocation2 + $0x13e8] sm:$0xff] }
 0x14d   :  { %v661_v62 = vld [vmem:[#allocation2 + $0x13f0] sm:$0xff]  ;;  %1683 = vst [vmem:[#allocation5 + $0x13e0] sm:$0xff] %v659_v60  ;;  %1684 = vst [vmem:[#allocation5 + $0x13e8] sm:$0xff] %v660_v61  ;;  %v662_v63 = vld [vmem:[#allocation2 + $0x13f8] sm:$0xff] }
 0x14e   :  { %1685 = vst [vmem:[#allocation5 + $0x13f0] sm:$0xff] %v661_v62  ;;  %v663_v0 = vld [vmem:[#allocation2 + $0x1400] sm:$0xff]  ;;  %v664_v1 = vld [vmem:[#allocation2 + $0x1408] sm:$0xff]  ;;  %1686 = vst [vmem:[#allocation5 + $0x13f8] sm:$0xff] %v662_v63 }
 0x14f   :  { %1687 = vst [vmem:[#allocation5 + $0x1400] sm:$0xff] %v663_v0  ;;  %1688 = vst [vmem:[#allocation5 + $0x1408] sm:$0xff] %v664_v1  ;;  %v665_v2 = vld [vmem:[#allocation2 + $0x1410] sm:$0xff]  ;;  %v666_v3 = vld [vmem:[#allocation2 + $0x1418] sm:$0xff] }
 0x150   :  { %v667_v4 = vld [vmem:[#allocation2 + $0x1420] sm:$0xff]  ;;  %1689 = vst [vmem:[#allocation5 + $0x1410] sm:$0xff] %v665_v2  ;;  %1690 = vst [vmem:[#allocation5 + $0x1418] sm:$0xff] %v666_v3  ;;  %v668_v5 = vld [vmem:[#allocation2 + $0x1428] sm:$0xff] }
 0x151   :  { %1691 = vst [vmem:[#allocation5 + $0x1420] sm:$0xff] %v667_v4  ;;  %v669_v6 = vld [vmem:[#allocation2 + $0x1430] sm:$0xff]  ;;  %v670_v7 = vld [vmem:[#allocation2 + $0x1438] sm:$0xff]  ;;  %1692 = vst [vmem:[#allocation5 + $0x1428] sm:$0xff] %v668_v5 }
 0x152   :  { %1693 = vst [vmem:[#allocation5 + $0x1430] sm:$0xff] %v669_v6  ;;  %1694 = vst [vmem:[#allocation5 + $0x1438] sm:$0xff] %v670_v7  ;;  %v671_v8 = vld [vmem:[#allocation2 + $0x1440] sm:$0xff]  ;;  %v672_v9 = vld [vmem:[#allocation2 + $0x1448] sm:$0xff] }
 0x153   :  { %v673_v10 = vld [vmem:[#allocation2 + $0x1450] sm:$0xff]  ;;  %1695 = vst [vmem:[#allocation5 + $0x1440] sm:$0xff] %v671_v8  ;;  %1696 = vst [vmem:[#allocation5 + $0x1448] sm:$0xff] %v672_v9  ;;  %v674_v11 = vld [vmem:[#allocation2 + $0x1458] sm:$0xff] }
 0x154   :  { %1697 = vst [vmem:[#allocation5 + $0x1450] sm:$0xff] %v673_v10  ;;  %v675_v12 = vld [vmem:[#allocation2 + $0x1460] sm:$0xff]  ;;  %v676_v13 = vld [vmem:[#allocation2 + $0x1468] sm:$0xff]  ;;  %1698 = vst [vmem:[#allocation5 + $0x1458] sm:$0xff] %v674_v11 }
 0x155   :  { %1699 = vst [vmem:[#allocation5 + $0x1460] sm:$0xff] %v675_v12  ;;  %1700 = vst [vmem:[#allocation5 + $0x1468] sm:$0xff] %v676_v13  ;;  %v677_v14 = vld [vmem:[#allocation2 + $0x1470] sm:$0xff]  ;;  %v678_v15 = vld [vmem:[#allocation2 + $0x1478] sm:$0xff] }
 0x156   :  { %v679_v16 = vld [vmem:[#allocation2 + $0x1480] sm:$0xff]  ;;  %1701 = vst [vmem:[#allocation5 + $0x1470] sm:$0xff] %v677_v14  ;;  %1702 = vst [vmem:[#allocation5 + $0x1478] sm:$0xff] %v678_v15  ;;  %v680_v17 = vld [vmem:[#allocation2 + $0x1488] sm:$0xff] }
 0x157   :  { %1703 = vst [vmem:[#allocation5 + $0x1480] sm:$0xff] %v679_v16  ;;  %v681_v18 = vld [vmem:[#allocation2 + $0x1490] sm:$0xff]  ;;  %v682_v19 = vld [vmem:[#allocation2 + $0x1498] sm:$0xff]  ;;  %1704 = vst [vmem:[#allocation5 + $0x1488] sm:$0xff] %v680_v17 }
 0x158   :  { %1705 = vst [vmem:[#allocation5 + $0x1490] sm:$0xff] %v681_v18  ;;  %1706 = vst [vmem:[#allocation5 + $0x1498] sm:$0xff] %v682_v19  ;;  %v683_v20 = vld [vmem:[#allocation2 + $0x14a0] sm:$0xff]  ;;  %v684_v21 = vld [vmem:[#allocation2 + $0x14a8] sm:$0xff] }
 0x159   :  { %v685_v22 = vld [vmem:[#allocation2 + $0x14b0] sm:$0xff]  ;;  %1707 = vst [vmem:[#allocation5 + $0x14a0] sm:$0xff] %v683_v20  ;;  %1708 = vst [vmem:[#allocation5 + $0x14a8] sm:$0xff] %v684_v21  ;;  %v686_v23 = vld [vmem:[#allocation2 + $0x14b8] sm:$0xff] }
 0x15a   :  { %1709 = vst [vmem:[#allocation5 + $0x14b0] sm:$0xff] %v685_v22  ;;  %v687_v24 = vld [vmem:[#allocation2 + $0x14c0] sm:$0xff]  ;;  %v688_v25 = vld [vmem:[#allocation2 + $0x14c8] sm:$0xff]  ;;  %1710 = vst [vmem:[#allocation5 + $0x14b8] sm:$0xff] %v686_v23 }
 0x15b   :  { %1711 = vst [vmem:[#allocation5 + $0x14c0] sm:$0xff] %v687_v24  ;;  %1712 = vst [vmem:[#allocation5 + $0x14c8] sm:$0xff] %v688_v25  ;;  %v689_v26 = vld [vmem:[#allocation2 + $0x14d0] sm:$0xff]  ;;  %v690_v27 = vld [vmem:[#allocation2 + $0x14d8] sm:$0xff] }
 0x15c   :  { %v691_v28 = vld [vmem:[#allocation2 + $0x14e0] sm:$0xff]  ;;  %1713 = vst [vmem:[#allocation5 + $0x14d0] sm:$0xff] %v689_v26  ;;  %1714 = vst [vmem:[#allocation5 + $0x14d8] sm:$0xff] %v690_v27  ;;  %v692_v29 = vld [vmem:[#allocation2 + $0x14e8] sm:$0xff] }
 0x15d   :  { %1715 = vst [vmem:[#allocation5 + $0x14e0] sm:$0xff] %v691_v28  ;;  %v693_v30 = vld [vmem:[#allocation2 + $0x14f0] sm:$0xff]  ;;  %v694_v31 = vld [vmem:[#allocation2 + $0x14f8] sm:$0xff]  ;;  %1716 = vst [vmem:[#allocation5 + $0x14e8] sm:$0xff] %v692_v29 }
 0x15e   :  { %1717 = vst [vmem:[#allocation5 + $0x14f0] sm:$0xff] %v693_v30  ;;  %1718 = vst [vmem:[#allocation5 + $0x14f8] sm:$0xff] %v694_v31  ;;  %v695_v32 = vld [vmem:[#allocation2 + $0x1500] sm:$0xff]  ;;  %v696_v33 = vld [vmem:[#allocation2 + $0x1508] sm:$0xff] }
 0x15f   :  { %v697_v34 = vld [vmem:[#allocation2 + $0x1510] sm:$0xff]  ;;  %1719 = vst [vmem:[#allocation5 + $0x1500] sm:$0xff] %v695_v32  ;;  %1720 = vst [vmem:[#allocation5 + $0x1508] sm:$0xff] %v696_v33  ;;  %v698_v35 = vld [vmem:[#allocation2 + $0x1518] sm:$0xff] }
 0x160   :  { %1721 = vst [vmem:[#allocation5 + $0x1510] sm:$0xff] %v697_v34  ;;  %v699_v36 = vld [vmem:[#allocation2 + $0x1520] sm:$0xff]  ;;  %v700_v37 = vld [vmem:[#allocation2 + $0x1528] sm:$0xff]  ;;  %1722 = vst [vmem:[#allocation5 + $0x1518] sm:$0xff] %v698_v35 }
 0x161   :  { %1723 = vst [vmem:[#allocation5 + $0x1520] sm:$0xff] %v699_v36  ;;  %1724 = vst [vmem:[#allocation5 + $0x1528] sm:$0xff] %v700_v37  ;;  %v701_v38 = vld [vmem:[#allocation2 + $0x1530] sm:$0xff]  ;;  %v702_v39 = vld [vmem:[#allocation2 + $0x1538] sm:$0xff] }
 0x162   :  { %v703_v40 = vld [vmem:[#allocation2 + $0x1540] sm:$0xff]  ;;  %1725 = vst [vmem:[#allocation5 + $0x1530] sm:$0xff] %v701_v38  ;;  %1726 = vst [vmem:[#allocation5 + $0x1538] sm:$0xff] %v702_v39  ;;  %v704_v41 = vld [vmem:[#allocation2 + $0x1548] sm:$0xff] }
 0x163   :  { %1727 = vst [vmem:[#allocation5 + $0x1540] sm:$0xff] %v703_v40  ;;  %v705_v42 = vld [vmem:[#allocation2 + $0x1550] sm:$0xff]  ;;  %v706_v43 = vld [vmem:[#allocation2 + $0x1558] sm:$0xff]  ;;  %1728 = vst [vmem:[#allocation5 + $0x1548] sm:$0xff] %v704_v41 }
 0x164   :  { %1729 = vst [vmem:[#allocation5 + $0x1550] sm:$0xff] %v705_v42  ;;  %1730 = vst [vmem:[#allocation5 + $0x1558] sm:$0xff] %v706_v43  ;;  %v707_v44 = vld [vmem:[#allocation2 + $0x1560] sm:$0xff]  ;;  %v708_v45 = vld [vmem:[#allocation2 + $0x1568] sm:$0xff] }
 0x165   :  { %v709_v46 = vld [vmem:[#allocation2 + $0x1570] sm:$0xff]  ;;  %1731 = vst [vmem:[#allocation5 + $0x1560] sm:$0xff] %v707_v44  ;;  %1732 = vst [vmem:[#allocation5 + $0x1568] sm:$0xff] %v708_v45  ;;  %v710_v47 = vld [vmem:[#allocation2 + $0x1578] sm:$0xff] }
 0x166   :  { %1733 = vst [vmem:[#allocation5 + $0x1570] sm:$0xff] %v709_v46  ;;  %v711_v48 = vld [vmem:[#allocation2 + $0x1580] sm:$0xff]  ;;  %v712_v49 = vld [vmem:[#allocation2 + $0x1588] sm:$0xff]  ;;  %1734 = vst [vmem:[#allocation5 + $0x1578] sm:$0xff] %v710_v47 }
 0x167   :  { %1735 = vst [vmem:[#allocation5 + $0x1580] sm:$0xff] %v711_v48  ;;  %1736 = vst [vmem:[#allocation5 + $0x1588] sm:$0xff] %v712_v49  ;;  %v713_v50 = vld [vmem:[#allocation2 + $0x1590] sm:$0xff]  ;;  %v714_v51 = vld [vmem:[#allocation2 + $0x1598] sm:$0xff] }
 0x168   :  { %v715_v52 = vld [vmem:[#allocation2 + $0x15a0] sm:$0xff]  ;;  %1737 = vst [vmem:[#allocation5 + $0x1590] sm:$0xff] %v713_v50  ;;  %1738 = vst [vmem:[#allocation5 + $0x1598] sm:$0xff] %v714_v51  ;;  %v716_v53 = vld [vmem:[#allocation2 + $0x15a8] sm:$0xff] }
 0x169   :  { %1739 = vst [vmem:[#allocation5 + $0x15a0] sm:$0xff] %v715_v52  ;;  %v717_v54 = vld [vmem:[#allocation2 + $0x15b0] sm:$0xff]  ;;  %v718_v55 = vld [vmem:[#allocation2 + $0x15b8] sm:$0xff]  ;;  %1740 = vst [vmem:[#allocation5 + $0x15a8] sm:$0xff] %v716_v53 }
 0x16a   :  { %1741 = vst [vmem:[#allocation5 + $0x15b0] sm:$0xff] %v717_v54  ;;  %1742 = vst [vmem:[#allocation5 + $0x15b8] sm:$0xff] %v718_v55  ;;  %v719_v56 = vld [vmem:[#allocation2 + $0x15c0] sm:$0xff]  ;;  %v720_v57 = vld [vmem:[#allocation2 + $0x15c8] sm:$0xff] }
 0x16b   :  { %v721_v58 = vld [vmem:[#allocation2 + $0x15d0] sm:$0xff]  ;;  %1743 = vst [vmem:[#allocation5 + $0x15c0] sm:$0xff] %v719_v56  ;;  %1744 = vst [vmem:[#allocation5 + $0x15c8] sm:$0xff] %v720_v57  ;;  %v722_v59 = vld [vmem:[#allocation2 + $0x15d8] sm:$0xff] }
 0x16c   :  { %1745 = vst [vmem:[#allocation5 + $0x15d0] sm:$0xff] %v721_v58  ;;  %v723_v60 = vld [vmem:[#allocation2 + $0x15e0] sm:$0xff]  ;;  %v724_v61 = vld [vmem:[#allocation2 + $0x15e8] sm:$0xff]  ;;  %1746 = vst [vmem:[#allocation5 + $0x15d8] sm:$0xff] %v722_v59 }
 0x16d   :  { %1747 = vst [vmem:[#allocation5 + $0x15e0] sm:$0xff] %v723_v60  ;;  %1748 = vst [vmem:[#allocation5 + $0x15e8] sm:$0xff] %v724_v61  ;;  %v725_v62 = vld [vmem:[#allocation2 + $0x15f0] sm:$0xff]  ;;  %v726_v63 = vld [vmem:[#allocation2 + $0x15f8] sm:$0xff] }
 0x16e   :  { %v727_v0 = vld [vmem:[#allocation2 + $0x1600] sm:$0xff]  ;;  %1749 = vst [vmem:[#allocation5 + $0x15f0] sm:$0xff] %v725_v62  ;;  %1750 = vst [vmem:[#allocation5 + $0x15f8] sm:$0xff] %v726_v63  ;;  %v728_v1 = vld [vmem:[#allocation2 + $0x1608] sm:$0xff] }
 0x16f   :  { %1751 = vst [vmem:[#allocation5 + $0x1600] sm:$0xff] %v727_v0  ;;  %v729_v2 = vld [vmem:[#allocation2 + $0x1610] sm:$0xff]  ;;  %v730_v3 = vld [vmem:[#allocation2 + $0x1618] sm:$0xff]  ;;  %1752 = vst [vmem:[#allocation5 + $0x1608] sm:$0xff] %v728_v1 }
 0x170   :  { %1753 = vst [vmem:[#allocation5 + $0x1610] sm:$0xff] %v729_v2  ;;  %1754 = vst [vmem:[#allocation5 + $0x1618] sm:$0xff] %v730_v3  ;;  %v731_v4 = vld [vmem:[#allocation2 + $0x1620] sm:$0xff]  ;;  %v732_v5 = vld [vmem:[#allocation2 + $0x1628] sm:$0xff] }
 0x171   :  { %v733_v6 = vld [vmem:[#allocation2 + $0x1630] sm:$0xff]  ;;  %1755 = vst [vmem:[#allocation5 + $0x1620] sm:$0xff] %v731_v4  ;;  %1756 = vst [vmem:[#allocation5 + $0x1628] sm:$0xff] %v732_v5  ;;  %v734_v7 = vld [vmem:[#allocation2 + $0x1638] sm:$0xff] }
 0x172   :  { %1757 = vst [vmem:[#allocation5 + $0x1630] sm:$0xff] %v733_v6  ;;  %v735_v8 = vld [vmem:[#allocation2 + $0x1640] sm:$0xff]  ;;  %v736_v9 = vld [vmem:[#allocation2 + $0x1648] sm:$0xff]  ;;  %1758 = vst [vmem:[#allocation5 + $0x1638] sm:$0xff] %v734_v7 }
 0x173   :  { %1759 = vst [vmem:[#allocation5 + $0x1640] sm:$0xff] %v735_v8  ;;  %1760 = vst [vmem:[#allocation5 + $0x1648] sm:$0xff] %v736_v9  ;;  %v737_v10 = vld [vmem:[#allocation2 + $0x1650] sm:$0xff]  ;;  %v738_v11 = vld [vmem:[#allocation2 + $0x1658] sm:$0xff] }
 0x174   :  { %v739_v12 = vld [vmem:[#allocation2 + $0x1660] sm:$0xff]  ;;  %1761 = vst [vmem:[#allocation5 + $0x1650] sm:$0xff] %v737_v10  ;;  %1762 = vst [vmem:[#allocation5 + $0x1658] sm:$0xff] %v738_v11  ;;  %v740_v13 = vld [vmem:[#allocation2 + $0x1668] sm:$0xff] }
 0x175   :  { %1763 = vst [vmem:[#allocation5 + $0x1660] sm:$0xff] %v739_v12  ;;  %v741_v14 = vld [vmem:[#allocation2 + $0x1670] sm:$0xff]  ;;  %v742_v15 = vld [vmem:[#allocation2 + $0x1678] sm:$0xff]  ;;  %1764 = vst [vmem:[#allocation5 + $0x1668] sm:$0xff] %v740_v13 }
 0x176   :  { %1765 = vst [vmem:[#allocation5 + $0x1670] sm:$0xff] %v741_v14  ;;  %1766 = vst [vmem:[#allocation5 + $0x1678] sm:$0xff] %v742_v15  ;;  %v743_v16 = vld [vmem:[#allocation2 + $0x1680] sm:$0xff]  ;;  %v744_v17 = vld [vmem:[#allocation2 + $0x1688] sm:$0xff] }
 0x177   :  { %v745_v18 = vld [vmem:[#allocation2 + $0x1690] sm:$0xff]  ;;  %1767 = vst [vmem:[#allocation5 + $0x1680] sm:$0xff] %v743_v16  ;;  %1768 = vst [vmem:[#allocation5 + $0x1688] sm:$0xff] %v744_v17  ;;  %v746_v19 = vld [vmem:[#allocation2 + $0x1698] sm:$0xff] }
 0x178   :  { %1769 = vst [vmem:[#allocation5 + $0x1690] sm:$0xff] %v745_v18  ;;  %v747_v20 = vld [vmem:[#allocation2 + $0x16a0] sm:$0xff]  ;;  %v748_v21 = vld [vmem:[#allocation2 + $0x16a8] sm:$0xff]  ;;  %1770 = vst [vmem:[#allocation5 + $0x1698] sm:$0xff] %v746_v19 }
 0x179   :  { %1771 = vst [vmem:[#allocation5 + $0x16a0] sm:$0xff] %v747_v20  ;;  %1772 = vst [vmem:[#allocation5 + $0x16a8] sm:$0xff] %v748_v21  ;;  %v749_v22 = vld [vmem:[#allocation2 + $0x16b0] sm:$0xff]  ;;  %v750_v23 = vld [vmem:[#allocation2 + $0x16b8] sm:$0xff] }
 0x17a   :  { %v751_v24 = vld [vmem:[#allocation2 + $0x16c0] sm:$0xff]  ;;  %1773 = vst [vmem:[#allocation5 + $0x16b0] sm:$0xff] %v749_v22  ;;  %1774 = vst [vmem:[#allocation5 + $0x16b8] sm:$0xff] %v750_v23  ;;  %v752_v25 = vld [vmem:[#allocation2 + $0x16c8] sm:$0xff] }
 0x17b   :  { %1775 = vst [vmem:[#allocation5 + $0x16c0] sm:$0xff] %v751_v24  ;;  %v753_v26 = vld [vmem:[#allocation2 + $0x16d0] sm:$0xff]  ;;  %v754_v27 = vld [vmem:[#allocation2 + $0x16d8] sm:$0xff]  ;;  %1776 = vst [vmem:[#allocation5 + $0x16c8] sm:$0xff] %v752_v25 }
 0x17c   :  { %1777 = vst [vmem:[#allocation5 + $0x16d0] sm:$0xff] %v753_v26  ;;  %1778 = vst [vmem:[#allocation5 + $0x16d8] sm:$0xff] %v754_v27  ;;  %v755_v28 = vld [vmem:[#allocation2 + $0x16e0] sm:$0xff]  ;;  %v756_v29 = vld [vmem:[#allocation2 + $0x16e8] sm:$0xff] }
 0x17d   :  { %v757_v30 = vld [vmem:[#allocation2 + $0x16f0] sm:$0xff]  ;;  %1779 = vst [vmem:[#allocation5 + $0x16e0] sm:$0xff] %v755_v28  ;;  %1780 = vst [vmem:[#allocation5 + $0x16e8] sm:$0xff] %v756_v29  ;;  %v758_v31 = vld [vmem:[#allocation2 + $0x16f8] sm:$0xff] }
 0x17e   :  { %1781 = vst [vmem:[#allocation5 + $0x16f0] sm:$0xff] %v757_v30  ;;  %v759_v32 = vld [vmem:[#allocation2 + $0x1700] sm:$0xff]  ;;  %v760_v33 = vld [vmem:[#allocation2 + $0x1708] sm:$0xff]  ;;  %1782 = vst [vmem:[#allocation5 + $0x16f8] sm:$0xff] %v758_v31 }
 0x17f   :  { %1783 = vst [vmem:[#allocation5 + $0x1700] sm:$0xff] %v759_v32  ;;  %1784 = vst [vmem:[#allocation5 + $0x1708] sm:$0xff] %v760_v33  ;;  %v761_v34 = vld [vmem:[#allocation2 + $0x1710] sm:$0xff]  ;;  %v762_v35 = vld [vmem:[#allocation2 + $0x1718] sm:$0xff] }
 0x180   :  { %v763_v36 = vld [vmem:[#allocation2 + $0x1720] sm:$0xff]  ;;  %1785 = vst [vmem:[#allocation5 + $0x1710] sm:$0xff] %v761_v34  ;;  %1786 = vst [vmem:[#allocation5 + $0x1718] sm:$0xff] %v762_v35  ;;  %v764_v37 = vld [vmem:[#allocation2 + $0x1728] sm:$0xff] }
 0x181   :  { %1787 = vst [vmem:[#allocation5 + $0x1720] sm:$0xff] %v763_v36  ;;  %v765_v38 = vld [vmem:[#allocation2 + $0x1730] sm:$0xff]  ;;  %v766_v39 = vld [vmem:[#allocation2 + $0x1738] sm:$0xff]  ;;  %1788 = vst [vmem:[#allocation5 + $0x1728] sm:$0xff] %v764_v37 }
 0x182   :  { %1789 = vst [vmem:[#allocation5 + $0x1730] sm:$0xff] %v765_v38  ;;  %1790 = vst [vmem:[#allocation5 + $0x1738] sm:$0xff] %v766_v39  ;;  %v767_v40 = vld [vmem:[#allocation2 + $0x1740] sm:$0xff]  ;;  %v768_v41 = vld [vmem:[#allocation2 + $0x1748] sm:$0xff] }
 0x183   :  { %v769_v42 = vld [vmem:[#allocation2 + $0x1750] sm:$0xff]  ;;  %1791 = vst [vmem:[#allocation5 + $0x1740] sm:$0xff] %v767_v40  ;;  %1792 = vst [vmem:[#allocation5 + $0x1748] sm:$0xff] %v768_v41  ;;  %v770_v43 = vld [vmem:[#allocation2 + $0x1758] sm:$0xff] }
 0x184   :  { %1793 = vst [vmem:[#allocation5 + $0x1750] sm:$0xff] %v769_v42  ;;  %v771_v44 = vld [vmem:[#allocation2 + $0x1760] sm:$0xff]  ;;  %v772_v45 = vld [vmem:[#allocation2 + $0x1768] sm:$0xff]  ;;  %1794 = vst [vmem:[#allocation5 + $0x1758] sm:$0xff] %v770_v43 }
 0x185   :  { %1795 = vst [vmem:[#allocation5 + $0x1760] sm:$0xff] %v771_v44  ;;  %1796 = vst [vmem:[#allocation5 + $0x1768] sm:$0xff] %v772_v45  ;;  %v773_v46 = vld [vmem:[#allocation2 + $0x1770] sm:$0xff]  ;;  %v774_v47 = vld [vmem:[#allocation2 + $0x1778] sm:$0xff] }
 0x186   :  { %v775_v48 = vld [vmem:[#allocation2 + $0x1780] sm:$0xff]  ;;  %1797 = vst [vmem:[#allocation5 + $0x1770] sm:$0xff] %v773_v46  ;;  %1798 = vst [vmem:[#allocation5 + $0x1778] sm:$0xff] %v774_v47  ;;  %v776_v49 = vld [vmem:[#allocation2 + $0x1788] sm:$0xff] }
 0x187   :  { %1799 = vst [vmem:[#allocation5 + $0x1780] sm:$0xff] %v775_v48  ;;  %v777_v50 = vld [vmem:[#allocation2 + $0x1790] sm:$0xff]  ;;  %v778_v51 = vld [vmem:[#allocation2 + $0x1798] sm:$0xff]  ;;  %1800 = vst [vmem:[#allocation5 + $0x1788] sm:$0xff] %v776_v49 }
 0x188   :  { %1801 = vst [vmem:[#allocation5 + $0x1790] sm:$0xff] %v777_v50  ;;  %1802 = vst [vmem:[#allocation5 + $0x1798] sm:$0xff] %v778_v51  ;;  %v779_v52 = vld [vmem:[#allocation2 + $0x17a0] sm:$0xff]  ;;  %v780_v53 = vld [vmem:[#allocation2 + $0x17a8] sm:$0xff] }
 0x189   :  { %v781_v54 = vld [vmem:[#allocation2 + $0x17b0] sm:$0xff]  ;;  %1803 = vst [vmem:[#allocation5 + $0x17a0] sm:$0xff] %v779_v52  ;;  %1804 = vst [vmem:[#allocation5 + $0x17a8] sm:$0xff] %v780_v53  ;;  %v782_v55 = vld [vmem:[#allocation2 + $0x17b8] sm:$0xff] }
 0x18a   :  { %1805 = vst [vmem:[#allocation5 + $0x17b0] sm:$0xff] %v781_v54  ;;  %v783_v56 = vld [vmem:[#allocation2 + $0x17c0] sm:$0xff]  ;;  %v784_v57 = vld [vmem:[#allocation2 + $0x17c8] sm:$0xff]  ;;  %1806 = vst [vmem:[#allocation5 + $0x17b8] sm:$0xff] %v782_v55 }
 0x18b   :  { %1807 = vst [vmem:[#allocation5 + $0x17c0] sm:$0xff] %v783_v56  ;;  %1808 = vst [vmem:[#allocation5 + $0x17c8] sm:$0xff] %v784_v57  ;;  %v785_v58 = vld [vmem:[#allocation2 + $0x17d0] sm:$0xff]  ;;  %v786_v59 = vld [vmem:[#allocation2 + $0x17d8] sm:$0xff] }
 0x18c   :  { %v787_v60 = vld [vmem:[#allocation2 + $0x17e0] sm:$0xff]  ;;  %1809 = vst [vmem:[#allocation5 + $0x17d0] sm:$0xff] %v785_v58  ;;  %1810 = vst [vmem:[#allocation5 + $0x17d8] sm:$0xff] %v786_v59  ;;  %v788_v61 = vld [vmem:[#allocation2 + $0x17e8] sm:$0xff] }
 0x18d   :  { %1811 = vst [vmem:[#allocation5 + $0x17e0] sm:$0xff] %v787_v60  ;;  %v789_v62 = vld [vmem:[#allocation2 + $0x17f0] sm:$0xff]  ;;  %v790_v63 = vld [vmem:[#allocation2 + $0x17f8] sm:$0xff]  ;;  %1812 = vst [vmem:[#allocation5 + $0x17e8] sm:$0xff] %v788_v61 }
 0x18e   :  { %1813 = vst [vmem:[#allocation5 + $0x17f0] sm:$0xff] %v789_v62  ;;  %1814 = vst [vmem:[#allocation5 + $0x17f8] sm:$0xff] %v790_v63  ;;  %v791_v0 = vld [vmem:[#allocation2 + $0x1800] sm:$0xff]  ;;  %v792_v1 = vld [vmem:[#allocation2 + $0x1808] sm:$0xff] }
 0x18f   :  { %v793_v2 = vld [vmem:[#allocation2 + $0x1810] sm:$0xff]  ;;  %1815 = vst [vmem:[#allocation5 + $0x1800] sm:$0xff] %v791_v0  ;;  %1816 = vst [vmem:[#allocation5 + $0x1808] sm:$0xff] %v792_v1  ;;  %v794_v3 = vld [vmem:[#allocation2 + $0x1818] sm:$0xff] }
 0x190   :  { %1817 = vst [vmem:[#allocation5 + $0x1810] sm:$0xff] %v793_v2  ;;  %v795_v4 = vld [vmem:[#allocation2 + $0x1820] sm:$0xff]  ;;  %v796_v5 = vld [vmem:[#allocation2 + $0x1828] sm:$0xff]  ;;  %1818 = vst [vmem:[#allocation5 + $0x1818] sm:$0xff] %v794_v3 }
 0x191   :  { %1819 = vst [vmem:[#allocation5 + $0x1820] sm:$0xff] %v795_v4  ;;  %1820 = vst [vmem:[#allocation5 + $0x1828] sm:$0xff] %v796_v5  ;;  %v797_v6 = vld [vmem:[#allocation2 + $0x1830] sm:$0xff]  ;;  %v798_v7 = vld [vmem:[#allocation2 + $0x1838] sm:$0xff] }
 0x192   :  { %v799_v8 = vld [vmem:[#allocation2 + $0x1840] sm:$0xff]  ;;  %1821 = vst [vmem:[#allocation5 + $0x1830] sm:$0xff] %v797_v6  ;;  %1822 = vst [vmem:[#allocation5 + $0x1838] sm:$0xff] %v798_v7  ;;  %v800_v9 = vld [vmem:[#allocation2 + $0x1848] sm:$0xff] }
 0x193   :  { %1823 = vst [vmem:[#allocation5 + $0x1840] sm:$0xff] %v799_v8  ;;  %v801_v10 = vld [vmem:[#allocation2 + $0x1850] sm:$0xff]  ;;  %v802_v11 = vld [vmem:[#allocation2 + $0x1858] sm:$0xff]  ;;  %1824 = vst [vmem:[#allocation5 + $0x1848] sm:$0xff] %v800_v9 }
 0x194   :  { %1825 = vst [vmem:[#allocation5 + $0x1850] sm:$0xff] %v801_v10  ;;  %1826 = vst [vmem:[#allocation5 + $0x1858] sm:$0xff] %v802_v11  ;;  %v803_v12 = vld [vmem:[#allocation2 + $0x1860] sm:$0xff]  ;;  %v804_v13 = vld [vmem:[#allocation2 + $0x1868] sm:$0xff] }
 0x195   :  { %v805_v14 = vld [vmem:[#allocation2 + $0x1870] sm:$0xff]  ;;  %1827 = vst [vmem:[#allocation5 + $0x1860] sm:$0xff] %v803_v12  ;;  %1828 = vst [vmem:[#allocation5 + $0x1868] sm:$0xff] %v804_v13  ;;  %v806_v15 = vld [vmem:[#allocation2 + $0x1878] sm:$0xff] }
 0x196   :  { %1829 = vst [vmem:[#allocation5 + $0x1870] sm:$0xff] %v805_v14  ;;  %v807_v16 = vld [vmem:[#allocation2 + $0x1880] sm:$0xff]  ;;  %v808_v17 = vld [vmem:[#allocation2 + $0x1888] sm:$0xff]  ;;  %1830 = vst [vmem:[#allocation5 + $0x1878] sm:$0xff] %v806_v15 }
 0x197   :  { %1831 = vst [vmem:[#allocation5 + $0x1880] sm:$0xff] %v807_v16  ;;  %1832 = vst [vmem:[#allocation5 + $0x1888] sm:$0xff] %v808_v17  ;;  %v809_v18 = vld [vmem:[#allocation2 + $0x1890] sm:$0xff]  ;;  %v810_v19 = vld [vmem:[#allocation2 + $0x1898] sm:$0xff] }
 0x198   :  { %v811_v20 = vld [vmem:[#allocation2 + $0x18a0] sm:$0xff]  ;;  %1833 = vst [vmem:[#allocation5 + $0x1890] sm:$0xff] %v809_v18  ;;  %1834 = vst [vmem:[#allocation5 + $0x1898] sm:$0xff] %v810_v19  ;;  %v812_v21 = vld [vmem:[#allocation2 + $0x18a8] sm:$0xff] }
 0x199   :  { %1835 = vst [vmem:[#allocation5 + $0x18a0] sm:$0xff] %v811_v20  ;;  %v813_v22 = vld [vmem:[#allocation2 + $0x18b0] sm:$0xff]  ;;  %v814_v23 = vld [vmem:[#allocation2 + $0x18b8] sm:$0xff]  ;;  %1836 = vst [vmem:[#allocation5 + $0x18a8] sm:$0xff] %v812_v21 }
 0x19a   :  { %1837 = vst [vmem:[#allocation5 + $0x18b0] sm:$0xff] %v813_v22  ;;  %1838 = vst [vmem:[#allocation5 + $0x18b8] sm:$0xff] %v814_v23  ;;  %v815_v24 = vld [vmem:[#allocation2 + $0x18c0] sm:$0xff]  ;;  %v816_v25 = vld [vmem:[#allocation2 + $0x18c8] sm:$0xff] }
 0x19b   :  { %v817_v26 = vld [vmem:[#allocation2 + $0x18d0] sm:$0xff]  ;;  %1839 = vst [vmem:[#allocation5 + $0x18c0] sm:$0xff] %v815_v24  ;;  %1840 = vst [vmem:[#allocation5 + $0x18c8] sm:$0xff] %v816_v25  ;;  %v818_v27 = vld [vmem:[#allocation2 + $0x18d8] sm:$0xff] }
 0x19c   :  { %1841 = vst [vmem:[#allocation5 + $0x18d0] sm:$0xff] %v817_v26  ;;  %v819_v28 = vld [vmem:[#allocation2 + $0x18e0] sm:$0xff]  ;;  %v820_v29 = vld [vmem:[#allocation2 + $0x18e8] sm:$0xff]  ;;  %1842 = vst [vmem:[#allocation5 + $0x18d8] sm:$0xff] %v818_v27 }
 0x19d   :  { %1843 = vst [vmem:[#allocation5 + $0x18e0] sm:$0xff] %v819_v28  ;;  %1844 = vst [vmem:[#allocation5 + $0x18e8] sm:$0xff] %v820_v29  ;;  %v821_v30 = vld [vmem:[#allocation2 + $0x18f0] sm:$0xff]  ;;  %v822_v31 = vld [vmem:[#allocation2 + $0x18f8] sm:$0xff] }
 0x19e   :  { %v823_v32 = vld [vmem:[#allocation2 + $0x1900] sm:$0xff]  ;;  %1845 = vst [vmem:[#allocation5 + $0x18f0] sm:$0xff] %v821_v30  ;;  %1846 = vst [vmem:[#allocation5 + $0x18f8] sm:$0xff] %v822_v31  ;;  %v824_v33 = vld [vmem:[#allocation2 + $0x1908] sm:$0xff] }
 0x19f   :  { %1847 = vst [vmem:[#allocation5 + $0x1900] sm:$0xff] %v823_v32  ;;  %v825_v34 = vld [vmem:[#allocation2 + $0x1910] sm:$0xff]  ;;  %v826_v35 = vld [vmem:[#allocation2 + $0x1918] sm:$0xff]  ;;  %1848 = vst [vmem:[#allocation5 + $0x1908] sm:$0xff] %v824_v33 }
 0x1a0   :  { %1849 = vst [vmem:[#allocation5 + $0x1910] sm:$0xff] %v825_v34  ;;  %1850 = vst [vmem:[#allocation5 + $0x1918] sm:$0xff] %v826_v35  ;;  %v827_v36 = vld [vmem:[#allocation2 + $0x1920] sm:$0xff]  ;;  %v828_v37 = vld [vmem:[#allocation2 + $0x1928] sm:$0xff] }
 0x1a1   :  { %v829_v38 = vld [vmem:[#allocation2 + $0x1930] sm:$0xff]  ;;  %1851 = vst [vmem:[#allocation5 + $0x1920] sm:$0xff] %v827_v36  ;;  %1852 = vst [vmem:[#allocation5 + $0x1928] sm:$0xff] %v828_v37  ;;  %v830_v39 = vld [vmem:[#allocation2 + $0x1938] sm:$0xff] }
 0x1a2   :  { %1853 = vst [vmem:[#allocation5 + $0x1930] sm:$0xff] %v829_v38  ;;  %v831_v40 = vld [vmem:[#allocation2 + $0x1940] sm:$0xff]  ;;  %v832_v41 = vld [vmem:[#allocation2 + $0x1948] sm:$0xff]  ;;  %1854 = vst [vmem:[#allocation5 + $0x1938] sm:$0xff] %v830_v39 }
 0x1a3   :  { %1855 = vst [vmem:[#allocation5 + $0x1940] sm:$0xff] %v831_v40  ;;  %1856 = vst [vmem:[#allocation5 + $0x1948] sm:$0xff] %v832_v41  ;;  %v833_v42 = vld [vmem:[#allocation2 + $0x1950] sm:$0xff]  ;;  %v834_v43 = vld [vmem:[#allocation2 + $0x1958] sm:$0xff] }
 0x1a4   :  { %v835_v44 = vld [vmem:[#allocation2 + $0x1960] sm:$0xff]  ;;  %1857 = vst [vmem:[#allocation5 + $0x1950] sm:$0xff] %v833_v42  ;;  %1858 = vst [vmem:[#allocation5 + $0x1958] sm:$0xff] %v834_v43  ;;  %v836_v45 = vld [vmem:[#allocation2 + $0x1968] sm:$0xff] }
 0x1a5   :  { %1859 = vst [vmem:[#allocation5 + $0x1960] sm:$0xff] %v835_v44  ;;  %v837_v46 = vld [vmem:[#allocation2 + $0x1970] sm:$0xff]  ;;  %v838_v47 = vld [vmem:[#allocation2 + $0x1978] sm:$0xff]  ;;  %1860 = vst [vmem:[#allocation5 + $0x1968] sm:$0xff] %v836_v45 }
 0x1a6   :  { %1861 = vst [vmem:[#allocation5 + $0x1970] sm:$0xff] %v837_v46  ;;  %1862 = vst [vmem:[#allocation5 + $0x1978] sm:$0xff] %v838_v47  ;;  %v839_v48 = vld [vmem:[#allocation2 + $0x1980] sm:$0xff]  ;;  %v840_v49 = vld [vmem:[#allocation2 + $0x1988] sm:$0xff] }
 0x1a7   :  { %v841_v50 = vld [vmem:[#allocation2 + $0x1990] sm:$0xff]  ;;  %1863 = vst [vmem:[#allocation5 + $0x1980] sm:$0xff] %v839_v48  ;;  %1864 = vst [vmem:[#allocation5 + $0x1988] sm:$0xff] %v840_v49  ;;  %v842_v51 = vld [vmem:[#allocation2 + $0x1998] sm:$0xff] }
 0x1a8   :  { %1865 = vst [vmem:[#allocation5 + $0x1990] sm:$0xff] %v841_v50  ;;  %v843_v52 = vld [vmem:[#allocation2 + $0x19a0] sm:$0xff]  ;;  %v844_v53 = vld [vmem:[#allocation2 + $0x19a8] sm:$0xff]  ;;  %1866 = vst [vmem:[#allocation5 + $0x1998] sm:$0xff] %v842_v51 }
 0x1a9   :  { %1867 = vst [vmem:[#allocation5 + $0x19a0] sm:$0xff] %v843_v52  ;;  %1868 = vst [vmem:[#allocation5 + $0x19a8] sm:$0xff] %v844_v53  ;;  %v845_v54 = vld [vmem:[#allocation2 + $0x19b0] sm:$0xff]  ;;  %v846_v55 = vld [vmem:[#allocation2 + $0x19b8] sm:$0xff] }
 0x1aa   :  { %v847_v56 = vld [vmem:[#allocation2 + $0x19c0] sm:$0xff]  ;;  %1869 = vst [vmem:[#allocation5 + $0x19b0] sm:$0xff] %v845_v54  ;;  %1870 = vst [vmem:[#allocation5 + $0x19b8] sm:$0xff] %v846_v55  ;;  %v848_v57 = vld [vmem:[#allocation2 + $0x19c8] sm:$0xff] }
 0x1ab   :  { %1871 = vst [vmem:[#allocation5 + $0x19c0] sm:$0xff] %v847_v56  ;;  %v849_v58 = vld [vmem:[#allocation2 + $0x19d0] sm:$0xff]  ;;  %v850_v59 = vld [vmem:[#allocation2 + $0x19d8] sm:$0xff]  ;;  %1872 = vst [vmem:[#allocation5 + $0x19c8] sm:$0xff] %v848_v57 }
 0x1ac   :  { %1873 = vst [vmem:[#allocation5 + $0x19d0] sm:$0xff] %v849_v58  ;;  %1874 = vst [vmem:[#allocation5 + $0x19d8] sm:$0xff] %v850_v59  ;;  %v851_v60 = vld [vmem:[#allocation2 + $0x19e0] sm:$0xff]  ;;  %v852_v61 = vld [vmem:[#allocation2 + $0x19e8] sm:$0xff] }
 0x1ad   :  { %v853_v62 = vld [vmem:[#allocation2 + $0x19f0] sm:$0xff]  ;;  %1875 = vst [vmem:[#allocation5 + $0x19e0] sm:$0xff] %v851_v60  ;;  %1876 = vst [vmem:[#allocation5 + $0x19e8] sm:$0xff] %v852_v61  ;;  %v854_v63 = vld [vmem:[#allocation2 + $0x19f8] sm:$0xff] }
 0x1ae   :  { %1877 = vst [vmem:[#allocation5 + $0x19f0] sm:$0xff] %v853_v62  ;;  %v855_v0 = vld [vmem:[#allocation2 + $0x1a00] sm:$0xff]  ;;  %v856_v1 = vld [vmem:[#allocation2 + $0x1a08] sm:$0xff]  ;;  %1878 = vst [vmem:[#allocation5 + $0x19f8] sm:$0xff] %v854_v63 }
 0x1af   :  { %1879 = vst [vmem:[#allocation5 + $0x1a00] sm:$0xff] %v855_v0  ;;  %1880 = vst [vmem:[#allocation5 + $0x1a08] sm:$0xff] %v856_v1  ;;  %v857_v2 = vld [vmem:[#allocation2 + $0x1a10] sm:$0xff]  ;;  %v858_v3 = vld [vmem:[#allocation2 + $0x1a18] sm:$0xff] }
 0x1b0   :  { %v859_v4 = vld [vmem:[#allocation2 + $0x1a20] sm:$0xff]  ;;  %1881 = vst [vmem:[#allocation5 + $0x1a10] sm:$0xff] %v857_v2  ;;  %1882 = vst [vmem:[#allocation5 + $0x1a18] sm:$0xff] %v858_v3  ;;  %v860_v5 = vld [vmem:[#allocation2 + $0x1a28] sm:$0xff] }
 0x1b1   :  { %1883 = vst [vmem:[#allocation5 + $0x1a20] sm:$0xff] %v859_v4  ;;  %v861_v6 = vld [vmem:[#allocation2 + $0x1a30] sm:$0xff]  ;;  %v862_v7 = vld [vmem:[#allocation2 + $0x1a38] sm:$0xff]  ;;  %1884 = vst [vmem:[#allocation5 + $0x1a28] sm:$0xff] %v860_v5 }
 0x1b2   :  { %1885 = vst [vmem:[#allocation5 + $0x1a30] sm:$0xff] %v861_v6  ;;  %1886 = vst [vmem:[#allocation5 + $0x1a38] sm:$0xff] %v862_v7  ;;  %v863_v8 = vld [vmem:[#allocation2 + $0x1a40] sm:$0xff]  ;;  %v864_v9 = vld [vmem:[#allocation2 + $0x1a48] sm:$0xff] }
 0x1b3   :  { %v865_v10 = vld [vmem:[#allocation2 + $0x1a50] sm:$0xff]  ;;  %1887 = vst [vmem:[#allocation5 + $0x1a40] sm:$0xff] %v863_v8  ;;  %1888 = vst [vmem:[#allocation5 + $0x1a48] sm:$0xff] %v864_v9  ;;  %v866_v11 = vld [vmem:[#allocation2 + $0x1a58] sm:$0xff] }
 0x1b4   :  { %1889 = vst [vmem:[#allocation5 + $0x1a50] sm:$0xff] %v865_v10  ;;  %v867_v12 = vld [vmem:[#allocation2 + $0x1a60] sm:$0xff]  ;;  %v868_v13 = vld [vmem:[#allocation2 + $0x1a68] sm:$0xff]  ;;  %1890 = vst [vmem:[#allocation5 + $0x1a58] sm:$0xff] %v866_v11 }
 0x1b5   :  { %1891 = vst [vmem:[#allocation5 + $0x1a60] sm:$0xff] %v867_v12  ;;  %1892 = vst [vmem:[#allocation5 + $0x1a68] sm:$0xff] %v868_v13  ;;  %v869_v14 = vld [vmem:[#allocation2 + $0x1a70] sm:$0xff]  ;;  %v870_v15 = vld [vmem:[#allocation2 + $0x1a78] sm:$0xff] }
 0x1b6   :  { %v871_v16 = vld [vmem:[#allocation2 + $0x1a80] sm:$0xff]  ;;  %1893 = vst [vmem:[#allocation5 + $0x1a70] sm:$0xff] %v869_v14  ;;  %1894 = vst [vmem:[#allocation5 + $0x1a78] sm:$0xff] %v870_v15  ;;  %v872_v17 = vld [vmem:[#allocation2 + $0x1a88] sm:$0xff] }
 0x1b7   :  { %1895 = vst [vmem:[#allocation5 + $0x1a80] sm:$0xff] %v871_v16  ;;  %v873_v18 = vld [vmem:[#allocation2 + $0x1a90] sm:$0xff]  ;;  %v874_v19 = vld [vmem:[#allocation2 + $0x1a98] sm:$0xff]  ;;  %1896 = vst [vmem:[#allocation5 + $0x1a88] sm:$0xff] %v872_v17 }
 0x1b8   :  { %1897 = vst [vmem:[#allocation5 + $0x1a90] sm:$0xff] %v873_v18  ;;  %1898 = vst [vmem:[#allocation5 + $0x1a98] sm:$0xff] %v874_v19  ;;  %v875_v20 = vld [vmem:[#allocation2 + $0x1aa0] sm:$0xff]  ;;  %v876_v21 = vld [vmem:[#allocation2 + $0x1aa8] sm:$0xff] }
 0x1b9   :  { %v877_v22 = vld [vmem:[#allocation2 + $0x1ab0] sm:$0xff]  ;;  %1899 = vst [vmem:[#allocation5 + $0x1aa0] sm:$0xff] %v875_v20  ;;  %1900 = vst [vmem:[#allocation5 + $0x1aa8] sm:$0xff] %v876_v21  ;;  %v878_v23 = vld [vmem:[#allocation2 + $0x1ab8] sm:$0xff] }
 0x1ba   :  { %1901 = vst [vmem:[#allocation5 + $0x1ab0] sm:$0xff] %v877_v22  ;;  %v879_v24 = vld [vmem:[#allocation2 + $0x1ac0] sm:$0xff]  ;;  %v880_v25 = vld [vmem:[#allocation2 + $0x1ac8] sm:$0xff]  ;;  %1902 = vst [vmem:[#allocation5 + $0x1ab8] sm:$0xff] %v878_v23 }
 0x1bb   :  { %1903 = vst [vmem:[#allocation5 + $0x1ac0] sm:$0xff] %v879_v24  ;;  %1904 = vst [vmem:[#allocation5 + $0x1ac8] sm:$0xff] %v880_v25  ;;  %v881_v26 = vld [vmem:[#allocation2 + $0x1ad0] sm:$0xff]  ;;  %v882_v27 = vld [vmem:[#allocation2 + $0x1ad8] sm:$0xff] }
 0x1bc   :  { %v883_v28 = vld [vmem:[#allocation2 + $0x1ae0] sm:$0xff]  ;;  %1905 = vst [vmem:[#allocation5 + $0x1ad0] sm:$0xff] %v881_v26  ;;  %1906 = vst [vmem:[#allocation5 + $0x1ad8] sm:$0xff] %v882_v27  ;;  %v884_v29 = vld [vmem:[#allocation2 + $0x1ae8] sm:$0xff] }
 0x1bd   :  { %1907 = vst [vmem:[#allocation5 + $0x1ae0] sm:$0xff] %v883_v28  ;;  %v885_v30 = vld [vmem:[#allocation2 + $0x1af0] sm:$0xff]  ;;  %v886_v31 = vld [vmem:[#allocation2 + $0x1af8] sm:$0xff]  ;;  %1908 = vst [vmem:[#allocation5 + $0x1ae8] sm:$0xff] %v884_v29 }
 0x1be   :  { %1909 = vst [vmem:[#allocation5 + $0x1af0] sm:$0xff] %v885_v30  ;;  %1910 = vst [vmem:[#allocation5 + $0x1af8] sm:$0xff] %v886_v31  ;;  %v887_v32 = vld [vmem:[#allocation2 + $0x1b00] sm:$0xff]  ;;  %v888_v33 = vld [vmem:[#allocation2 + $0x1b08] sm:$0xff] }
 0x1bf   :  { %v889_v34 = vld [vmem:[#allocation2 + $0x1b10] sm:$0xff]  ;;  %1911 = vst [vmem:[#allocation5 + $0x1b00] sm:$0xff] %v887_v32  ;;  %1912 = vst [vmem:[#allocation5 + $0x1b08] sm:$0xff] %v888_v33  ;;  %v890_v35 = vld [vmem:[#allocation2 + $0x1b18] sm:$0xff] }
 0x1c0   :  { %1913 = vst [vmem:[#allocation5 + $0x1b10] sm:$0xff] %v889_v34  ;;  %v891_v36 = vld [vmem:[#allocation2 + $0x1b20] sm:$0xff]  ;;  %v892_v37 = vld [vmem:[#allocation2 + $0x1b28] sm:$0xff]  ;;  %1914 = vst [vmem:[#allocation5 + $0x1b18] sm:$0xff] %v890_v35 }
 0x1c1   :  { %1915 = vst [vmem:[#allocation5 + $0x1b20] sm:$0xff] %v891_v36  ;;  %1916 = vst [vmem:[#allocation5 + $0x1b28] sm:$0xff] %v892_v37  ;;  %v893_v38 = vld [vmem:[#allocation2 + $0x1b30] sm:$0xff]  ;;  %v894_v39 = vld [vmem:[#allocation2 + $0x1b38] sm:$0xff] }
 0x1c2   :  { %v895_v40 = vld [vmem:[#allocation2 + $0x1b40] sm:$0xff]  ;;  %1917 = vst [vmem:[#allocation5 + $0x1b30] sm:$0xff] %v893_v38  ;;  %1918 = vst [vmem:[#allocation5 + $0x1b38] sm:$0xff] %v894_v39  ;;  %v896_v41 = vld [vmem:[#allocation2 + $0x1b48] sm:$0xff] }
 0x1c3   :  { %1919 = vst [vmem:[#allocation5 + $0x1b40] sm:$0xff] %v895_v40  ;;  %v897_v42 = vld [vmem:[#allocation2 + $0x1b50] sm:$0xff]  ;;  %v898_v43 = vld [vmem:[#allocation2 + $0x1b58] sm:$0xff]  ;;  %1920 = vst [vmem:[#allocation5 + $0x1b48] sm:$0xff] %v896_v41 }
 0x1c4   :  { %1921 = vst [vmem:[#allocation5 + $0x1b50] sm:$0xff] %v897_v42  ;;  %1922 = vst [vmem:[#allocation5 + $0x1b58] sm:$0xff] %v898_v43  ;;  %v899_v44 = vld [vmem:[#allocation2 + $0x1b60] sm:$0xff]  ;;  %v900_v45 = vld [vmem:[#allocation2 + $0x1b68] sm:$0xff] }
 0x1c5   :  { %v901_v46 = vld [vmem:[#allocation2 + $0x1b70] sm:$0xff]  ;;  %1923 = vst [vmem:[#allocation5 + $0x1b60] sm:$0xff] %v899_v44  ;;  %1924 = vst [vmem:[#allocation5 + $0x1b68] sm:$0xff] %v900_v45  ;;  %v902_v47 = vld [vmem:[#allocation2 + $0x1b78] sm:$0xff] }
 0x1c6   :  { %1925 = vst [vmem:[#allocation5 + $0x1b70] sm:$0xff] %v901_v46  ;;  %v903_v48 = vld [vmem:[#allocation2 + $0x1b80] sm:$0xff]  ;;  %v904_v49 = vld [vmem:[#allocation2 + $0x1b88] sm:$0xff]  ;;  %1926 = vst [vmem:[#allocation5 + $0x1b78] sm:$0xff] %v902_v47 }
 0x1c7   :  { %1927 = vst [vmem:[#allocation5 + $0x1b80] sm:$0xff] %v903_v48  ;;  %1928 = vst [vmem:[#allocation5 + $0x1b88] sm:$0xff] %v904_v49  ;;  %v905_v50 = vld [vmem:[#allocation2 + $0x1b90] sm:$0xff]  ;;  %v906_v51 = vld [vmem:[#allocation2 + $0x1b98] sm:$0xff] }
 0x1c8   :  { %v907_v52 = vld [vmem:[#allocation2 + $0x1ba0] sm:$0xff]  ;;  %1929 = vst [vmem:[#allocation5 + $0x1b90] sm:$0xff] %v905_v50  ;;  %1930 = vst [vmem:[#allocation5 + $0x1b98] sm:$0xff] %v906_v51  ;;  %v908_v53 = vld [vmem:[#allocation2 + $0x1ba8] sm:$0xff] }
 0x1c9   :  { %1931 = vst [vmem:[#allocation5 + $0x1ba0] sm:$0xff] %v907_v52  ;;  %v909_v54 = vld [vmem:[#allocation2 + $0x1bb0] sm:$0xff]  ;;  %v910_v55 = vld [vmem:[#allocation2 + $0x1bb8] sm:$0xff]  ;;  %1932 = vst [vmem:[#allocation5 + $0x1ba8] sm:$0xff] %v908_v53 }
 0x1ca   :  { %1933 = vst [vmem:[#allocation5 + $0x1bb0] sm:$0xff] %v909_v54  ;;  %1934 = vst [vmem:[#allocation5 + $0x1bb8] sm:$0xff] %v910_v55  ;;  %v911_v56 = vld [vmem:[#allocation2 + $0x1bc0] sm:$0xff]  ;;  %v912_v57 = vld [vmem:[#allocation2 + $0x1bc8] sm:$0xff] }
 0x1cb   :  { %v913_v58 = vld [vmem:[#allocation2 + $0x1bd0] sm:$0xff]  ;;  %1935 = vst [vmem:[#allocation5 + $0x1bc0] sm:$0xff] %v911_v56  ;;  %1936 = vst [vmem:[#allocation5 + $0x1bc8] sm:$0xff] %v912_v57  ;;  %v914_v59 = vld [vmem:[#allocation2 + $0x1bd8] sm:$0xff] }
 0x1cc   :  { %1937 = vst [vmem:[#allocation5 + $0x1bd0] sm:$0xff] %v913_v58  ;;  %v915_v60 = vld [vmem:[#allocation2 + $0x1be0] sm:$0xff]  ;;  %v916_v61 = vld [vmem:[#allocation2 + $0x1be8] sm:$0xff]  ;;  %1938 = vst [vmem:[#allocation5 + $0x1bd8] sm:$0xff] %v914_v59 }
 0x1cd   :  { %1939 = vst [vmem:[#allocation5 + $0x1be0] sm:$0xff] %v915_v60  ;;  %1940 = vst [vmem:[#allocation5 + $0x1be8] sm:$0xff] %v916_v61  ;;  %v917_v62 = vld [vmem:[#allocation2 + $0x1bf0] sm:$0xff]  ;;  %v918_v63 = vld [vmem:[#allocation2 + $0x1bf8] sm:$0xff] }
 0x1ce   :  { %v919_v0 = vld [vmem:[#allocation2 + $0x1c00] sm:$0xff]  ;;  %1941 = vst [vmem:[#allocation5 + $0x1bf0] sm:$0xff] %v917_v62  ;;  %1942 = vst [vmem:[#allocation5 + $0x1bf8] sm:$0xff] %v918_v63  ;;  %v920_v1 = vld [vmem:[#allocation2 + $0x1c08] sm:$0xff] }
 0x1cf   :  { %1943 = vst [vmem:[#allocation5 + $0x1c00] sm:$0xff] %v919_v0  ;;  %v921_v2 = vld [vmem:[#allocation2 + $0x1c10] sm:$0xff]  ;;  %v922_v3 = vld [vmem:[#allocation2 + $0x1c18] sm:$0xff]  ;;  %1944 = vst [vmem:[#allocation5 + $0x1c08] sm:$0xff] %v920_v1 }
 0x1d0   :  { %1945 = vst [vmem:[#allocation5 + $0x1c10] sm:$0xff] %v921_v2  ;;  %1946 = vst [vmem:[#allocation5 + $0x1c18] sm:$0xff] %v922_v3  ;;  %v923_v4 = vld [vmem:[#allocation2 + $0x1c20] sm:$0xff]  ;;  %v924_v5 = vld [vmem:[#allocation2 + $0x1c28] sm:$0xff] }
 0x1d1   :  { %v925_v6 = vld [vmem:[#allocation2 + $0x1c30] sm:$0xff]  ;;  %1947 = vst [vmem:[#allocation5 + $0x1c20] sm:$0xff] %v923_v4  ;;  %1948 = vst [vmem:[#allocation5 + $0x1c28] sm:$0xff] %v924_v5  ;;  %v926_v7 = vld [vmem:[#allocation2 + $0x1c38] sm:$0xff] }
 0x1d2   :  { %1949 = vst [vmem:[#allocation5 + $0x1c30] sm:$0xff] %v925_v6  ;;  %v927_v8 = vld [vmem:[#allocation2 + $0x1c40] sm:$0xff]  ;;  %v928_v9 = vld [vmem:[#allocation2 + $0x1c48] sm:$0xff]  ;;  %1950 = vst [vmem:[#allocation5 + $0x1c38] sm:$0xff] %v926_v7 }
 0x1d3   :  { %1951 = vst [vmem:[#allocation5 + $0x1c40] sm:$0xff] %v927_v8  ;;  %1952 = vst [vmem:[#allocation5 + $0x1c48] sm:$0xff] %v928_v9  ;;  %v929_v10 = vld [vmem:[#allocation2 + $0x1c50] sm:$0xff]  ;;  %v930_v11 = vld [vmem:[#allocation2 + $0x1c58] sm:$0xff] }
 0x1d4   :  { %v931_v12 = vld [vmem:[#allocation2 + $0x1c60] sm:$0xff]  ;;  %1953 = vst [vmem:[#allocation5 + $0x1c50] sm:$0xff] %v929_v10  ;;  %1954 = vst [vmem:[#allocation5 + $0x1c58] sm:$0xff] %v930_v11  ;;  %v932_v13 = vld [vmem:[#allocation2 + $0x1c68] sm:$0xff] }
 0x1d5   :  { %1955 = vst [vmem:[#allocation5 + $0x1c60] sm:$0xff] %v931_v12  ;;  %v933_v14 = vld [vmem:[#allocation2 + $0x1c70] sm:$0xff]  ;;  %v934_v15 = vld [vmem:[#allocation2 + $0x1c78] sm:$0xff]  ;;  %1956 = vst [vmem:[#allocation5 + $0x1c68] sm:$0xff] %v932_v13 }
 0x1d6   :  { %1957 = vst [vmem:[#allocation5 + $0x1c70] sm:$0xff] %v933_v14  ;;  %1958 = vst [vmem:[#allocation5 + $0x1c78] sm:$0xff] %v934_v15  ;;  %v935_v16 = vld [vmem:[#allocation2 + $0x1c80] sm:$0xff]  ;;  %v936_v17 = vld [vmem:[#allocation2 + $0x1c88] sm:$0xff] }
 0x1d7   :  { %v937_v18 = vld [vmem:[#allocation2 + $0x1c90] sm:$0xff]  ;;  %1959 = vst [vmem:[#allocation5 + $0x1c80] sm:$0xff] %v935_v16  ;;  %1960 = vst [vmem:[#allocation5 + $0x1c88] sm:$0xff] %v936_v17  ;;  %v938_v19 = vld [vmem:[#allocation2 + $0x1c98] sm:$0xff] }
 0x1d8   :  { %1961 = vst [vmem:[#allocation5 + $0x1c90] sm:$0xff] %v937_v18  ;;  %v939_v20 = vld [vmem:[#allocation2 + $0x1ca0] sm:$0xff]  ;;  %v940_v21 = vld [vmem:[#allocation2 + $0x1ca8] sm:$0xff]  ;;  %1962 = vst [vmem:[#allocation5 + $0x1c98] sm:$0xff] %v938_v19 }
 0x1d9   :  { %1963 = vst [vmem:[#allocation5 + $0x1ca0] sm:$0xff] %v939_v20  ;;  %1964 = vst [vmem:[#allocation5 + $0x1ca8] sm:$0xff] %v940_v21  ;;  %v941_v22 = vld [vmem:[#allocation2 + $0x1cb0] sm:$0xff]  ;;  %v942_v23 = vld [vmem:[#allocation2 + $0x1cb8] sm:$0xff] }
 0x1da   :  { %v943_v24 = vld [vmem:[#allocation2 + $0x1cc0] sm:$0xff]  ;;  %1965 = vst [vmem:[#allocation5 + $0x1cb0] sm:$0xff] %v941_v22  ;;  %1966 = vst [vmem:[#allocation5 + $0x1cb8] sm:$0xff] %v942_v23  ;;  %v944_v25 = vld [vmem:[#allocation2 + $0x1cc8] sm:$0xff] }
 0x1db   :  { %1967 = vst [vmem:[#allocation5 + $0x1cc0] sm:$0xff] %v943_v24  ;;  %v945_v26 = vld [vmem:[#allocation2 + $0x1cd0] sm:$0xff]  ;;  %v946_v27 = vld [vmem:[#allocation2 + $0x1cd8] sm:$0xff]  ;;  %1968 = vst [vmem:[#allocation5 + $0x1cc8] sm:$0xff] %v944_v25 }
 0x1dc   :  { %1969 = vst [vmem:[#allocation5 + $0x1cd0] sm:$0xff] %v945_v26  ;;  %1970 = vst [vmem:[#allocation5 + $0x1cd8] sm:$0xff] %v946_v27  ;;  %v947_v28 = vld [vmem:[#allocation2 + $0x1ce0] sm:$0xff]  ;;  %v948_v29 = vld [vmem:[#allocation2 + $0x1ce8] sm:$0xff] }
 0x1dd   :  { %v949_v30 = vld [vmem:[#allocation2 + $0x1cf0] sm:$0xff]  ;;  %1971 = vst [vmem:[#allocation5 + $0x1ce0] sm:$0xff] %v947_v28  ;;  %1972 = vst [vmem:[#allocation5 + $0x1ce8] sm:$0xff] %v948_v29  ;;  %v950_v31 = vld [vmem:[#allocation2 + $0x1cf8] sm:$0xff] }
 0x1de   :  { %1973 = vst [vmem:[#allocation5 + $0x1cf0] sm:$0xff] %v949_v30  ;;  %v951_v32 = vld [vmem:[#allocation2 + $0x1d00] sm:$0xff]  ;;  %v952_v33 = vld [vmem:[#allocation2 + $0x1d08] sm:$0xff]  ;;  %1974 = vst [vmem:[#allocation5 + $0x1cf8] sm:$0xff] %v950_v31 }
 0x1df   :  { %1975 = vst [vmem:[#allocation5 + $0x1d00] sm:$0xff] %v951_v32  ;;  %1976 = vst [vmem:[#allocation5 + $0x1d08] sm:$0xff] %v952_v33  ;;  %v953_v34 = vld [vmem:[#allocation2 + $0x1d10] sm:$0xff]  ;;  %v954_v35 = vld [vmem:[#allocation2 + $0x1d18] sm:$0xff] }
 0x1e0   :  { %v955_v36 = vld [vmem:[#allocation2 + $0x1d20] sm:$0xff]  ;;  %1977 = vst [vmem:[#allocation5 + $0x1d10] sm:$0xff] %v953_v34  ;;  %1978 = vst [vmem:[#allocation5 + $0x1d18] sm:$0xff] %v954_v35  ;;  %v956_v37 = vld [vmem:[#allocation2 + $0x1d28] sm:$0xff] }
 0x1e1   :  { %1979 = vst [vmem:[#allocation5 + $0x1d20] sm:$0xff] %v955_v36  ;;  %v957_v38 = vld [vmem:[#allocation2 + $0x1d30] sm:$0xff]  ;;  %v958_v39 = vld [vmem:[#allocation2 + $0x1d38] sm:$0xff]  ;;  %1980 = vst [vmem:[#allocation5 + $0x1d28] sm:$0xff] %v956_v37 }
 0x1e2   :  { %1981 = vst [vmem:[#allocation5 + $0x1d30] sm:$0xff] %v957_v38  ;;  %1982 = vst [vmem:[#allocation5 + $0x1d38] sm:$0xff] %v958_v39  ;;  %v959_v40 = vld [vmem:[#allocation2 + $0x1d40] sm:$0xff]  ;;  %v960_v41 = vld [vmem:[#allocation2 + $0x1d48] sm:$0xff] }
 0x1e3   :  { %v961_v42 = vld [vmem:[#allocation2 + $0x1d50] sm:$0xff]  ;;  %1983 = vst [vmem:[#allocation5 + $0x1d40] sm:$0xff] %v959_v40  ;;  %1984 = vst [vmem:[#allocation5 + $0x1d48] sm:$0xff] %v960_v41  ;;  %v962_v43 = vld [vmem:[#allocation2 + $0x1d58] sm:$0xff] }
 0x1e4   :  { %1985 = vst [vmem:[#allocation5 + $0x1d50] sm:$0xff] %v961_v42  ;;  %v963_v44 = vld [vmem:[#allocation2 + $0x1d60] sm:$0xff]  ;;  %v964_v45 = vld [vmem:[#allocation2 + $0x1d68] sm:$0xff]  ;;  %1986 = vst [vmem:[#allocation5 + $0x1d58] sm:$0xff] %v962_v43 }
 0x1e5   :  { %1987 = vst [vmem:[#allocation5 + $0x1d60] sm:$0xff] %v963_v44  ;;  %1988 = vst [vmem:[#allocation5 + $0x1d68] sm:$0xff] %v964_v45  ;;  %v965_v46 = vld [vmem:[#allocation2 + $0x1d70] sm:$0xff]  ;;  %v966_v47 = vld [vmem:[#allocation2 + $0x1d78] sm:$0xff] }
 0x1e6   :  { %v967_v48 = vld [vmem:[#allocation2 + $0x1d80] sm:$0xff]  ;;  %1989 = vst [vmem:[#allocation5 + $0x1d70] sm:$0xff] %v965_v46  ;;  %1990 = vst [vmem:[#allocation5 + $0x1d78] sm:$0xff] %v966_v47  ;;  %v968_v49 = vld [vmem:[#allocation2 + $0x1d88] sm:$0xff] }
 0x1e7   :  { %1991 = vst [vmem:[#allocation5 + $0x1d80] sm:$0xff] %v967_v48  ;;  %v969_v50 = vld [vmem:[#allocation2 + $0x1d90] sm:$0xff]  ;;  %v970_v51 = vld [vmem:[#allocation2 + $0x1d98] sm:$0xff]  ;;  %1992 = vst [vmem:[#allocation5 + $0x1d88] sm:$0xff] %v968_v49 }
 0x1e8   :  { %1993 = vst [vmem:[#allocation5 + $0x1d90] sm:$0xff] %v969_v50  ;;  %1994 = vst [vmem:[#allocation5 + $0x1d98] sm:$0xff] %v970_v51  ;;  %v971_v52 = vld [vmem:[#allocation2 + $0x1da0] sm:$0xff]  ;;  %v972_v53 = vld [vmem:[#allocation2 + $0x1da8] sm:$0xff] }
 0x1e9   :  { %v973_v54 = vld [vmem:[#allocation2 + $0x1db0] sm:$0xff]  ;;  %1995 = vst [vmem:[#allocation5 + $0x1da0] sm:$0xff] %v971_v52  ;;  %1996 = vst [vmem:[#allocation5 + $0x1da8] sm:$0xff] %v972_v53  ;;  %v974_v55 = vld [vmem:[#allocation2 + $0x1db8] sm:$0xff] }
 0x1ea   :  { %1997 = vst [vmem:[#allocation5 + $0x1db0] sm:$0xff] %v973_v54  ;;  %v975_v56 = vld [vmem:[#allocation2 + $0x1dc0] sm:$0xff]  ;;  %v976_v57 = vld [vmem:[#allocation2 + $0x1dc8] sm:$0xff]  ;;  %1998 = vst [vmem:[#allocation5 + $0x1db8] sm:$0xff] %v974_v55 }
 0x1eb   :  { %1999 = vst [vmem:[#allocation5 + $0x1dc0] sm:$0xff] %v975_v56  ;;  %2000 = vst [vmem:[#allocation5 + $0x1dc8] sm:$0xff] %v976_v57  ;;  %v977_v58 = vld [vmem:[#allocation2 + $0x1dd0] sm:$0xff]  ;;  %v978_v59 = vld [vmem:[#allocation2 + $0x1dd8] sm:$0xff] }
 0x1ec   :  { %v979_v60 = vld [vmem:[#allocation2 + $0x1de0] sm:$0xff]  ;;  %2001 = vst [vmem:[#allocation5 + $0x1dd0] sm:$0xff] %v977_v58  ;;  %2002 = vst [vmem:[#allocation5 + $0x1dd8] sm:$0xff] %v978_v59  ;;  %v980_v61 = vld [vmem:[#allocation2 + $0x1de8] sm:$0xff] }
 0x1ed   :  { %2003 = vst [vmem:[#allocation5 + $0x1de0] sm:$0xff] %v979_v60  ;;  %v981_v62 = vld [vmem:[#allocation2 + $0x1df0] sm:$0xff]  ;;  %v982_v63 = vld [vmem:[#allocation2 + $0x1df8] sm:$0xff]  ;;  %2004 = vst [vmem:[#allocation5 + $0x1de8] sm:$0xff] %v980_v61 }
 0x1ee   :  { %2005 = vst [vmem:[#allocation5 + $0x1df0] sm:$0xff] %v981_v62  ;;  %2006 = vst [vmem:[#allocation5 + $0x1df8] sm:$0xff] %v982_v63  ;;  %v983_v0 = vld [vmem:[#allocation2 + $0x1e00] sm:$0xff]  ;;  %v984_v1 = vld [vmem:[#allocation2 + $0x1e08] sm:$0xff] }
 0x1ef   :  { %v985_v2 = vld [vmem:[#allocation2 + $0x1e10] sm:$0xff]  ;;  %2007 = vst [vmem:[#allocation5 + $0x1e00] sm:$0xff] %v983_v0  ;;  %2008 = vst [vmem:[#allocation5 + $0x1e08] sm:$0xff] %v984_v1  ;;  %v986_v3 = vld [vmem:[#allocation2 + $0x1e18] sm:$0xff] }
 0x1f0   :  { %2009 = vst [vmem:[#allocation5 + $0x1e10] sm:$0xff] %v985_v2  ;;  %v987_v4 = vld [vmem:[#allocation2 + $0x1e20] sm:$0xff]  ;;  %v988_v5 = vld [vmem:[#allocation2 + $0x1e28] sm:$0xff]  ;;  %2010 = vst [vmem:[#allocation5 + $0x1e18] sm:$0xff] %v986_v3 }
 0x1f1   :  { %2011 = vst [vmem:[#allocation5 + $0x1e20] sm:$0xff] %v987_v4  ;;  %2012 = vst [vmem:[#allocation5 + $0x1e28] sm:$0xff] %v988_v5  ;;  %v989_v6 = vld [vmem:[#allocation2 + $0x1e30] sm:$0xff]  ;;  %v990_v7 = vld [vmem:[#allocation2 + $0x1e38] sm:$0xff] }
 0x1f2   :  { %v991_v8 = vld [vmem:[#allocation2 + $0x1e40] sm:$0xff]  ;;  %2013 = vst [vmem:[#allocation5 + $0x1e30] sm:$0xff] %v989_v6  ;;  %2014 = vst [vmem:[#allocation5 + $0x1e38] sm:$0xff] %v990_v7  ;;  %v992_v9 = vld [vmem:[#allocation2 + $0x1e48] sm:$0xff] }
 0x1f3   :  { %2015 = vst [vmem:[#allocation5 + $0x1e40] sm:$0xff] %v991_v8  ;;  %v993_v10 = vld [vmem:[#allocation2 + $0x1e50] sm:$0xff]  ;;  %v994_v11 = vld [vmem:[#allocation2 + $0x1e58] sm:$0xff]  ;;  %2016 = vst [vmem:[#allocation5 + $0x1e48] sm:$0xff] %v992_v9 }
 0x1f4   :  { %2017 = vst [vmem:[#allocation5 + $0x1e50] sm:$0xff] %v993_v10  ;;  %2018 = vst [vmem:[#allocation5 + $0x1e58] sm:$0xff] %v994_v11  ;;  %v995_v12 = vld [vmem:[#allocation2 + $0x1e60] sm:$0xff]  ;;  %v996_v13 = vld [vmem:[#allocation2 + $0x1e68] sm:$0xff] }
 0x1f5   :  { %v997_v14 = vld [vmem:[#allocation2 + $0x1e70] sm:$0xff]  ;;  %2019 = vst [vmem:[#allocation5 + $0x1e60] sm:$0xff] %v995_v12  ;;  %2020 = vst [vmem:[#allocation5 + $0x1e68] sm:$0xff] %v996_v13  ;;  %v998_v15 = vld [vmem:[#allocation2 + $0x1e78] sm:$0xff] }
 0x1f6   :  { %2021 = vst [vmem:[#allocation5 + $0x1e70] sm:$0xff] %v997_v14  ;;  %v999_v16 = vld [vmem:[#allocation2 + $0x1e80] sm:$0xff]  ;;  %v1000_v17 = vld [vmem:[#allocation2 + $0x1e88] sm:$0xff]  ;;  %2022 = vst [vmem:[#allocation5 + $0x1e78] sm:$0xff] %v998_v15 }
 0x1f7   :  { %2023 = vst [vmem:[#allocation5 + $0x1e80] sm:$0xff] %v999_v16  ;;  %2024 = vst [vmem:[#allocation5 + $0x1e88] sm:$0xff] %v1000_v17  ;;  %v1001_v18 = vld [vmem:[#allocation2 + $0x1e90] sm:$0xff]  ;;  %v1002_v19 = vld [vmem:[#allocation2 + $0x1e98] sm:$0xff] }
 0x1f8   :  { %v1003_v20 = vld [vmem:[#allocation2 + $0x1ea0] sm:$0xff]  ;;  %2025 = vst [vmem:[#allocation5 + $0x1e90] sm:$0xff] %v1001_v18  ;;  %2026 = vst [vmem:[#allocation5 + $0x1e98] sm:$0xff] %v1002_v19  ;;  %v1004_v21 = vld [vmem:[#allocation2 + $0x1ea8] sm:$0xff] }
 0x1f9   :  { %2027 = vst [vmem:[#allocation5 + $0x1ea0] sm:$0xff] %v1003_v20  ;;  %v1005_v22 = vld [vmem:[#allocation2 + $0x1eb0] sm:$0xff]  ;;  %v1006_v23 = vld [vmem:[#allocation2 + $0x1eb8] sm:$0xff]  ;;  %2028 = vst [vmem:[#allocation5 + $0x1ea8] sm:$0xff] %v1004_v21 }
 0x1fa   :  { %2029 = vst [vmem:[#allocation5 + $0x1eb0] sm:$0xff] %v1005_v22  ;;  %2030 = vst [vmem:[#allocation5 + $0x1eb8] sm:$0xff] %v1006_v23  ;;  %v1007_v24 = vld [vmem:[#allocation2 + $0x1ec0] sm:$0xff]  ;;  %v1008_v25 = vld [vmem:[#allocation2 + $0x1ec8] sm:$0xff] }
 0x1fb   :  { %v1009_v26 = vld [vmem:[#allocation2 + $0x1ed0] sm:$0xff]  ;;  %2031 = vst [vmem:[#allocation5 + $0x1ec0] sm:$0xff] %v1007_v24  ;;  %2032 = vst [vmem:[#allocation5 + $0x1ec8] sm:$0xff] %v1008_v25  ;;  %v1010_v27 = vld [vmem:[#allocation2 + $0x1ed8] sm:$0xff] }
 0x1fc   :  { %2033 = vst [vmem:[#allocation5 + $0x1ed0] sm:$0xff] %v1009_v26  ;;  %v1011_v28 = vld [vmem:[#allocation2 + $0x1ee0] sm:$0xff]  ;;  %v1012_v29 = vld [vmem:[#allocation2 + $0x1ee8] sm:$0xff]  ;;  %2034 = vst [vmem:[#allocation5 + $0x1ed8] sm:$0xff] %v1010_v27 }
 0x1fd   :  { %2035 = vst [vmem:[#allocation5 + $0x1ee0] sm:$0xff] %v1011_v28  ;;  %2036 = vst [vmem:[#allocation5 + $0x1ee8] sm:$0xff] %v1012_v29  ;;  %v1013_v30 = vld [vmem:[#allocation2 + $0x1ef0] sm:$0xff]  ;;  %v1014_v31 = vld [vmem:[#allocation2 + $0x1ef8] sm:$0xff] }
 0x1fe   :  { %v1015_v32 = vld [vmem:[#allocation2 + $0x1f00] sm:$0xff]  ;;  %2037 = vst [vmem:[#allocation5 + $0x1ef0] sm:$0xff] %v1013_v30  ;;  %2038 = vst [vmem:[#allocation5 + $0x1ef8] sm:$0xff] %v1014_v31  ;;  %v1016_v33 = vld [vmem:[#allocation2 + $0x1f08] sm:$0xff] }
 0x1ff   :  { %2039 = vst [vmem:[#allocation5 + $0x1f00] sm:$0xff] %v1015_v32  ;;  %v1017_v34 = vld [vmem:[#allocation2 + $0x1f10] sm:$0xff]  ;;  %v1018_v35 = vld [vmem:[#allocation2 + $0x1f18] sm:$0xff]  ;;  %2040 = vst [vmem:[#allocation5 + $0x1f08] sm:$0xff] %v1016_v33 }
 0x200   :  { %2041 = vst [vmem:[#allocation5 + $0x1f10] sm:$0xff] %v1017_v34  ;;  %2042 = vst [vmem:[#allocation5 + $0x1f18] sm:$0xff] %v1018_v35  ;;  %v1019_v36 = vld [vmem:[#allocation2 + $0x1f20] sm:$0xff]  ;;  %v1020_v37 = vld [vmem:[#allocation2 + $0x1f28] sm:$0xff] }
 0x201   :  { %v1021_v38 = vld [vmem:[#allocation2 + $0x1f30] sm:$0xff]  ;;  %2043 = vst [vmem:[#allocation5 + $0x1f20] sm:$0xff] %v1019_v36  ;;  %2044 = vst [vmem:[#allocation5 + $0x1f28] sm:$0xff] %v1020_v37  ;;  %v1022_v39 = vld [vmem:[#allocation2 + $0x1f38] sm:$0xff] }
 0x202   :  { %2045 = vst [vmem:[#allocation5 + $0x1f30] sm:$0xff] %v1021_v38  ;;  %v1023_v40 = vld [vmem:[#allocation2 + $0x1f40] sm:$0xff]  ;;  %v1024_v41 = vld [vmem:[#allocation2 + $0x1f48] sm:$0xff]  ;;  %2046 = vst [vmem:[#allocation5 + $0x1f38] sm:$0xff] %v1022_v39 }
 0x203   :  { %2047 = vst [vmem:[#allocation5 + $0x1f40] sm:$0xff] %v1023_v40  ;;  %2048 = vst [vmem:[#allocation5 + $0x1f48] sm:$0xff] %v1024_v41  ;;  %v1025_v42 = vld [vmem:[#allocation2 + $0x1f50] sm:$0xff]  ;;  %v1026_v43 = vld [vmem:[#allocation2 + $0x1f58] sm:$0xff] }
 0x204   :  { %v1027_v44 = vld [vmem:[#allocation2 + $0x1f60] sm:$0xff]  ;;  %2049 = vst [vmem:[#allocation5 + $0x1f50] sm:$0xff] %v1025_v42  ;;  %2050 = vst [vmem:[#allocation5 + $0x1f58] sm:$0xff] %v1026_v43  ;;  %v1028_v45 = vld [vmem:[#allocation2 + $0x1f68] sm:$0xff] }
 0x205   :  { %2051 = vst [vmem:[#allocation5 + $0x1f60] sm:$0xff] %v1027_v44  ;;  %v1029_v46 = vld [vmem:[#allocation2 + $0x1f70] sm:$0xff]  ;;  %v1030_v47 = vld [vmem:[#allocation2 + $0x1f78] sm:$0xff]  ;;  %2052 = vst [vmem:[#allocation5 + $0x1f68] sm:$0xff] %v1028_v45 }
 0x206   :  { %2053 = vst [vmem:[#allocation5 + $0x1f70] sm:$0xff] %v1029_v46  ;;  %2054 = vst [vmem:[#allocation5 + $0x1f78] sm:$0xff] %v1030_v47  ;;  %v1031_v48 = vld [vmem:[#allocation2 + $0x1f80] sm:$0xff]  ;;  %v1032_v49 = vld [vmem:[#allocation2 + $0x1f88] sm:$0xff] }
 0x207   :  { %v1033_v50 = vld [vmem:[#allocation2 + $0x1f90] sm:$0xff]  ;;  %2055 = vst [vmem:[#allocation5 + $0x1f80] sm:$0xff] %v1031_v48  ;;  %2056 = vst [vmem:[#allocation5 + $0x1f88] sm:$0xff] %v1032_v49  ;;  %v1034_v51 = vld [vmem:[#allocation2 + $0x1f98] sm:$0xff] }
 0x208   :  { %2057 = vst [vmem:[#allocation5 + $0x1f90] sm:$0xff] %v1033_v50  ;;  %v1035_v52 = vld [vmem:[#allocation2 + $0x1fa0] sm:$0xff]  ;;  %v1036_v53 = vld [vmem:[#allocation2 + $0x1fa8] sm:$0xff]  ;;  %2058 = vst [vmem:[#allocation5 + $0x1f98] sm:$0xff] %v1034_v51 }
 0x209   :  { %2059 = vst [vmem:[#allocation5 + $0x1fa0] sm:$0xff] %v1035_v52  ;;  %2060 = vst [vmem:[#allocation5 + $0x1fa8] sm:$0xff] %v1036_v53  ;;  %v1037_v54 = vld [vmem:[#allocation2 + $0x1fb0] sm:$0xff]  ;;  %v1038_v55 = vld [vmem:[#allocation2 + $0x1fb8] sm:$0xff] }
 0x20a   :  { %v1039_v56 = vld [vmem:[#allocation2 + $0x1fc0] sm:$0xff]  ;;  %2061 = vst [vmem:[#allocation5 + $0x1fb0] sm:$0xff] %v1037_v54  ;;  %2062 = vst [vmem:[#allocation5 + $0x1fb8] sm:$0xff] %v1038_v55  ;;  %v1040_v57 = vld [vmem:[#allocation2 + $0x1fc8] sm:$0xff] }
 0x20b   :  { %2063 = vst [vmem:[#allocation5 + $0x1fc0] sm:$0xff] %v1039_v56  ;;  %v1041_v58 = vld [vmem:[#allocation2 + $0x1fd0] sm:$0xff]  ;;  %v1042_v59 = vld [vmem:[#allocation2 + $0x1fd8] sm:$0xff]  ;;  %2064 = vst [vmem:[#allocation5 + $0x1fc8] sm:$0xff] %v1040_v57 }
 0x20c   :  { %2065 = vst [vmem:[#allocation5 + $0x1fd0] sm:$0xff] %v1041_v58  ;;  %2066 = vst [vmem:[#allocation5 + $0x1fd8] sm:$0xff] %v1042_v59  ;;  %v1043_v60 = vld [vmem:[#allocation2 + $0x1fe0] sm:$0xff]  ;;  %v1044_v61 = vld [vmem:[#allocation2 + $0x1fe8] sm:$0xff] }
 0x20d   :  { %v1045_v62 = vld [vmem:[#allocation2 + $0x1ff0] sm:$0xff]  ;;  %2067 = vst [vmem:[#allocation5 + $0x1fe0] sm:$0xff] %v1043_v60  ;;  %2068 = vst [vmem:[#allocation5 + $0x1fe8] sm:$0xff] %v1044_v61  ;;  %v1046_v63 = vld [vmem:[#allocation2 + $0x1ff8] sm:$0xff] }
 0x20e   :  { %2069 = vst [vmem:[#allocation5 + $0x1ff0] sm:$0xff] %v1045_v62  ;;  %2070 = vst [vmem:[#allocation5 + $0x1ff8] sm:$0xff] %v1046_v63 }
 0x20f   :  { %2123 = shalt.err (!%p2120_p9)
}
 0x210   :  { %2082 = dma.vmem_to_hbm [thread:$0]  %s2077_s13, 131072, %s2163_s1, [#allocation4], %s2137_s9, %s2137_s9, %s2138_s10  }
 0x211   :  { %2134 = dma.done.wait [#allocation4], 131072  }
 0x212   :  { %2135 = vsyncadd [#allocation4], 4294836224 }
 0x213   :  { %2086 = vsyncpa [#allocation3], 1 }
 0x214   :  { %2087 = vsyncpa [#allocation4], 1 }

</bundles_post_ra>
